<compile_context>
chip_gen: v7x
topology: tpu7x:2x2x1
jax: 0.10.0
libtpu: 0.0.40
codegen_flags: <defaults>
</compile_context>

<pallas_src>
import functools

import jax
import jax.numpy as jnp
from jax.experimental import pallas as pl
from jax.experimental.pallas import tpu as pltpu


# ----------------------------------------------------------------------------
# Pallas kernel: fused 8-layer GEMM chain (matmul + bias + tanh per layer)
# ----------------------------------------------------------------------------
def _cae_fused_kernel(*refs, n_layers):
    """refs = (x, w0, b0, w1, b1, ..., w{L-1}, b{L-1}, out).

    x:  (Mpad, K0)   bf16   flattened (NCHW) input, rows padded to 8
    wi: (Ki, Ni)     bf16   dense per-layer matrix (conv folded in)
    bi: (1, Ni)      f32    per-output bias (channel bias repeated over HW)
    out:(Mpad, N7)   f32
    """
    x_ref = refs[0]
    out_ref = refs[1 + 2 * n_layers]

    h = x_ref[...]                                           # bf16 activations
    for layer in range(n_layers):
        w = refs[1 + 2 * layer][...]
        b = refs[2 + 2 * layer][...]
        acc = jnp.dot(h, w, preferred_element_type=jnp.float32) + b   # MXU + VPU
        if layer < n_layers - 1:
            h = jnp.tanh(acc).astype(jnp.bfloat16)           # f32 tanh (EUP), bf16 for next MXU
        else:
            out_ref[...] = acc                               # last layer: no tanh


def cae_fused_forward(layer_mats, x_flat):
    """x_flat: (Mpad, K0) bf16;  layer_mats: [(W bf16 (K,N), b f32 (1,N)), ...]."""
    n_layers = len(layer_mats)
    out_dim = layer_mats[-1][0].shape[1]
    args = [x_flat]
    for w, b in layer_mats:
        args.append(w)
        args.append(b)

    return pl.pallas_call(
        functools.partial(_cae_fused_kernel, n_layers=n_layers),
        out_shape=jax.ShapeDtypeStruct((x_flat.shape[0], out_dim), jnp.float32),
        # No grid: everything (weights + activations, ~3 MiB) is resident in VMEM.
        in_specs=[pl.BlockSpec(memory_space=pltpu.MemorySpace.VMEM)] * len(args),
        out_specs=pl.BlockSpec(memory_space=pltpu.MemorySpace.VMEM),
    )(*args)


# ----------------------------------------------------------------------------
# Host-side (init-time) folding of each conv layer into a dense matrix
# ----------------------------------------------------------------------------
def _conv_jacobian(apply_fn, in_chw):
    """Dense (Cin*H*W, Cout*OH*OW) matrix of a linear NCHW->NCHW map."""
    cin, h, w = in_chw
    k_in = cin * h * w
    basis = jnp.eye(k_in, dtype=jnp.float32).reshape(k_in, cin, h, w)
    out = apply_fn(basis)                                    # (k_in, OC, OH, OW)
    oc, oh, ow = out.shape[1], out.shape[2], out.shape[3]
    return out.reshape(k_in, oc * oh * ow), (oc, oh, ow)


def _conv2d_apply(w, stride, padding):
    """PyTorch-semantics Conv2d (no bias).  w: (OC, IC, k, k)."""
    def apply_fn(x):
        return jax.lax.conv_general_dilated(
            x, w, (stride, stride), [(padding, padding)] * 2,
            dimension_numbers=("NCHW", "OIHW", "NCHW"),
            precision=jax.lax.Precision.HIGHEST)
    return apply_fn


def _conv_transpose2d_apply(w, stride, padding):
    """PyTorch-semantics ConvTranspose2d (no bias).  w: (IC, OC, k, k)."""
    k = w.shape[2]
    eff = k - 1 - padding
    w_conv = jnp.flip(w, (2, 3)).transpose(1, 0, 2, 3)       # (OC, IC, k, k)

    def apply_fn(x):
        return jax.lax.conv_general_dilated(
            x, w_conv, (1, 1), [(eff, eff)] * 2, lhs_dilation=(stride, stride),
            dimension_numbers=("NCHW", "OIHW", "NCHW"),
            precision=jax.lax.Precision.HIGHEST)
    return apply_fn


def prepare_layer_mats(params, enc_cfg, dec_cfg, in_chw):
    """Fold every layer into (dense bf16 matrix, f32 bias row), NCHW-flattened."""
    mats = []
    chw = in_chw
    for (w, b), (_, _, k, s, p) in zip(params["enc"], enc_cfg):
        big_w, chw = _conv_jacobian(_conv2d_apply(w, s, p), chw)
        oc, oh, ow = chw
        big_b = jnp.repeat(b.astype(jnp.float32), oh * ow).reshape(1, -1)
        mats.append((big_w.astype(jnp.bfloat16), big_b))
    for (w, b), (_, _, k, s, p) in zip(params["dec"], dec_cfg):
        big_w, chw = _conv_jacobian(_conv_transpose2d_apply(w, s, p), chw)
        oc, oh, ow = chw
        big_b = jnp.repeat(b.astype(jnp.float32), oh * ow).reshape(1, -1)
        mats.append((big_w.astype(jnp.bfloat16), big_b))
    return mats, chw


def cae_forward(layer_mats, x, *, out_chw):
    """x: (N, C, H, W) f32 -> (N, *out_chw) f32, one Pallas launch."""
    n = x.shape[0]
    k_in = x.shape[1] * x.shape[2] * x.shape[3]
    m_pad = max(8, ((n + 7) // 8) * 8)                       # sublane-aligned GEMM rows
    x_flat = x.reshape(n, k_in).astype(jnp.bfloat16)
    x_flat = jnp.pad(x_flat, ((0, m_pad - n), (0, 0)))
    out = cae_fused_forward(layer_mats, x_flat)
    return out[:n].reshape((n,) + tuple(out_chw))


# ----------------------------------------------------------------------------
# CAE model configuration / params (PyTorch layouts)
# ----------------------------------------------------------------------------
def cae_layer_cfgs(input_c, hidden_c):
    enc = [
        (input_c, hidden_c, 4, 2, 1),
        (hidden_c, hidden_c * 2, 4, 2, 1),
        (hidden_c * 2, hidden_c * 4, 6, 2, 2),
        (hidden_c * 4, hidden_c * 8, 6, 2, 2),
    ]
    dec = [
        (hidden_c * 8, hidden_c * 4, 6, 2, 2),
        (hidden_c * 4, hidden_c * 2, 6, 2, 2),
        (hidden_c * 2, hidden_c, 4, 2, 1),
        (hidden_c, input_c, 4, 2, 1),
    ]
    return enc, dec


def init_cae_params(key, input_c, hidden_c):
    enc_cfg, dec_cfg = cae_layer_cfgs(input_c, hidden_c)
    params = {"enc": [], "dec": []}
    for ic, oc, k, s, p in enc_cfg:
        key, kw, kb = jax.random.split(key, 3)
        w = jax.random.normal(kw, (oc, ic, k, k), jnp.float32) * 0.05
        b = jax.random.normal(kb, (oc,), jnp.float32) * 0.05
        params["enc"].append((w, b))
    for ic, oc, k, s, p in dec_cfg:
        key, kw, kb = jax.random.split(key, 3)
        w = jax.random.normal(kw, (ic, oc, k, k), jnp.float32) * 0.05  # ConvT layout
        b = jax.random.normal(kb, (oc,), jnp.float32) * 0.05
        params["dec"].append((w, b))
    return params


# ----------------------------------------------------------------------------
# Pure-JAX reference (same bf16 operands / f32 accumulation, lax convs)
# ----------------------------------------------------------------------------
def _ref_conv(x, w, b, s, p):
    y = jax.lax.conv_general_dilated(
        x.astype(jnp.bfloat16), w.astype(jnp.bfloat16), (s, s),
        [(p, p), (p, p)], dimension_numbers=("NCHW", "OIHW", "NCHW"),
        preferred_element_type=jnp.float32)
    return y + b[None, :, None, None]


def _ref_convt(x, w, b, s, p):
    k = w.shape[2]
    w_conv = jnp.flip(w, (2, 3)).transpose(1, 0, 2, 3)
    y = jax.lax.conv_general_dilated(
        x.astype(jnp.bfloat16), w_conv.astype(jnp.bfloat16), (1, 1),
        [(k - 1 - p, k - 1 - p)] * 2, lhs_dilation=(s, s),
        dimension_numbers=("NCHW", "OIHW", "NCHW"),
        preferred_element_type=jnp.float32)
    return y + b[None, :, None, None]


def cae_forward_ref(params, x, *, enc_cfg, dec_cfg):
    for (w, b), (_, _, k, s, p) in zip(params["enc"], enc_cfg):
        x = jnp.tanh(_ref_conv(x, w, b, s, p))
    n_dec = len(params["dec"])
    for i, ((w, b), (_, _, k, s, p)) in enumerate(zip(params["dec"], dec_cfg)):
        x = _ref_convt(x, w, b, s, p)
        if i < n_dec - 1:
            x = jnp.tanh(x)
    return x


# ----------------------------------------------------------------------------
if __name__ == "__main__":
    batch, input_c, hidden_c, spatial = 2, 4, 8, 16

    key = jax.random.PRNGKey(0)
    key, kx = jax.random.split(key)
    x = jax.random.normal(kx, (batch, input_c, spatial, spatial), jnp.float32)
    params = init_cae_params(key, input_c, hidden_c)
    enc_cfg, dec_cfg = cae_layer_cfgs(input_c, hidden_c)

    # One-time init-cost: fold every conv layer into a dense GEMM matrix.
    layer_mats, out_chw = prepare_layer_mats(
        params, enc_cfg, dec_cfg, (input_c, spatial, spatial))

    fwd = jax.jit(functools.partial(cae_forward, out_chw=out_chw))
    out = jax.block_until_ready(fwd(layer_mats, x))

    assert out.shape == (batch, input_c, spatial, spatial), out.shape
    assert bool(jnp.all(jnp.isfinite(out)))

    ref_fwd = jax.jit(functools.partial(cae_forward_ref,
                                        enc_cfg=enc_cfg, dec_cfg=dec_cfg))
    ref = jax.block_until_ready(ref_fwd(params, x))
    assert bool(jnp.allclose(out, ref, rtol=1e-2, atol=2e-3)), (
        float(jnp.max(jnp.abs(out - ref))))

    print("KERNEL_OK")
</pallas_src>

<mosaic_0001>
module attributes {stable_mosaic.version = 11 : i64} {
  func.func @_cae_fused_kernel(%arg0: memref<8x1024xbf16, #tpu.memory_space<vmem>>, %arg1: memref<1024x512xbf16, #tpu.memory_space<vmem>>, %arg2: memref<1x512xf32, #tpu.memory_space<vmem>>, %arg3: memref<512x256xbf16, #tpu.memory_space<vmem>>, %arg4: memref<1x256xf32, #tpu.memory_space<vmem>>, %arg5: memref<256x128xbf16, #tpu.memory_space<vmem>>, %arg6: memref<1x128xf32, #tpu.memory_space<vmem>>, %arg7: memref<128x64xbf16, #tpu.memory_space<vmem>>, %arg8: memref<1x64xf32, #tpu.memory_space<vmem>>, %arg9: memref<64x128xbf16, #tpu.memory_space<vmem>>, %arg10: memref<1x128xf32, #tpu.memory_space<vmem>>, %arg11: memref<128x256xbf16, #tpu.memory_space<vmem>>, %arg12: memref<1x256xf32, #tpu.memory_space<vmem>>, %arg13: memref<256x512xbf16, #tpu.memory_space<vmem>>, %arg14: memref<1x512xf32, #tpu.memory_space<vmem>>, %arg15: memref<512x1024xbf16, #tpu.memory_space<vmem>>, %arg16: memref<1x1024xf32, #tpu.memory_space<vmem>>, %arg17: memref<8x1024xf32, #tpu.memory_space<vmem>>) attributes {dimension_semantics = [], scalar_prefetch = 0 : i64, scratch_operands = 0 : i64, tpu.core_type = #tpu.core_type<tc>} {
    %c0 = arith.constant 0 : index
    %c0_0 = arith.constant 0 : index
    %0 = vector.load %arg0[%c0, %c0_0] : memref<8x1024xbf16, #tpu.memory_space<vmem>>, vector<8x1024xbf16>
    %c0_1 = arith.constant 0 : index
    %c0_2 = arith.constant 0 : index
    %1 = vector.load %arg1[%c0_1, %c0_2] : memref<1024x512xbf16, #tpu.memory_space<vmem>>, vector<1024x512xbf16>
    %c0_3 = arith.constant 0 : index
    %c0_4 = arith.constant 0 : index
    %2 = vector.load %arg2[%c0_3, %c0_4] : memref<1x512xf32, #tpu.memory_space<vmem>>, vector<1x512xf32>
    %cst = arith.constant dense<0.000000e+00> : vector<8x512xf32>
    %3 = tpu.matmul %0, %1, %cst {dimension_numbers = #tpu.dot_dimension_numbers<[1], [0], [0], [1], [0, 0, 1, 1], [], []>} : vector<8x1024xbf16>, vector<1024x512xbf16>, vector<8x512xf32> -> vector<8x512xf32>
    %4 = vector.broadcast %2 : vector<1x512xf32> to vector<8x512xf32>
    %5 = arith.addf %3, %4 : vector<8x512xf32>
    %6 = math.tanh %5 : vector<8x512xf32>
    %7 = arith.truncf %6 : vector<8x512xf32> to vector<8x512xbf16>
    %c0_5 = arith.constant 0 : index
    %c0_6 = arith.constant 0 : index
    %8 = vector.load %arg3[%c0_5, %c0_6] : memref<512x256xbf16, #tpu.memory_space<vmem>>, vector<512x256xbf16>
    %c0_7 = arith.constant 0 : index
    %c0_8 = arith.constant 0 : index
    %9 = vector.load %arg4[%c0_7, %c0_8] : memref<1x256xf32, #tpu.memory_space<vmem>>, vector<1x256xf32>
    %cst_9 = arith.constant dense<0.000000e+00> : vector<8x256xf32>
    %10 = tpu.matmul %7, %8, %cst_9 {dimension_numbers = #tpu.dot_dimension_numbers<[1], [0], [0], [1], [0, 0, 1, 1], [], []>} : vector<8x512xbf16>, vector<512x256xbf16>, vector<8x256xf32> -> vector<8x256xf32>
    %11 = vector.broadcast %9 : vector<1x256xf32> to vector<8x256xf32>
    %12 = arith.addf %10, %11 : vector<8x256xf32>
    %13 = math.tanh %12 : vector<8x256xf32>
    %14 = arith.truncf %13 : vector<8x256xf32> to vector<8x256xbf16>
    %c0_10 = arith.constant 0 : index
    %c0_11 = arith.constant 0 : index
    %15 = vector.load %arg5[%c0_10, %c0_11] : memref<256x128xbf16, #tpu.memory_space<vmem>>, vector<256x128xbf16>
    %c0_12 = arith.constant 0 : index
    %c0_13 = arith.constant 0 : index
    %16 = vector.load %arg6[%c0_12, %c0_13] : memref<1x128xf32, #tpu.memory_space<vmem>>, vector<1x128xf32>
    %cst_14 = arith.constant dense<0.000000e+00> : vector<8x128xf32>
    %17 = tpu.matmul %14, %15, %cst_14 {dimension_numbers = #tpu.dot_dimension_numbers<[1], [0], [0], [1], [0, 0, 1, 1], [], []>} : vector<8x256xbf16>, vector<256x128xbf16>, vector<8x128xf32> -> vector<8x128xf32>
    %18 = vector.broadcast %16 : vector<1x128xf32> to vector<8x128xf32>
    %19 = arith.addf %17, %18 : vector<8x128xf32>
    %20 = math.tanh %19 : vector<8x128xf32>
    %21 = arith.truncf %20 : vector<8x128xf32> to vector<8x128xbf16>
    %c0_15 = arith.constant 0 : index
    %c0_16 = arith.constant 0 : index
    %22 = vector.load %arg7[%c0_15, %c0_16] : memref<128x64xbf16, #tpu.memory_space<vmem>>, vector<128x64xbf16>
    %c0_17 = arith.constant 0 : index
    %c0_18 = arith.constant 0 : index
    %23 = vector.load %arg8[%c0_17, %c0_18] : memref<1x64xf32, #tpu.memory_space<vmem>>, vector<1x64xf32>
    %cst_19 = arith.constant dense<0.000000e+00> : vector<8x64xf32>
    %24 = tpu.matmul %21, %22, %cst_19 {dimension_numbers = #tpu.dot_dimension_numbers<[1], [0], [0], [1], [0, 0, 1, 1], [], []>} : vector<8x128xbf16>, vector<128x64xbf16>, vector<8x64xf32> -> vector<8x64xf32>
    %25 = vector.broadcast %23 : vector<1x64xf32> to vector<8x64xf32>
    %26 = arith.addf %24, %25 : vector<8x64xf32>
    %27 = math.tanh %26 : vector<8x64xf32>
    %28 = arith.truncf %27 : vector<8x64xf32> to vector<8x64xbf16>
    %c0_20 = arith.constant 0 : index
    %c0_21 = arith.constant 0 : index
    %29 = vector.load %arg9[%c0_20, %c0_21] : memref<64x128xbf16, #tpu.memory_space<vmem>>, vector<64x128xbf16>
    %c0_22 = arith.constant 0 : index
    %c0_23 = arith.constant 0 : index
    %30 = vector.load %arg10[%c0_22, %c0_23] : memref<1x128xf32, #tpu.memory_space<vmem>>, vector<1x128xf32>
    %cst_24 = arith.constant dense<0.000000e+00> : vector<8x128xf32>
    %31 = tpu.matmul %28, %29, %cst_24 {dimension_numbers = #tpu.dot_dimension_numbers<[1], [0], [0], [1], [0, 0, 1, 1], [], []>} : vector<8x64xbf16>, vector<64x128xbf16>, vector<8x128xf32> -> vector<8x128xf32>
    %32 = vector.broadcast %30 : vector<1x128xf32> to vector<8x128xf32>
    %33 = arith.addf %31, %32 : vector<8x128xf32>
    %34 = math.tanh %33 : vector<8x128xf32>
    %35 = arith.truncf %34 : vector<8x128xf32> to vector<8x128xbf16>
    %c0_25 = arith.constant 0 : index
    %c0_26 = arith.constant 0 : index
    %36 = vector.load %arg11[%c0_25, %c0_26] : memref<128x256xbf16, #tpu.memory_space<vmem>>, vector<128x256xbf16>
    %c0_27 = arith.constant 0 : index
    %c0_28 = arith.constant 0 : index
    %37 = vector.load %arg12[%c0_27, %c0_28] : memref<1x256xf32, #tpu.memory_space<vmem>>, vector<1x256xf32>
    %cst_29 = arith.constant dense<0.000000e+00> : vector<8x256xf32>
    %38 = tpu.matmul %35, %36, %cst_29 {dimension_numbers = #tpu.dot_dimension_numbers<[1], [0], [0], [1], [0, 0, 1, 1], [], []>} : vector<8x128xbf16>, vector<128x256xbf16>, vector<8x256xf32> -> vector<8x256xf32>
    %39 = vector.broadcast %37 : vector<1x256xf32> to vector<8x256xf32>
    %40 = arith.addf %38, %39 : vector<8x256xf32>
    %41 = math.tanh %40 : vector<8x256xf32>
    %42 = arith.truncf %41 : vector<8x256xf32> to vector<8x256xbf16>
    %c0_30 = arith.constant 0 : index
    %c0_31 = arith.constant 0 : index
    %43 = vector.load %arg13[%c0_30, %c0_31] : memref<256x512xbf16, #tpu.memory_space<vmem>>, vector<256x512xbf16>
    %c0_32 = arith.constant 0 : index
    %c0_33 = arith.constant 0 : index
    %44 = vector.load %arg14[%c0_32, %c0_33] : memref<1x512xf32, #tpu.memory_space<vmem>>, vector<1x512xf32>
    %cst_34 = arith.constant dense<0.000000e+00> : vector<8x512xf32>
    %45 = tpu.matmul %42, %43, %cst_34 {dimension_numbers = #tpu.dot_dimension_numbers<[1], [0], [0], [1], [0, 0, 1, 1], [], []>} : vector<8x256xbf16>, vector<256x512xbf16>, vector<8x512xf32> -> vector<8x512xf32>
    %46 = vector.broadcast %44 : vector<1x512xf32> to vector<8x512xf32>
    %47 = arith.addf %45, %46 : vector<8x512xf32>
    %48 = math.tanh %47 : vector<8x512xf32>
    %49 = arith.truncf %48 : vector<8x512xf32> to vector<8x512xbf16>
    %c0_35 = arith.constant 0 : index
    %c0_36 = arith.constant 0 : index
    %50 = vector.load %arg15[%c0_35, %c0_36] : memref<512x1024xbf16, #tpu.memory_space<vmem>>, vector<512x1024xbf16>
    %c0_37 = arith.constant 0 : index
    %c0_38 = arith.constant 0 : index
    %51 = vector.load %arg16[%c0_37, %c0_38] : memref<1x1024xf32, #tpu.memory_space<vmem>>, vector<1x1024xf32>
    %cst_39 = arith.constant dense<0.000000e+00> : vector<8x1024xf32>
    %52 = tpu.matmul %49, %50, %cst_39 {dimension_numbers = #tpu.dot_dimension_numbers<[1], [0], [0], [1], [0, 0, 1, 1], [], []>} : vector<8x512xbf16>, vector<512x1024xbf16>, vector<8x1024xf32> -> vector<8x1024xf32>
    %53 = vector.broadcast %51 : vector<1x1024xf32> to vector<8x1024xf32>
    %54 = arith.addf %52, %53 : vector<8x1024xf32>
    %c0_40 = arith.constant 0 : index
    %c0_41 = arith.constant 0 : index
    %55 = vector.load %arg17[%c0_40, %c0_41] : memref<8x1024xf32, #tpu.memory_space<vmem>>, vector<8x1024xf32>
    tpu.vector_store %arg17[%c0_40, %c0_41], %54 {strides = array<i32>} : memref<8x1024xf32, #tpu.memory_space<vmem>>, vector<8x1024xf32>,
    return
  }
}

</mosaic_0001>

<bundles_post_ra>
// kernel: cae_forward.1
= control target key start
LH: loop header
LB: loop body
LE: loop exit
PB: predicated region body
PF: predicated region fallthrough
CT: control target
= control target key end

     0   :  { %s7518_s0 = inlined_call_operand.vmem [shape: bf16[8,1024], index: 0, kind: input, shape index: {}]   ;;  %s7519_s1 = inlined_call_operand.hbm [shape: bf16[1024,512], index: 1, kind: input, shape index: {}]   ;;  %s7520_s2 = inlined_call_operand.vmem [shape: f32[1,512], index: 2, kind: input, shape index: {}]   ;;  %s7521_s3 = inlined_call_operand.hbm [shape: bf16[512,256], index: 3, kind: input, shape index: {}]   ;;  %s7522_s4 = inlined_call_operand.vmem [shape: f32[1,256], index: 4, kind: input, shape index: {}]   ;;  %s7523_s5 = inlined_call_operand.vmem [shape: bf16[256,128], index: 5, kind: input, shape index: {}]   ;;  %s7524_s6 = inlined_call_operand.vmem [shape: f32[1,128], index: 6, kind: input, shape index: {}]   ;;  %s7525_s7 = inlined_call_operand.vmem [shape: bf16[128,64], index: 7, kind: input, shape index: {}]   ;;  %s7526_s8 = inlined_call_operand.vmem [shape: f32[1,64], index: 8, kind: input, shape index: {}]   ;;  %s7527_s9 = inlined_call_operand.vmem [shape: bf16[64,128], index: 9, kind: input, shape index: {}]   ;;  %s7528_s10 = inlined_call_operand.vmem [shape: f32[1,128], index: 10, kind: input, shape index: {}]   ;;  %s7529_s11 = inlined_call_operand.vmem [shape: bf16[128,256], index: 11, kind: input, shape index: {}]   ;;  %s7530_s12 = inlined_call_operand.vmem [shape: f32[1,256], index: 12, kind: input, shape index: {}]   ;;  %s7531_s13 = inlined_call_operand.hbm [shape: bf16[256,512], index: 13, kind: input, shape index: {}]   ;;  %s7532_s14 = inlined_call_operand.vmem [shape: f32[1,512], index: 14, kind: input, shape index: {}]   ;;  %s7533_s15 = inlined_call_operand.hbm [shape: bf16[512,1024], index: 15, kind: input, shape index: {}]   ;;  %s7534_s16 = inlined_call_operand.vmem [shape: f32[1,1024], index: 16, kind: input, shape index: {}]   ;;  %s7535_s17 = inlined_call_operand.vmem [shape: f32[8,1024], index: 17, kind: output, shape index: {}]  }
   0x1   :  { %7539 = sst [smem:[#allocation12_spill]] %s7518_s0 }
   0x2   :  { %7540 = sst [smem:[#allocation13_spill]] %s7519_s1 }
   0x3   :  { %7541 = sst [smem:[#allocation14_spill]] %s7535_s17 }
   0x4   :  { %22 = vsyncpa [#allocation3], 0 }
   0x5   :  { %23 = vsyncpa [#allocation5], 0 }
   0x6   :  { %24 = vsyncpa [#allocation8], 0  ;;  %s7060_s24 = smov [#allocation4]   ;;  %s6966_s28 = scalar_lea.hbm %s7521_s3, 8192 }
   0x7   :  { %s46_s25 = sshll.u32 %s7060_s24, 4  ;;  %p6967_p0 = scmp.ne.s32.totalorder %s7521_s3, %s6966_s28  ;;  %s47_s25 = int_to_ptr.vmem [resolvable:$true] %s46_s25 }
   0x8   :  { %p6970_p1 = scmp.lt.u32.totalorder %s6966_s28, %s7521_s3 }
   0xa   :  { %p6972_p2 = pnand %p6970_p1, %p6967_p0 }
   0xc   :  { %6975 = shalt.err (!%p6972_p2)
}
   0xd   :  { %s6976_s19 = scalar_lea.vmem %s47_s25, 8192  ;;  %p6981_p4 = scmp.lt.s32.totalorder %s47_s25, %s47_s25 }
   0xe   :  { %p6977_p3 = scmp.ne.s32.totalorder %s47_s25, %s6976_s19  ;;  %p6982_p5 = scmp.lt.s32.totalorder %s6976_s19, %s6976_s19 }
  0x10   :  { %p6983_p6 = por %p6982_p5, %p6981_p4 }
  0x12   :  { %p6984_p7 = pnand %p6983_p6, %p6977_p3 }
  0x14   :  { %6987 = shalt.err (!%p6984_p7)
}
  0x15   :  { %s7061_s1 = smov 128   ;;  %s7062_s20 = smov 8  }
  0x16   :  { %52 = dma.hbm_to_vmem [thread:$0]  %s7521_s3, 8192, %s47_s25, [#allocation5], %s7061_s1, %s7061_s1, %s7062_s20  }
  0x17   :  { %s7063_s23 = smov [#allocation2]   ;;  %s7542_s28 = sld [smem:[#allocation13_spill]] }
  0x18   :  { %s32_s24 = sshll.u32 %s7063_s23, 4  ;;  %s33_s24 = int_to_ptr.vmem [resolvable:$true] %s32_s24 }
  0x1d   :  { %s6988_s29 = scalar_lea.hbm %s7542_s28, 32768 }
  0x1e   :  { %p6989_p8 = scmp.ne.s32.totalorder %s7542_s28, %s6988_s29  ;;  %p6992_p9 = scmp.lt.u32.totalorder %s6988_s29, %s7542_s28 }
  0x20   :  { %p6994_p10 = pnand %p6992_p9, %p6989_p8 }
  0x22   :  { %6997 = shalt.err (!%p6994_p10)
}
  0x23   :  { %s6998_s17 = scalar_lea.vmem %s33_s24, 32768  ;;  %p7003_p12 = scmp.lt.s32.totalorder %s33_s24, %s33_s24 }
  0x24   :  { %p6999_p11 = scmp.ne.s32.totalorder %s33_s24, %s6998_s17  ;;  %p7004_p13 = scmp.lt.s32.totalorder %s6998_s17, %s6998_s17 }
  0x26   :  { %p7005_p0 = por %p7004_p13, %p7003_p12 }
  0x28   :  { %p7006_p1 = pnand %p7005_p0, %p6999_p11 }
  0x2a   :  { %7009 = shalt.err (!%p7006_p1)
}
  0x2b   :  { %s7064_s3 = smov 256   ;;  %s7065_s25 = smov 16  }
  0x2c   :  { %38 = dma.hbm_to_vmem [thread:$0]  %s7542_s28, 32768, %s33_s24, [#allocation3], %s7064_s3, %s7064_s3, %s7065_s25  }
  0x2d   :  { %s7066_s21 = smov [#allocation6]   ;;  %s7067_s23 = smov [#allocation7]  }
  0x2e   :  { %s76_s22 = sshll.u32 %s7066_s21, 4  ;;  %s90_s26 = sshll.u32 %s7067_s23, 4  ;;  %s77_s22 = int_to_ptr.vmem [resolvable:$true] %s76_s22  ;;  %s7187_s26 = int_to_ptr.vmem [resolvable:$true] %s90_s26 }
  0x2f   :  { %s7010_s17 = scalar_lea.hbm %s7531_s13, 8192 }
  0x30   :  { %p7011_p2 = scmp.ne.s32.totalorder %s7531_s13, %s7010_s17  ;;  %p7014_p3 = scmp.lt.u32.totalorder %s7010_s17, %s7531_s13 }
  0x32   :  { %p7016_p4 = pnand %p7014_p3, %p7011_p2 }
  0x34   :  { %7019 = shalt.err (!%p7016_p4)
}
  0x35   :  { %s7020_s24 = scalar_lea.vmem %s77_s22, 8192  ;;  %p7025_p6 = scmp.lt.s32.totalorder %s77_s22, %s77_s22 }
  0x36   :  { %p7021_p5 = scmp.ne.s32.totalorder %s77_s22, %s7020_s24  ;;  %p7026_p7 = scmp.lt.s32.totalorder %s7020_s24, %s7020_s24 }
  0x38   :  { %p7027_p8 = por %p7026_p7, %p7025_p6 }
  0x3a   :  { %p7028_p9 = pnand %p7027_p8, %p7021_p5 }
  0x3c   :  { %7031 = shalt.err (!%p7028_p9)
}
  0x3d   :  { %82 = dma.hbm_to_vmem [thread:$0]  %s7531_s13, 8192, %s77_s22, [#allocation5], %s7064_s3, %s7064_s3, %s7065_s25  }
  0x3e   :  { %s7032_s23 = scalar_lea.hbm %s7533_s15, 32768 }
  0x3f   :  { %p7033_p10 = scmp.ne.s32.totalorder %s7533_s15, %s7032_s23  ;;  %p7036_p11 = scmp.lt.u32.totalorder %s7032_s23, %s7533_s15 }
  0x41   :  { %p7038_p12 = pnand %p7036_p11, %p7033_p10 }
  0x43   :  { %7041 = shalt.err (!%p7038_p12)
}
  0x44   :  { %s7042_s30 = scalar_lea.vmem %s7187_s26, 32768  ;;  %p7047_p0 = scmp.lt.s32.totalorder %s7187_s26, %s7187_s26 }
  0x45   :  { %p7043_p13 = scmp.ne.s32.totalorder %s7187_s26, %s7042_s30  ;;  %p7048_p1 = scmp.lt.s32.totalorder %s7042_s30, %s7042_s30 }
  0x47   :  { %p7049_p2 = por %p7048_p1, %p7047_p0 }
  0x49   :  { %p7050_p3 = pnand %p7049_p2, %p7043_p13 }
  0x4b   :  { %7053 = shalt.err (!%p7050_p3)
}
  0x4c   :  { %s7068_s13 = smov 512   ;;  %s7069_s3 = smov 32  }
  0x4d   :  { %96 = dma.hbm_to_vmem [thread:$0]  %s7533_s15, 32768, %s7187_s26, [#allocation8], %s7068_s13, %s7068_s13, %s7069_s3  }
  0x4e   :  { %7054 = dma.done.wait [#allocation3], 32768  }
  0x4f   :  { %7055 = vsyncadd [#allocation3], 4294934528 }
  0x50   :  { %7056 = dma.done.wait [#allocation5], 16384  }
  0x51   :  { %7057 = vsyncadd [#allocation5], 4294950912 }
  0x52   :  { %7058 = dma.done.wait [#allocation8], 32768  }
  0x53   :  { %7059 = vsyncadd [#allocation8], 4294934528  ;;  %v6300_v0 = vld [vmem:[#allocation2 + $0x4] ss:$16 sps:$4 sm:$0xff]   ;;  %v6302_v1 = vld [vmem:[#allocation2 + $0xc] ss:$16 sps:$4 sm:$0xff]  }
  0x54   :  { %1702 = vmatprep.subr.bf16.mxu0 %v6300_v0  ;;  %v6304_v2 = vld [vmem:[#allocation2] ss:$16 sps:$4 sm:$0xff]   ;;  %v6305_v3 = vld [vmem:[#allocation2 + $0x8] ss:$16 sps:$4 sm:$0xff]   ;;  %1866 = vmatprep.subr.bf16.mxu1 %v6302_v1  ;;  %v6306_v4 = vld [vmem:[#allocation2 + $0x24] ss:$16 sps:$4 sm:$0xff]  }
  0x55   :  { %1703 = vmatpush1.bf16.msra.mxu0 %v6304_v2  ;;  %1867 = vmatpush1.bf16.msra.mxu1 %v6305_v3  ;;  %v6308_v5 = vld [vmem:[#allocation2 + $0x2c] ss:$16 sps:$4 sm:$0xff]   ;;  %v6310_v6 = vld [vmem:[#allocation2 + $0x20] ss:$16 sps:$4 sm:$0xff]   ;;  %v6311_v7 = vld [vmem:[#allocation2 + $0x28] ss:$16 sps:$4 sm:$0xff]  }
  0x56   :  { %1704 = vmatprep.subr.bf16.mxu0 %v6306_v4  ;;  %1868 = vmatprep.subr.bf16.mxu1 %v6308_v5  ;;  %v6312_v8 = vld [vmem:[#allocation2 + $0x44] ss:$16 sps:$4 sm:$0xff]   ;;  %v6314_v9 = vld [vmem:[#allocation2 + $0x4c] ss:$16 sps:$4 sm:$0xff]   ;;  %v6316_v10 = vld [vmem:[#allocation2 + $0x40] ss:$16 sps:$4 sm:$0xff]  }
  0x57   :  { %v6317_v11 = vld [vmem:[#allocation2 + $0x48] ss:$16 sps:$4 sm:$0xff]   ;;  %v6318_v12 = vld [vmem:[#allocation2 + $0x64] ss:$16 sps:$4 sm:$0xff]   ;;  %v6320_v13 = vld [vmem:[#allocation2 + $0x6c] ss:$16 sps:$4 sm:$0xff]  }
  0x58   :  { %v6322_v14 = vld [vmem:[#allocation2 + $0x60] ss:$16 sps:$4 sm:$0xff]   ;;  %v6323_v15 = vld [vmem:[#allocation2 + $0x68] ss:$16 sps:$4 sm:$0xff]   ;;  %v6324_v16 = vld [vmem:[#allocation2 + $0x84] ss:$16 sps:$4 sm:$0xff]  }
  0x59   :  { %1705 = vmatpush1.bf16.msra.mxu0 %v6310_v6  ;;  %1869 = vmatpush1.bf16.msra.mxu1 %v6311_v7  ;;  %v6326_v17 = vld [vmem:[#allocation2 + $0x8c] ss:$16 sps:$4 sm:$0xff]   ;;  %v6328_v18 = vld [vmem:[#allocation2 + $0x80] ss:$16 sps:$4 sm:$0xff]   ;;  %v6329_v19 = vld [vmem:[#allocation2 + $0x88] ss:$16 sps:$4 sm:$0xff]  }
  0x5a   :  { %1706 = vmatprep.subr.bf16.mxu0 %v6312_v8  ;;  %1870 = vmatprep.subr.bf16.mxu1 %v6314_v9  ;;  %v6330_v20 = vld [vmem:[#allocation2 + $0xa4] ss:$16 sps:$4 sm:$0xff]   ;;  %v6332_v21 = vld [vmem:[#allocation2 + $0xac] ss:$16 sps:$4 sm:$0xff]   ;;  %v6334_v22 = vld [vmem:[#allocation2 + $0xa0] ss:$16 sps:$4 sm:$0xff]  }
  0x5b   :  { %v6335_v23 = vld [vmem:[#allocation2 + $0xa8] ss:$16 sps:$4 sm:$0xff]   ;;  %v6336_v24 = vld [vmem:[#allocation2 + $0xc4] ss:$16 sps:$4 sm:$0xff]   ;;  %v6338_v25 = vld [vmem:[#allocation2 + $0xcc] ss:$16 sps:$4 sm:$0xff]  }
  0x5c   :  { %v6340_v26 = vld [vmem:[#allocation2 + $0xc0] ss:$16 sps:$4 sm:$0xff]   ;;  %v6341_v27 = vld [vmem:[#allocation2 + $0xc8] ss:$16 sps:$4 sm:$0xff]   ;;  %v6342_v28 = vld [vmem:[#allocation2 + $0xe4] ss:$16 sps:$4 sm:$0xff]  }
  0x5d   :  { %1707 = vmatpush1.bf16.msra.mxu0 %v6316_v10  ;;  %1871 = vmatpush1.bf16.msra.mxu1 %v6317_v11  ;;  %v6344_v29 = vld [vmem:[#allocation2 + $0xec] ss:$16 sps:$4 sm:$0xff]   ;;  %v6346_v30 = vld [vmem:[#allocation2 + $0xe0] ss:$16 sps:$4 sm:$0xff]   ;;  %v6347_v31 = vld [vmem:[#allocation2 + $0xe8] ss:$16 sps:$4 sm:$0xff]  }
  0x5e   :  { %1708 = vmatprep.subr.bf16.mxu0 %v6318_v12  ;;  %1872 = vmatprep.subr.bf16.mxu1 %v6320_v13  ;;  %v6348_v32 = vld [vmem:[#allocation2 + $0x104] ss:$16 sps:$4 sm:$0xff]   ;;  %v6350_v33 = vld [vmem:[#allocation2 + $0x10c] ss:$16 sps:$4 sm:$0xff]   ;;  %v6352_v34 = vld [vmem:[#allocation2 + $0x100] ss:$16 sps:$4 sm:$0xff]  }
  0x5f   :  { %v6353_v35 = vld [vmem:[#allocation2 + $0x108] ss:$16 sps:$4 sm:$0xff]   ;;  %v6354_v36 = vld [vmem:[#allocation2 + $0x124] ss:$16 sps:$4 sm:$0xff]   ;;  %v6356_v37 = vld [vmem:[#allocation2 + $0x12c] ss:$16 sps:$4 sm:$0xff]  }
  0x60   :  { %v6358_v38 = vld [vmem:[#allocation2 + $0x120] ss:$16 sps:$4 sm:$0xff]   ;;  %v6359_v39 = vld [vmem:[#allocation2 + $0x128] ss:$16 sps:$4 sm:$0xff]   ;;  %v6360_v40 = vld [vmem:[#allocation2 + $0x144] ss:$16 sps:$4 sm:$0xff]  }
  0x61   :  { %1709 = vmatpush1.bf16.msra.mxu0 %v6322_v14  ;;  %1873 = vmatpush1.bf16.msra.mxu1 %v6323_v15  ;;  %v6362_v41 = vld [vmem:[#allocation2 + $0x14c] ss:$16 sps:$4 sm:$0xff]   ;;  %v6364_v42 = vld [vmem:[#allocation2 + $0x140] ss:$16 sps:$4 sm:$0xff]   ;;  %v6365_v43 = vld [vmem:[#allocation2 + $0x148] ss:$16 sps:$4 sm:$0xff]  }
  0x62   :  { %1710 = vmatprep.subr.bf16.mxu0 %v6324_v16  ;;  %1874 = vmatprep.subr.bf16.mxu1 %v6326_v17  ;;  %v6366_v44 = vld [vmem:[#allocation2 + $0x164] ss:$16 sps:$4 sm:$0xff]   ;;  %v6368_v45 = vld [vmem:[#allocation2 + $0x16c] ss:$16 sps:$4 sm:$0xff]   ;;  %s7543_s18 = sld [smem:[#allocation12_spill]]  ;;  %vm7071_vm0 = vmmov 0  }
  0x63   :  { %v6370_v47 = vld [vmem:[#allocation2 + $0x160] ss:$16 sps:$4 sm:$0xff]   ;;  %v6371_v49 = vld [vmem:[#allocation2 + $0x168] ss:$16 sps:$4 sm:$0xff]   ;;  %v6372_v50 = vld [vmem:[#allocation2 + $0x184] ss:$16 sps:$4 sm:$0xff]  }
  0x64   :  { %v6374_v51 = vld [vmem:[#allocation2 + $0x18c] ss:$16 sps:$4 sm:$0xff]   ;;  %v6376_v52 = vld [vmem:[#allocation2 + $0x180] ss:$16 sps:$4 sm:$0xff]   ;;  %v6377_v53 = vld [vmem:[#allocation2 + $0x188] ss:$16 sps:$4 sm:$0xff]  }
  0x65   :  { %1711 = vmatpush1.bf16.msra.mxu0 %v6328_v18  ;;  %1875 = vmatpush1.bf16.msra.mxu1 %v6329_v19  ;;  %v6378_v54 = vld [vmem:[#allocation2 + $0x1a4] ss:$16 sps:$4 sm:$0xff]   ;;  %v6380_v55 = vld [vmem:[#allocation2 + $0x1ac] ss:$16 sps:$4 sm:$0xff]   ;;  %v6382_v56 = vld [vmem:[#allocation2 + $0x1a0] ss:$16 sps:$4 sm:$0xff]  }
  0x66   :  { %1712 = vmatprep.subr.bf16.mxu0 %v6330_v20  ;;  %1876 = vmatprep.subr.bf16.mxu1 %v6332_v21  ;;  %v6383_v57 = vld [vmem:[#allocation2 + $0x1a8] ss:$16 sps:$4 sm:$0xff]   ;;  %v6384_v58 = vld [vmem:[#allocation2 + $0x1c4] ss:$16 sps:$4 sm:$0xff]   ;;  %v6386_v59 = vld [vmem:[#allocation2 + $0x1cc] ss:$16 sps:$4 sm:$0xff]  }
  0x67   :  { %v6388_v60 = vld [vmem:[#allocation2 + $0x1c0] ss:$16 sps:$4 sm:$0xff]   ;;  %v6389_v61 = vld [vmem:[#allocation2 + $0x1c8] ss:$16 sps:$4 sm:$0xff]   ;;  %v6390_v62 = vld [vmem:[#allocation2 + $0x1e4] ss:$16 sps:$4 sm:$0xff]  }
  0x68   :  { %v112_v46 = vld [vmem:[%s7543_s18] sm:$0xff]  ;;  %v6392_v63 = vld [vmem:[#allocation2 + $0x1ec] ss:$16 sps:$4 sm:$0xff]   ;;  %v6395_v1 = vld [vmem:[#allocation2 + $0x1e8] ss:$16 sps:$4 sm:$0xff]   ;;  %vm2849_vm1 = vcmask 523264  }
  0x69   :  { %1713 = vmatpush1.bf16.msra.mxu0 %v6334_v22  ;;  %1877 = vmatpush1.bf16.msra.mxu1 %v6335_v23  ;;  %v5466_v48 = vcombine.high %v112_v46, %v112_v46  ;;  %v6394_v0 = vld [vmem:[#allocation2 + $0x1e0] ss:$16 sps:$4 sm:$0xff]   ;;  %v6400_v2 = vld [vmem:[#allocation2 + $0x204] ss:$16 sps:$4 sm:$0xff]   ;;  %v6403_v3 = vld [vmem:[#allocation2 + $0x20c] ss:$16 sps:$4 sm:$0xff]   ;;  %v5465_v4 = vcombine.low %v112_v46, %v112_v46 }
  0x6a   :  { %1714 = vmatprep.subr.bf16.mxu0 %v6336_v24  ;;  %1878 = vmatprep.subr.bf16.mxu1 %v6338_v25  ;;  %v6398_v5 = vld [vmem:[#allocation2 + $0x200] ss:$16 sps:$4 sm:$0xff]   ;;  %v6401_v6 = vld [vmem:[#allocation2 + $0x208] ss:$16 sps:$4 sm:$0xff]   ;;  %v6406_v7 = vld [vmem:[#allocation2 + $0x224] ss:$16 sps:$4 sm:$0xff]  }
  0x6b   :  { %1734 = vmatprep.mubr.bf16.mxu0 %v5466_v48  ;;  %1898 = vmatprep.mubr.bf16.mxu1 %v5466_v48  ;;  %v6409_v8 = vld [vmem:[#allocation2 + $0x22c] ss:$16 sps:$4 sm:$0xff]   ;;  %v6404_v9 = vld [vmem:[#allocation2 + $0x220] ss:$16 sps:$4 sm:$0xff]   ;;  %v6407_v10 = vld [vmem:[#allocation2 + $0x228] ss:$16 sps:$4 sm:$0xff]  }
  0x6c   :  { %v6412_v11 = vld [vmem:[#allocation2 + $0x244] ss:$16 sps:$4 sm:$0xff]   ;;  %v6415_v12 = vld [vmem:[#allocation2 + $0x24c] ss:$16 sps:$4 sm:$0xff]   ;;  %v6410_v13 = vld [vmem:[#allocation2 + $0x240] ss:$16 sps:$4 sm:$0xff]  }
  0x6d   :  { %1715 = vmatpush1.bf16.msra.mxu0 %v6340_v26  ;;  %1879 = vmatpush1.bf16.msra.mxu1 %v6341_v27  ;;  %v6413_v14 = vld [vmem:[#allocation2 + $0x248] ss:$16 sps:$4 sm:$0xff]   ;;  %v6418_v15 = vld [vmem:[#allocation2 + $0x264] ss:$16 sps:$4 sm:$0xff]   ;;  %v6421_v16 = vld [vmem:[#allocation2 + $0x26c] ss:$16 sps:$4 sm:$0xff]  }
  0x6e   :  { %1716 = vmatprep.subr.bf16.mxu0 %v6342_v28  ;;  %1880 = vmatprep.subr.bf16.mxu1 %v6344_v29  ;;  %v6416_v17 = vld [vmem:[#allocation2 + $0x260] ss:$16 sps:$4 sm:$0xff]   ;;  %v6419_v18 = vld [vmem:[#allocation2 + $0x268] ss:$16 sps:$4 sm:$0xff]   ;;  %v6424_v19 = vld [vmem:[#allocation2 + $0x284] ss:$16 sps:$4 sm:$0xff]  }
  0x6f   :  { %v6427_v20 = vld [vmem:[#allocation2 + $0x28c] ss:$16 sps:$4 sm:$0xff]   ;;  %v6422_v21 = vld [vmem:[#allocation2 + $0x280] ss:$16 sps:$4 sm:$0xff]   ;;  %v6425_v22 = vld [vmem:[#allocation2 + $0x288] ss:$16 sps:$4 sm:$0xff]  }
  0x70   :  { %v6430_v23 = vld [vmem:[#allocation2 + $0x2a4] ss:$16 sps:$4 sm:$0xff]   ;;  %v6433_v24 = vld [vmem:[#allocation2 + $0x2ac] ss:$16 sps:$4 sm:$0xff]   ;;  %v6428_v25 = vld [vmem:[#allocation2 + $0x2a0] ss:$16 sps:$4 sm:$0xff]  }
  0x71   :  { %1717 = vmatpush1.bf16.msra.mxu0 %v6346_v30  ;;  %1881 = vmatpush1.bf16.msra.mxu1 %v6347_v31  ;;  %v6431_v26 = vld [vmem:[#allocation2 + $0x2a8] ss:$16 sps:$4 sm:$0xff]   ;;  %v6436_v27 = vld [vmem:[#allocation2 + $0x2c4] ss:$16 sps:$4 sm:$0xff]   ;;  %v6439_v28 = vld [vmem:[#allocation2 + $0x2cc] ss:$16 sps:$4 sm:$0xff]  }
  0x72   :  { %1718 = vmatprep.subr.bf16.mxu0 %v6348_v32  ;;  %1882 = vmatprep.subr.bf16.mxu1 %v6350_v33  ;;  %v7224_v29 = vld [vmem:[%s7543_s18 + $0x8] sm:$0xff]  ;;  %v6434_v31 = vld [vmem:[#allocation2 + $0x2c0] ss:$16 sps:$4 sm:$0xff]   ;;  %v6442_v33 = vld [vmem:[#allocation2 + $0x2e4] ss:$16 sps:$4 sm:$0xff]   ;;  %s7544_s3 = sld [smem:[#allocation14_spill]] }
  0x73   :  { %v5468_v30 = vcombine.high %v7224_v29, %v7224_v29  ;;  %v6437_v32 = vld [vmem:[#allocation2 + $0x2c8] ss:$16 sps:$4 sm:$0xff]   ;;  %v6463_v46 = vld [vmem:[#allocation2 + $0x34c] ss:$16 sps:$4 sm:$0xff]  }
  0x74   :  { %v6461_v48 = vld [vmem:[#allocation2 + $0x348] ss:$16 sps:$4 sm:$0xff]  }
  0x75   :  { %1719 = vmatpush1.bf16.msra.mxu0 %v6352_v34  ;;  %1883 = vmatpush1.bf16.msra.mxu1 %v6353_v35  ;;  %v6445_v34 = vld [vmem:[#allocation2 + $0x2ec] ss:$16 sps:$4 sm:$0xff]   ;;  %v6440_v35 = vld [vmem:[#allocation2 + $0x2e0] ss:$16 sps:$4 sm:$0xff]  }
  0x76   :  { %1720 = vmatprep.subr.bf16.mxu0 %v6354_v36  ;;  %1884 = vmatprep.subr.bf16.mxu1 %v6356_v37  ;;  %v6443_v36 = vld [vmem:[#allocation2 + $0x2e8] ss:$16 sps:$4 sm:$0xff]   ;;  %v6448_v37 = vld [vmem:[#allocation2 + $0x304] ss:$16 sps:$4 sm:$0xff]  }
  0x79   :  { %1721 = vmatpush1.bf16.msra.mxu0 %v6358_v38  ;;  %1885 = vmatpush1.bf16.msra.mxu1 %v6359_v39  ;;  %v6451_v38 = vld [vmem:[#allocation2 + $0x30c] ss:$16 sps:$4 sm:$0xff]   ;;  %v6446_v39 = vld [vmem:[#allocation2 + $0x300] ss:$16 sps:$4 sm:$0xff]  }
  0x7a   :  { %1722 = vmatprep.subr.bf16.mxu0 %v6360_v40  ;;  %1886 = vmatprep.subr.bf16.mxu1 %v6362_v41  ;;  %v6449_v40 = vld [vmem:[#allocation2 + $0x308] ss:$16 sps:$4 sm:$0xff]   ;;  %v6454_v41 = vld [vmem:[#allocation2 + $0x324] ss:$16 sps:$4 sm:$0xff]  }
  0x7d   :  { %1723 = vmatpush1.bf16.msra.mxu0 %v6364_v42  ;;  %1887 = vmatpush1.bf16.msra.mxu1 %v6365_v43  ;;  %v6457_v42 = vld [vmem:[#allocation2 + $0x32c] ss:$16 sps:$4 sm:$0xff]   ;;  %v6452_v43 = vld [vmem:[#allocation2 + $0x320] ss:$16 sps:$4 sm:$0xff]  }
  0x7e   :  { %1724 = vmatprep.subr.bf16.mxu0 %v6366_v44  ;;  %1888 = vmatprep.subr.bf16.mxu1 %v6368_v45  ;;  %v6455_v44 = vld [vmem:[#allocation2 + $0x328] ss:$16 sps:$4 sm:$0xff]   ;;  %v6460_v45 = vld [vmem:[#allocation2 + $0x344] ss:$16 sps:$4 sm:$0xff]  }
  0x81   :  { %1725 = vmatpush1.bf16.msra.mxu0 %v6370_v47  ;;  %1889 = vmatpush1.bf16.msra.mxu1 %v6371_v49  ;;  %v6458_v47 = vld [vmem:[#allocation2 + $0x340] ss:$16 sps:$4 sm:$0xff]   ;;  %v6466_v49 = vld [vmem:[#allocation2 + $0x364] ss:$16 sps:$4 sm:$0xff]  }
  0x82   :  { %1726 = vmatprep.subr.bf16.mxu0 %v6372_v50  ;;  %1890 = vmatprep.subr.bf16.mxu1 %v6374_v51  ;;  %v6469_v50 = vld [vmem:[#allocation2 + $0x36c] ss:$16 sps:$4 sm:$0xff]   ;;  %v6464_v51 = vld [vmem:[#allocation2 + $0x360] ss:$16 sps:$4 sm:$0xff]  }
  0x85   :  { %1727 = vmatpush1.bf16.msra.mxu0 %v6376_v52  ;;  %1891 = vmatpush1.bf16.msra.mxu1 %v6377_v53  ;;  %v6467_v52 = vld [vmem:[#allocation2 + $0x368] ss:$16 sps:$4 sm:$0xff]   ;;  %v6472_v53 = vld [vmem:[#allocation2 + $0x384] ss:$16 sps:$4 sm:$0xff]  }
  0x86   :  { %1728 = vmatprep.subr.bf16.mxu0 %v6378_v54  ;;  %1892 = vmatprep.subr.bf16.mxu1 %v6380_v55  ;;  %v6475_v54 = vld [vmem:[#allocation2 + $0x38c] ss:$16 sps:$4 sm:$0xff]   ;;  %v6470_v55 = vld [vmem:[#allocation2 + $0x380] ss:$16 sps:$4 sm:$0xff]  }
  0x89   :  { %1729 = vmatpush1.bf16.msra.mxu0 %v6382_v56  ;;  %1893 = vmatpush1.bf16.msra.mxu1 %v6383_v57  ;;  %v6473_v56 = vld [vmem:[#allocation2 + $0x388] ss:$16 sps:$4 sm:$0xff]   ;;  %v6478_v57 = vld [vmem:[#allocation2 + $0x3a4] ss:$16 sps:$4 sm:$0xff]  }
  0x8a   :  { %1730 = vmatprep.subr.bf16.mxu0 %v6384_v58  ;;  %1894 = vmatprep.subr.bf16.mxu1 %v6386_v59  ;;  %v6481_v58 = vld [vmem:[#allocation2 + $0x3ac] ss:$16 sps:$4 sm:$0xff]   ;;  %v6476_v59 = vld [vmem:[#allocation2 + $0x3a0] ss:$16 sps:$4 sm:$0xff]  }
  0x8d   :  { %1731 = vmatpush1.bf16.msra.mxu0 %v6388_v60  ;;  %1895 = vmatpush1.bf16.msra.mxu1 %v6389_v61  ;;  %v6479_v60 = vld [vmem:[#allocation2 + $0x3a8] ss:$16 sps:$4 sm:$0xff]   ;;  %v6484_v61 = vld [vmem:[#allocation2 + $0x3c4] ss:$16 sps:$4 sm:$0xff]  }
  0x8e   :  { %1732 = vmatprep.subr.bf16.mxu0 %v6390_v62  ;;  %1896 = vmatprep.subr.bf16.mxu1 %v6392_v63  ;;  %v6487_v62 = vld [vmem:[#allocation2 + $0x3cc] ss:$16 sps:$4 sm:$0xff]   ;;  %v6482_v63 = vld [vmem:[#allocation2 + $0x3c0] ss:$16 sps:$4 sm:$0xff]  }
  0x91   :  { %1733 = vmatpush1.bf16.msra.mxu0 %v6394_v0  ;;  %1897 = vmatpush1.bf16.msra.mxu1 %v6395_v1  ;;  %v6485_v0 = vld [vmem:[#allocation2 + $0x3c8] ss:$16 sps:$4 sm:$0xff]   ;;  %v6490_v1 = vld [vmem:[#allocation2 + $0x3e4] ss:$16 sps:$4 sm:$0xff]  }
  0x92   :  { %1743 = vmatprep.subr.bf16.mxu0 %v6400_v2  ;;  %1907 = vmatprep.subr.bf16.mxu1 %v6403_v3  ;;  %v6493_v2 = vld [vmem:[#allocation2 + $0x3ec] ss:$16 sps:$4 sm:$0xff]   ;;  %v6488_v3 = vld [vmem:[#allocation2 + $0x3e0] ss:$16 sps:$4 sm:$0xff]  }
  0x94   :  { %1735 = vmatmul.mubr.bf16.vlgmr.msra.gmra.mrb[0].mxu0 %v5465_v4  ;;  %1899 = vmatmul.mubr.bf16.vlgmr.msra.gmra.mrb[0].mxu1 %v5465_v4  ;;  %v6491_v4 = vld [vmem:[#allocation2 + $0x3e8] ss:$16 sps:$4 sm:$0xff]  }
  0x95   :  { %1744 = vmatpush1.bf16.msra.mxu0 %v6398_v5  ;;  %1908 = vmatpush1.bf16.msra.mxu1 %v6401_v6  ;;  %v6498_v5 = vld [vmem:[#allocation2 + $0x404] ss:$16 sps:$4 sm:$0xff]   ;;  %v6501_v6 = vld [vmem:[#allocation2 + $0x40c] ss:$16 sps:$4 sm:$0xff]  }
  0x96   :  { %1745 = vmatprep.subr.bf16.mxu0 %v6406_v7  ;;  %1909 = vmatprep.subr.bf16.mxu1 %v6409_v8  ;;  %v5467_v7 = vcombine.low %v7224_v29, %v7224_v29  ;;  %v6496_v8 = vld [vmem:[#allocation2 + $0x400] ss:$16 sps:$4 sm:$0xff]   ;;  %v6531_v29 = vld [vmem:[#allocation2 + $0x4ac] ss:$16 sps:$4 sm:$0xff]  }
  0x97   :  { %1775 = vmatprep.mubr.bf16.mxu0 %v5468_v30  ;;  %1939 = vmatprep.mubr.bf16.mxu1 %v5468_v30  ;;  %v6526_v30 = vld [vmem:[#allocation2 + $0x4a0] ss:$16 sps:$4 sm:$0xff]  }
  0x99   :  { %1746 = vmatpush1.bf16.msra.mxu0 %v6404_v9  ;;  %1910 = vmatpush1.bf16.msra.mxu1 %v6407_v10  ;;  %v6499_v9 = vld [vmem:[#allocation2 + $0x408] ss:$16 sps:$4 sm:$0xff]   ;;  %v6504_v10 = vld [vmem:[#allocation2 + $0x424] ss:$16 sps:$4 sm:$0xff]  }
  0x9a   :  { %1747 = vmatprep.subr.bf16.mxu0 %v6412_v11  ;;  %1911 = vmatprep.subr.bf16.mxu1 %v6415_v12  ;;  %v7233_v11 = vld [vmem:[%s7543_s18 + $0x10] sm:$0xff]  ;;  %v6507_v12 = vld [vmem:[#allocation2 + $0x42c] ss:$16 sps:$4 sm:$0xff]  }
  0x9d   :  { %1748 = vmatpush1.bf16.msra.mxu0 %v6410_v13  ;;  %1912 = vmatpush1.bf16.msra.mxu1 %v6413_v14  ;;  %v5470_v13 = vcombine.high %v7233_v11, %v7233_v11  ;;  %v6502_v14 = vld [vmem:[#allocation2 + $0x420] ss:$16 sps:$4 sm:$0xff]  }
  0x9e   :  { %1749 = vmatprep.subr.bf16.mxu0 %v6418_v15  ;;  %1913 = vmatprep.subr.bf16.mxu1 %v6421_v16  ;;  %v6505_v15 = vld [vmem:[#allocation2 + $0x428] ss:$16 sps:$4 sm:$0xff]   ;;  %v6510_v16 = vld [vmem:[#allocation2 + $0x444] ss:$16 sps:$4 sm:$0xff]  }
  0xa1   :  { %1750 = vmatpush1.bf16.msra.mxu0 %v6416_v17  ;;  %1914 = vmatpush1.bf16.msra.mxu1 %v6419_v18  ;;  %v6513_v17 = vld [vmem:[#allocation2 + $0x44c] ss:$16 sps:$4 sm:$0xff]   ;;  %v6508_v18 = vld [vmem:[#allocation2 + $0x440] ss:$16 sps:$4 sm:$0xff]  }
  0xa2   :  { %1751 = vmatprep.subr.bf16.mxu0 %v6424_v19  ;;  %1915 = vmatprep.subr.bf16.mxu1 %v6427_v20  ;;  %v6511_v19 = vld [vmem:[#allocation2 + $0x448] ss:$16 sps:$4 sm:$0xff]   ;;  %v6516_v20 = vld [vmem:[#allocation2 + $0x464] ss:$16 sps:$4 sm:$0xff]  }
  0xa5   :  { %1752 = vmatpush1.bf16.msra.mxu0 %v6422_v21  ;;  %1916 = vmatpush1.bf16.msra.mxu1 %v6425_v22  ;;  %v6519_v21 = vld [vmem:[#allocation2 + $0x46c] ss:$16 sps:$4 sm:$0xff]   ;;  %v6514_v22 = vld [vmem:[#allocation2 + $0x460] ss:$16 sps:$4 sm:$0xff]  }
  0xa6   :  { %1753 = vmatprep.subr.bf16.mxu0 %v6430_v23  ;;  %1917 = vmatprep.subr.bf16.mxu1 %v6433_v24  ;;  %v6517_v23 = vld [vmem:[#allocation2 + $0x468] ss:$16 sps:$4 sm:$0xff]   ;;  %v6522_v24 = vld [vmem:[#allocation2 + $0x484] ss:$16 sps:$4 sm:$0xff]  }
  0xa9   :  { %1754 = vmatpush1.bf16.msra.mxu0 %v6428_v25  ;;  %1918 = vmatpush1.bf16.msra.mxu1 %v6431_v26  ;;  %v6525_v25 = vld [vmem:[#allocation2 + $0x48c] ss:$16 sps:$4 sm:$0xff]   ;;  %v6520_v26 = vld [vmem:[#allocation2 + $0x480] ss:$16 sps:$4 sm:$0xff]  }
  0xaa   :  { %1755 = vmatprep.subr.bf16.mxu0 %v6436_v27  ;;  %1919 = vmatprep.subr.bf16.mxu1 %v6439_v28  ;;  %v6523_v27 = vld [vmem:[#allocation2 + $0x488] ss:$16 sps:$4 sm:$0xff]   ;;  %v6528_v28 = vld [vmem:[#allocation2 + $0x4a4] ss:$16 sps:$4 sm:$0xff]  }
  0xad   :  { %1756 = vmatpush1.bf16.msra.mxu0 %v6434_v31  ;;  %1920 = vmatpush1.bf16.msra.mxu1 %v6437_v32  ;;  %v6529_v31 = vld [vmem:[#allocation2 + $0x4a8] ss:$16 sps:$4 sm:$0xff]   ;;  %v6534_v32 = vld [vmem:[#allocation2 + $0x4c4] ss:$16 sps:$4 sm:$0xff]  }
  0xae   :  { %1757 = vmatprep.subr.bf16.mxu0 %v6442_v33  ;;  %1921 = vmatprep.subr.bf16.mxu1 %v6445_v34  ;;  %v6537_v33 = vld [vmem:[#allocation2 + $0x4cc] ss:$16 sps:$4 sm:$0xff]   ;;  %v6532_v34 = vld [vmem:[#allocation2 + $0x4c0] ss:$16 sps:$4 sm:$0xff]  }
  0xb1   :  { %1758 = vmatpush1.bf16.msra.mxu0 %v6440_v35  ;;  %1922 = vmatpush1.bf16.msra.mxu1 %v6443_v36  ;;  %v6535_v35 = vld [vmem:[#allocation2 + $0x4c8] ss:$16 sps:$4 sm:$0xff]   ;;  %v6540_v36 = vld [vmem:[#allocation2 + $0x4e4] ss:$16 sps:$4 sm:$0xff]  }
  0xb2   :  { %1759 = vmatprep.subr.bf16.mxu0 %v6448_v37  ;;  %1923 = vmatprep.subr.bf16.mxu1 %v6451_v38  ;;  %v6543_v37 = vld [vmem:[#allocation2 + $0x4ec] ss:$16 sps:$4 sm:$0xff]   ;;  %v6538_v38 = vld [vmem:[#allocation2 + $0x4e0] ss:$16 sps:$4 sm:$0xff]  }
  0xb5   :  { %1760 = vmatpush1.bf16.msra.mxu0 %v6446_v39  ;;  %1924 = vmatpush1.bf16.msra.mxu1 %v6449_v40  ;;  %v6541_v39 = vld [vmem:[#allocation2 + $0x4e8] ss:$16 sps:$4 sm:$0xff]   ;;  %v6546_v40 = vld [vmem:[#allocation2 + $0x504] ss:$16 sps:$4 sm:$0xff]  }
  0xb6   :  { %1761 = vmatprep.subr.bf16.mxu0 %v6454_v41  ;;  %1925 = vmatprep.subr.bf16.mxu1 %v6457_v42  ;;  %v6549_v41 = vld [vmem:[#allocation2 + $0x50c] ss:$16 sps:$4 sm:$0xff]   ;;  %v6544_v42 = vld [vmem:[#allocation2 + $0x500] ss:$16 sps:$4 sm:$0xff]  }
  0xb9   :  { %1762 = vmatpush1.bf16.msra.mxu0 %v6452_v43  ;;  %1926 = vmatpush1.bf16.msra.mxu1 %v6455_v44  ;;  %v6547_v43 = vld [vmem:[#allocation2 + $0x508] ss:$16 sps:$4 sm:$0xff]   ;;  %v6552_v44 = vld [vmem:[#allocation2 + $0x524] ss:$16 sps:$4 sm:$0xff]  }
  0xba   :  { %1763 = vmatprep.subr.bf16.mxu0 %v6460_v45  ;;  %1927 = vmatprep.subr.bf16.mxu1 %v6463_v46  ;;  %v6555_v45 = vld [vmem:[#allocation2 + $0x52c] ss:$16 sps:$4 sm:$0xff]   ;;  %v6550_v46 = vld [vmem:[#allocation2 + $0x520] ss:$16 sps:$4 sm:$0xff]  }
  0xbd   :  { %1764 = vmatpush1.bf16.msra.mxu0 %v6458_v47  ;;  %1928 = vmatpush1.bf16.msra.mxu1 %v6461_v48  ;;  %v6553_v47 = vld [vmem:[#allocation2 + $0x528] ss:$16 sps:$4 sm:$0xff]   ;;  %v6558_v48 = vld [vmem:[#allocation2 + $0x544] ss:$16 sps:$4 sm:$0xff]  }
  0xbe   :  { %1765 = vmatprep.subr.bf16.mxu0 %v6466_v49  ;;  %1929 = vmatprep.subr.bf16.mxu1 %v6469_v50  ;;  %v6561_v49 = vld [vmem:[#allocation2 + $0x54c] ss:$16 sps:$4 sm:$0xff]   ;;  %v6556_v50 = vld [vmem:[#allocation2 + $0x540] ss:$16 sps:$4 sm:$0xff]  }
  0xc1   :  { %1766 = vmatpush1.bf16.msra.mxu0 %v6464_v51  ;;  %1930 = vmatpush1.bf16.msra.mxu1 %v6467_v52  ;;  %v6559_v51 = vld [vmem:[#allocation2 + $0x548] ss:$16 sps:$4 sm:$0xff]   ;;  %v6564_v52 = vld [vmem:[#allocation2 + $0x564] ss:$16 sps:$4 sm:$0xff]  }
  0xc2   :  { %1767 = vmatprep.subr.bf16.mxu0 %v6472_v53  ;;  %1931 = vmatprep.subr.bf16.mxu1 %v6475_v54  ;;  %v6567_v53 = vld [vmem:[#allocation2 + $0x56c] ss:$16 sps:$4 sm:$0xff]   ;;  %v6562_v54 = vld [vmem:[#allocation2 + $0x560] ss:$16 sps:$4 sm:$0xff]  }
  0xc5   :  { %1768 = vmatpush1.bf16.msra.mxu0 %v6470_v55  ;;  %1932 = vmatpush1.bf16.msra.mxu1 %v6473_v56  ;;  %v6565_v55 = vld [vmem:[#allocation2 + $0x568] ss:$16 sps:$4 sm:$0xff]   ;;  %v6570_v56 = vld [vmem:[#allocation2 + $0x584] ss:$16 sps:$4 sm:$0xff]  }
  0xc6   :  { %1769 = vmatprep.subr.bf16.mxu0 %v6478_v57  ;;  %1933 = vmatprep.subr.bf16.mxu1 %v6481_v58  ;;  %v6573_v57 = vld [vmem:[#allocation2 + $0x58c] ss:$16 sps:$4 sm:$0xff]   ;;  %v6568_v58 = vld [vmem:[#allocation2 + $0x580] ss:$16 sps:$4 sm:$0xff]  }
  0xc9   :  { %1770 = vmatpush1.bf16.msra.mxu0 %v6476_v59  ;;  %1934 = vmatpush1.bf16.msra.mxu1 %v6479_v60  ;;  %v6571_v59 = vld [vmem:[#allocation2 + $0x588] ss:$16 sps:$4 sm:$0xff]   ;;  %v6576_v60 = vld [vmem:[#allocation2 + $0x5a4] ss:$16 sps:$4 sm:$0xff]  }
  0xca   :  { %1771 = vmatprep.subr.bf16.mxu0 %v6484_v61  ;;  %1935 = vmatprep.subr.bf16.mxu1 %v6487_v62  ;;  %v6579_v61 = vld [vmem:[#allocation2 + $0x5ac] ss:$16 sps:$4 sm:$0xff]   ;;  %v6574_v62 = vld [vmem:[#allocation2 + $0x5a0] ss:$16 sps:$4 sm:$0xff]  }
  0xcd   :  { %1772 = vmatpush1.bf16.msra.mxu0 %v6482_v63  ;;  %1936 = vmatpush1.bf16.msra.mxu1 %v6485_v0  ;;  %v6577_v63 = vld [vmem:[#allocation2 + $0x5a8] ss:$16 sps:$4 sm:$0xff]   ;;  %v6582_v0 = vld [vmem:[#allocation2 + $0x5c4] ss:$16 sps:$4 sm:$0xff]  }
  0xce   :  { %1773 = vmatprep.subr.bf16.mxu0 %v6490_v1  ;;  %1937 = vmatprep.subr.bf16.mxu1 %v6493_v2  ;;  %v6585_v1 = vld [vmem:[#allocation2 + $0x5cc] ss:$16 sps:$4 sm:$0xff]   ;;  %v6580_v2 = vld [vmem:[#allocation2 + $0x5c0] ss:$16 sps:$4 sm:$0xff]  }
  0xd1   :  { %1774 = vmatpush1.bf16.msra.mxu0 %v6488_v3  ;;  %1938 = vmatpush1.bf16.msra.mxu1 %v6491_v4  ;;  %v6583_v3 = vld [vmem:[#allocation2 + $0x5c8] ss:$16 sps:$4 sm:$0xff]   ;;  %v6588_v4 = vld [vmem:[#allocation2 + $0x5e4] ss:$16 sps:$4 sm:$0xff]  }
  0xd2   :  { %1784 = vmatprep.subr.bf16.mxu0 %v6498_v5  ;;  %1948 = vmatprep.subr.bf16.mxu1 %v6501_v6  ;;  %v6591_v5 = vld [vmem:[#allocation2 + $0x5ec] ss:$16 sps:$4 sm:$0xff]   ;;  %v6586_v6 = vld [vmem:[#allocation2 + $0x5e0] ss:$16 sps:$4 sm:$0xff]  }
  0xd4   :  { %1776 = vmatmul.mubr.bf16.vlgmr.msra.gmra.mrb[0].mxu0 %v5467_v7  ;;  %1940 = vmatmul.mubr.bf16.vlgmr.msra.gmra.mrb[0].mxu1 %v5467_v7  ;;  %v6589_v7 = vld [vmem:[#allocation2 + $0x5e8] ss:$16 sps:$4 sm:$0xff]  }
  0xd5   :  { %1785 = vmatpush1.bf16.msra.mxu0 %v6496_v8  ;;  %1949 = vmatpush1.bf16.msra.mxu1 %v6499_v9  ;;  %v6596_v8 = vld [vmem:[#allocation2 + $0x604] ss:$16 sps:$4 sm:$0xff]   ;;  %v6599_v9 = vld [vmem:[#allocation2 + $0x60c] ss:$16 sps:$4 sm:$0xff]  }
  0xd6   :  { %1786 = vmatprep.subr.bf16.mxu0 %v6504_v10  ;;  %1950 = vmatprep.subr.bf16.mxu1 %v6507_v12  ;;  %v7240_v10 = vld [vmem:[%s7543_s18 + $0x18] sm:$0xff]  ;;  %v6594_v12 = vld [vmem:[#allocation2 + $0x600] ss:$16 sps:$4 sm:$0xff]  }
  0xd7   :  { %1816 = vmatprep.mubr.bf16.mxu0 %v5470_v13  ;;  %1980 = vmatprep.mubr.bf16.mxu1 %v5470_v13  ;;  %v6597_v13 = vld [vmem:[#allocation2 + $0x608] ss:$16 sps:$4 sm:$0xff]  }
  0xd9   :  { %1787 = vmatpush1.bf16.msra.mxu0 %v6502_v14  ;;  %1951 = vmatpush1.bf16.msra.mxu1 %v6505_v15  ;;  %v5469_v14 = vcombine.low %v7233_v11, %v7233_v11  ;;  %v6602_v15 = vld [vmem:[#allocation2 + $0x624] ss:$16 sps:$4 sm:$0xff]   ;;  %v6606_v11 = vld [vmem:[#allocation2 + $0x640] ss:$16 sps:$4 sm:$0xff]  }
  0xda   :  { %1788 = vmatprep.subr.bf16.mxu0 %v6510_v16  ;;  %1952 = vmatprep.subr.bf16.mxu1 %v6513_v17  ;;  %v6605_v16 = vld [vmem:[#allocation2 + $0x62c] ss:$16 sps:$4 sm:$0xff]   ;;  %v6600_v17 = vld [vmem:[#allocation2 + $0x620] ss:$16 sps:$4 sm:$0xff]  }
  0xdd   :  { %1789 = vmatpush1.bf16.msra.mxu0 %v6508_v18  ;;  %1953 = vmatpush1.bf16.msra.mxu1 %v6511_v19  ;;  %v6603_v18 = vld [vmem:[#allocation2 + $0x628] ss:$16 sps:$4 sm:$0xff]   ;;  %v5472_v19 = vcombine.high %v7240_v10, %v7240_v10 }
  0xde   :  { %1790 = vmatprep.subr.bf16.mxu0 %v6516_v20  ;;  %1954 = vmatprep.subr.bf16.mxu1 %v6519_v21  ;;  %v6608_v20 = vld [vmem:[#allocation2 + $0x644] ss:$16 sps:$4 sm:$0xff]   ;;  %v6611_v21 = vld [vmem:[#allocation2 + $0x64c] ss:$16 sps:$4 sm:$0xff]  }
  0xe1   :  { %1791 = vmatpush1.bf16.msra.mxu0 %v6514_v22  ;;  %1955 = vmatpush1.bf16.msra.mxu1 %v6517_v23  ;;  %v6609_v22 = vld [vmem:[#allocation2 + $0x648] ss:$16 sps:$4 sm:$0xff]   ;;  %v6614_v23 = vld [vmem:[#allocation2 + $0x664] ss:$16 sps:$4 sm:$0xff]  }
  0xe2   :  { %1792 = vmatprep.subr.bf16.mxu0 %v6522_v24  ;;  %1956 = vmatprep.subr.bf16.mxu1 %v6525_v25  ;;  %v6617_v24 = vld [vmem:[#allocation2 + $0x66c] ss:$16 sps:$4 sm:$0xff]   ;;  %v6612_v25 = vld [vmem:[#allocation2 + $0x660] ss:$16 sps:$4 sm:$0xff]  }
  0xe5   :  { %1793 = vmatpush1.bf16.msra.mxu0 %v6520_v26  ;;  %1957 = vmatpush1.bf16.msra.mxu1 %v6523_v27  ;;  %v6615_v26 = vld [vmem:[#allocation2 + $0x668] ss:$16 sps:$4 sm:$0xff]   ;;  %v6620_v27 = vld [vmem:[#allocation2 + $0x684] ss:$16 sps:$4 sm:$0xff]  }
  0xe6   :  { %1794 = vmatprep.subr.bf16.mxu0 %v6528_v28  ;;  %1958 = vmatprep.subr.bf16.mxu1 %v6531_v29  ;;  %v6623_v28 = vld [vmem:[#allocation2 + $0x68c] ss:$16 sps:$4 sm:$0xff]   ;;  %v6618_v29 = vld [vmem:[#allocation2 + $0x680] ss:$16 sps:$4 sm:$0xff]  }
  0xe9   :  { %1795 = vmatpush1.bf16.msra.mxu0 %v6526_v30  ;;  %1959 = vmatpush1.bf16.msra.mxu1 %v6529_v31  ;;  %v6621_v30 = vld [vmem:[#allocation2 + $0x688] ss:$16 sps:$4 sm:$0xff]   ;;  %v6626_v31 = vld [vmem:[#allocation2 + $0x6a4] ss:$16 sps:$4 sm:$0xff]  }
  0xea   :  { %1796 = vmatprep.subr.bf16.mxu0 %v6534_v32  ;;  %1960 = vmatprep.subr.bf16.mxu1 %v6537_v33  ;;  %v6629_v32 = vld [vmem:[#allocation2 + $0x6ac] ss:$16 sps:$4 sm:$0xff]   ;;  %v6624_v33 = vld [vmem:[#allocation2 + $0x6a0] ss:$16 sps:$4 sm:$0xff]  }
  0xed   :  { %1797 = vmatpush1.bf16.msra.mxu0 %v6532_v34  ;;  %1961 = vmatpush1.bf16.msra.mxu1 %v6535_v35  ;;  %v6627_v34 = vld [vmem:[#allocation2 + $0x6a8] ss:$16 sps:$4 sm:$0xff]   ;;  %v6632_v35 = vld [vmem:[#allocation2 + $0x6c4] ss:$16 sps:$4 sm:$0xff]  }
  0xee   :  { %1798 = vmatprep.subr.bf16.mxu0 %v6540_v36  ;;  %1962 = vmatprep.subr.bf16.mxu1 %v6543_v37  ;;  %v6635_v36 = vld [vmem:[#allocation2 + $0x6cc] ss:$16 sps:$4 sm:$0xff]   ;;  %v6630_v37 = vld [vmem:[#allocation2 + $0x6c0] ss:$16 sps:$4 sm:$0xff]  }
  0xf1   :  { %1799 = vmatpush1.bf16.msra.mxu0 %v6538_v38  ;;  %1963 = vmatpush1.bf16.msra.mxu1 %v6541_v39  ;;  %v6633_v38 = vld [vmem:[#allocation2 + $0x6c8] ss:$16 sps:$4 sm:$0xff]   ;;  %v6638_v39 = vld [vmem:[#allocation2 + $0x6e4] ss:$16 sps:$4 sm:$0xff]  }
  0xf2   :  { %1800 = vmatprep.subr.bf16.mxu0 %v6546_v40  ;;  %1964 = vmatprep.subr.bf16.mxu1 %v6549_v41  ;;  %v6641_v40 = vld [vmem:[#allocation2 + $0x6ec] ss:$16 sps:$4 sm:$0xff]   ;;  %v6636_v41 = vld [vmem:[#allocation2 + $0x6e0] ss:$16 sps:$4 sm:$0xff]  }
  0xf5   :  { %1801 = vmatpush1.bf16.msra.mxu0 %v6544_v42  ;;  %1965 = vmatpush1.bf16.msra.mxu1 %v6547_v43  ;;  %v6639_v42 = vld [vmem:[#allocation2 + $0x6e8] ss:$16 sps:$4 sm:$0xff]   ;;  %v6644_v43 = vld [vmem:[#allocation2 + $0x704] ss:$16 sps:$4 sm:$0xff]  }
  0xf6   :  { %1802 = vmatprep.subr.bf16.mxu0 %v6552_v44  ;;  %1966 = vmatprep.subr.bf16.mxu1 %v6555_v45  ;;  %v6647_v44 = vld [vmem:[#allocation2 + $0x70c] ss:$16 sps:$4 sm:$0xff]   ;;  %v6642_v45 = vld [vmem:[#allocation2 + $0x700] ss:$16 sps:$4 sm:$0xff]  }
  0xf9   :  { %1803 = vmatpush1.bf16.msra.mxu0 %v6550_v46  ;;  %1967 = vmatpush1.bf16.msra.mxu1 %v6553_v47  ;;  %v6645_v46 = vld [vmem:[#allocation2 + $0x708] ss:$16 sps:$4 sm:$0xff]   ;;  %v6650_v47 = vld [vmem:[#allocation2 + $0x724] ss:$16 sps:$4 sm:$0xff]  }
  0xfa   :  { %1804 = vmatprep.subr.bf16.mxu0 %v6558_v48  ;;  %1968 = vmatprep.subr.bf16.mxu1 %v6561_v49  ;;  %v6653_v48 = vld [vmem:[#allocation2 + $0x72c] ss:$16 sps:$4 sm:$0xff]   ;;  %v6648_v49 = vld [vmem:[#allocation2 + $0x720] ss:$16 sps:$4 sm:$0xff]  }
  0xfd   :  { %1805 = vmatpush1.bf16.msra.mxu0 %v6556_v50  ;;  %1969 = vmatpush1.bf16.msra.mxu1 %v6559_v51  ;;  %v6651_v50 = vld [vmem:[#allocation2 + $0x728] ss:$16 sps:$4 sm:$0xff]   ;;  %v6656_v51 = vld [vmem:[#allocation2 + $0x744] ss:$16 sps:$4 sm:$0xff]  }
  0xfe   :  { %1806 = vmatprep.subr.bf16.mxu0 %v6564_v52  ;;  %1970 = vmatprep.subr.bf16.mxu1 %v6567_v53  ;;  %v6659_v52 = vld [vmem:[#allocation2 + $0x74c] ss:$16 sps:$4 sm:$0xff]   ;;  %v6654_v53 = vld [vmem:[#allocation2 + $0x740] ss:$16 sps:$4 sm:$0xff]  }
 0x101   :  { %1807 = vmatpush1.bf16.msra.mxu0 %v6562_v54  ;;  %1971 = vmatpush1.bf16.msra.mxu1 %v6565_v55  ;;  %v6657_v54 = vld [vmem:[#allocation2 + $0x748] ss:$16 sps:$4 sm:$0xff]   ;;  %v6662_v55 = vld [vmem:[#allocation2 + $0x764] ss:$16 sps:$4 sm:$0xff]  }
 0x102   :  { %1808 = vmatprep.subr.bf16.mxu0 %v6570_v56  ;;  %1972 = vmatprep.subr.bf16.mxu1 %v6573_v57  ;;  %v6665_v56 = vld [vmem:[#allocation2 + $0x76c] ss:$16 sps:$4 sm:$0xff]   ;;  %v6660_v57 = vld [vmem:[#allocation2 + $0x760] ss:$16 sps:$4 sm:$0xff]  }
 0x105   :  { %1809 = vmatpush1.bf16.msra.mxu0 %v6568_v58  ;;  %1973 = vmatpush1.bf16.msra.mxu1 %v6571_v59  ;;  %v6663_v58 = vld [vmem:[#allocation2 + $0x768] ss:$16 sps:$4 sm:$0xff]   ;;  %v6668_v59 = vld [vmem:[#allocation2 + $0x784] ss:$16 sps:$4 sm:$0xff]  }
 0x106   :  { %1810 = vmatprep.subr.bf16.mxu0 %v6576_v60  ;;  %1974 = vmatprep.subr.bf16.mxu1 %v6579_v61  ;;  %v6671_v60 = vld [vmem:[#allocation2 + $0x78c] ss:$16 sps:$4 sm:$0xff]   ;;  %v6666_v61 = vld [vmem:[#allocation2 + $0x780] ss:$16 sps:$4 sm:$0xff]  }
 0x109   :  { %1811 = vmatpush1.bf16.msra.mxu0 %v6574_v62  ;;  %1975 = vmatpush1.bf16.msra.mxu1 %v6577_v63  ;;  %v6669_v62 = vld [vmem:[#allocation2 + $0x788] ss:$16 sps:$4 sm:$0xff]   ;;  %v6674_v63 = vld [vmem:[#allocation2 + $0x7a4] ss:$16 sps:$4 sm:$0xff]  }
 0x10a   :  { %1812 = vmatprep.subr.bf16.mxu0 %v6582_v0  ;;  %1976 = vmatprep.subr.bf16.mxu1 %v6585_v1  ;;  %v6677_v0 = vld [vmem:[#allocation2 + $0x7ac] ss:$16 sps:$4 sm:$0xff]   ;;  %v6672_v1 = vld [vmem:[#allocation2 + $0x7a0] ss:$16 sps:$4 sm:$0xff]  }
 0x10d   :  { %1813 = vmatpush1.bf16.msra.mxu0 %v6580_v2  ;;  %1977 = vmatpush1.bf16.msra.mxu1 %v6583_v3  ;;  %v6675_v2 = vld [vmem:[#allocation2 + $0x7a8] ss:$16 sps:$4 sm:$0xff]   ;;  %v6680_v3 = vld [vmem:[#allocation2 + $0x7c4] ss:$16 sps:$4 sm:$0xff]  }
 0x10e   :  { %1814 = vmatprep.subr.bf16.mxu0 %v6588_v4  ;;  %1978 = vmatprep.subr.bf16.mxu1 %v6591_v5  ;;  %v6683_v4 = vld [vmem:[#allocation2 + $0x7cc] ss:$16 sps:$4 sm:$0xff]   ;;  %v6678_v5 = vld [vmem:[#allocation2 + $0x7c0] ss:$16 sps:$4 sm:$0xff]  }
 0x111   :  { %1815 = vmatpush1.bf16.msra.mxu0 %v6586_v6  ;;  %1979 = vmatpush1.bf16.msra.mxu1 %v6589_v7  ;;  %v6681_v6 = vld [vmem:[#allocation2 + $0x7c8] ss:$16 sps:$4 sm:$0xff]   ;;  %v6686_v7 = vld [vmem:[#allocation2 + $0x7e4] ss:$16 sps:$4 sm:$0xff]  }
 0x112   :  { %1825 = vmatprep.subr.bf16.mxu0 %v6596_v8  ;;  %1989 = vmatprep.subr.bf16.mxu1 %v6599_v9  ;;  %v6689_v8 = vld [vmem:[#allocation2 + $0x7ec] ss:$16 sps:$4 sm:$0xff]   ;;  %v6684_v9 = vld [vmem:[#allocation2 + $0x7e0] ss:$16 sps:$4 sm:$0xff]  }
 0x114   :  { %1817 = vmatmul.mubr.bf16.vlgmr.msra.gmra.mrb[0].mxu0 %v5469_v14  ;;  %1981 = vmatmul.mubr.bf16.vlgmr.msra.gmra.mrb[0].mxu1 %v5469_v14  ;;  %v5471_v14 = vcombine.low %v7240_v10, %v7240_v10  ;;  %v6704_v10 = vld [vmem:[#allocation4 + $0x40] ss:$8 sps:$4 sm:$0xff]  }
 0x115   :  { %1826 = vmatpush1.bf16.msra.mxu0 %v6594_v12  ;;  %1990 = vmatpush1.bf16.msra.mxu1 %v6597_v13  ;;  %v6687_v12 = vld [vmem:[#allocation2 + $0x7e8] ss:$16 sps:$4 sm:$0xff]   ;;  %v6694_v13 = vld [vmem:[#allocation4 + $0x4] ss:$8 sps:$4 sm:$0xff]  }
 0x116   :  { %1827 = vmatprep.subr.bf16.mxu0 %v6602_v15  ;;  %1991 = vmatprep.subr.bf16.mxu1 %v6605_v16  ;;  %v6692_v15 = vld [vmem:[#allocation4] ss:$8 sps:$4 sm:$0xff]   ;;  %v6697_v16 = vld [vmem:[#allocation4 + $0x14] ss:$8 sps:$4 sm:$0xff]  }
 0x117   :  { %1857 = vmatprep.mubr.bf16.mxu0 %v5472_v19  ;;  %2021 = vmatprep.mubr.bf16.mxu1 %v5472_v19  ;;  %v6698_v19 = vld [vmem:[#allocation4 + $0x20] ss:$8 sps:$4 sm:$0xff]  }
 0x119   :  { %1828 = vmatpush1.bf16.msra.mxu0 %v6600_v17  ;;  %1992 = vmatpush1.bf16.msra.mxu1 %v6603_v18  ;;  %v6695_v17 = vld [vmem:[#allocation4 + $0x10] ss:$8 sps:$4 sm:$0xff]   ;;  %v6700_v18 = vld [vmem:[#allocation4 + $0x24] ss:$8 sps:$4 sm:$0xff]  }
 0x11a   :  { %1829 = vmatprep.subr.bf16.mxu0 %v6608_v20  ;;  %1993 = vmatprep.subr.bf16.mxu1 %v6611_v21  ;;  %v6703_v20 = vld [vmem:[#allocation4 + $0x34] ss:$8 sps:$4 sm:$0xff]   ;;  %v6701_v21 = vld [vmem:[#allocation4 + $0x30] ss:$8 sps:$4 sm:$0xff]  }
 0x11d   :  { %1830 = vmatpush1.bf16.msra.mxu0 %v6606_v11  ;;  %1994 = vmatpush1.bf16.msra.mxu1 %v6609_v22  ;;  %v6706_v11 = vld [vmem:[#allocation4 + $0x44] ss:$8 sps:$4 sm:$0xff]   ;;  %v6709_v22 = vld [vmem:[#allocation4 + $0x54] ss:$8 sps:$4 sm:$0xff]  }
 0x11e   :  { %1831 = vmatprep.subr.bf16.mxu0 %v6614_v23  ;;  %1995 = vmatprep.subr.bf16.mxu1 %v6617_v24  ;;  %v6707_v23 = vld [vmem:[#allocation4 + $0x50] ss:$8 sps:$4 sm:$0xff]   ;;  %v6712_v24 = vld [vmem:[#allocation4 + $0x64] ss:$8 sps:$4 sm:$0xff]  }
 0x121   :  { %1832 = vmatpush1.bf16.msra.mxu0 %v6612_v25  ;;  %1996 = vmatpush1.bf16.msra.mxu1 %v6615_v26  ;;  %v6710_v25 = vld [vmem:[#allocation4 + $0x60] ss:$8 sps:$4 sm:$0xff]   ;;  %v6715_v26 = vld [vmem:[#allocation4 + $0x74] ss:$8 sps:$4 sm:$0xff]  }
 0x122   :  { %1833 = vmatprep.subr.bf16.mxu0 %v6620_v27  ;;  %1997 = vmatprep.subr.bf16.mxu1 %v6623_v28  ;;  %v6713_v27 = vld [vmem:[#allocation4 + $0x70] ss:$8 sps:$4 sm:$0xff]   ;;  %v6718_v28 = vld [vmem:[#allocation4 + $0x84] ss:$8 sps:$4 sm:$0xff]  }
 0x125   :  { %1834 = vmatpush1.bf16.msra.mxu0 %v6618_v29  ;;  %1998 = vmatpush1.bf16.msra.mxu1 %v6621_v30  ;;  %v6716_v29 = vld [vmem:[#allocation4 + $0x80] ss:$8 sps:$4 sm:$0xff]   ;;  %v6721_v30 = vld [vmem:[#allocation4 + $0x94] ss:$8 sps:$4 sm:$0xff]  }
 0x126   :  { %1835 = vmatprep.subr.bf16.mxu0 %v6626_v31  ;;  %1999 = vmatprep.subr.bf16.mxu1 %v6629_v32  ;;  %v6719_v31 = vld [vmem:[#allocation4 + $0x90] ss:$8 sps:$4 sm:$0xff]   ;;  %v6724_v32 = vld [vmem:[#allocation4 + $0xa4] ss:$8 sps:$4 sm:$0xff]  }
 0x129   :  { %1836 = vmatpush1.bf16.msra.mxu0 %v6624_v33  ;;  %2000 = vmatpush1.bf16.msra.mxu1 %v6627_v34  ;;  %v6722_v33 = vld [vmem:[#allocation4 + $0xa0] ss:$8 sps:$4 sm:$0xff]   ;;  %v6727_v34 = vld [vmem:[#allocation4 + $0xb4] ss:$8 sps:$4 sm:$0xff]  }
 0x12a   :  { %1837 = vmatprep.subr.bf16.mxu0 %v6632_v35  ;;  %2001 = vmatprep.subr.bf16.mxu1 %v6635_v36  ;;  %v6725_v35 = vld [vmem:[#allocation4 + $0xb0] ss:$8 sps:$4 sm:$0xff]   ;;  %v6730_v36 = vld [vmem:[#allocation4 + $0xc4] ss:$8 sps:$4 sm:$0xff]  }
 0x12d   :  { %1838 = vmatpush1.bf16.msra.mxu0 %v6630_v37  ;;  %2002 = vmatpush1.bf16.msra.mxu1 %v6633_v38  ;;  %v6728_v37 = vld [vmem:[#allocation4 + $0xc0] ss:$8 sps:$4 sm:$0xff]   ;;  %v6733_v38 = vld [vmem:[#allocation4 + $0xd4] ss:$8 sps:$4 sm:$0xff]  }
 0x12e   :  { %1839 = vmatprep.subr.bf16.mxu0 %v6638_v39  ;;  %2003 = vmatprep.subr.bf16.mxu1 %v6641_v40  ;;  %v6731_v39 = vld [vmem:[#allocation4 + $0xd0] ss:$8 sps:$4 sm:$0xff]   ;;  %v6736_v40 = vld [vmem:[#allocation4 + $0xe4] ss:$8 sps:$4 sm:$0xff]  }
 0x131   :  { %1840 = vmatpush1.bf16.msra.mxu0 %v6636_v41  ;;  %2004 = vmatpush1.bf16.msra.mxu1 %v6639_v42  ;;  %v6734_v41 = vld [vmem:[#allocation4 + $0xe0] ss:$8 sps:$4 sm:$0xff]   ;;  %v6739_v42 = vld [vmem:[#allocation4 + $0xf4] ss:$8 sps:$4 sm:$0xff]  }
 0x132   :  { %1841 = vmatprep.subr.bf16.mxu0 %v6644_v43  ;;  %2005 = vmatprep.subr.bf16.mxu1 %v6647_v44  ;;  %v6737_v43 = vld [vmem:[#allocation4 + $0xf0] ss:$8 sps:$4 sm:$0xff]   ;;  %v6742_v44 = vld [vmem:[#allocation4 + $0x104] ss:$8 sps:$4 sm:$0xff]  }
 0x135   :  { %1842 = vmatpush1.bf16.msra.mxu0 %v6642_v45  ;;  %2006 = vmatpush1.bf16.msra.mxu1 %v6645_v46  ;;  %v6788_v45 = vld [vmem:[%s7523_s5 + $0x40] sm:$0xff]  }
 0x136   :  { %1843 = vmatprep.subr.bf16.mxu0 %v6650_v47  ;;  %2007 = vmatprep.subr.bf16.mxu1 %v6653_v48  ;;  %v6789_v46 = vld [vmem:[%s7523_s5] sm:$0xff]   ;;  %v6790_v47 = vld [vmem:[%s7523_s5 + $0x48] sm:$0xff]  }
 0x137   :  { %v6791_v48 = vld [vmem:[%s7523_s5 + $0x8] sm:$0xff]  }
 0x139   :  { %1844 = vmatpush1.bf16.msra.mxu0 %v6648_v49  ;;  %2008 = vmatpush1.bf16.msra.mxu1 %v6651_v50  ;;  %v6792_v49 = vld [vmem:[%s7523_s5 + $0x50] sm:$0xff]  }
 0x13a   :  { %1845 = vmatprep.subr.bf16.mxu0 %v6656_v51  ;;  %2009 = vmatprep.subr.bf16.mxu1 %v6659_v52  ;;  %v6793_v50 = vld [vmem:[%s7523_s5 + $0x10] sm:$0xff]   ;;  %v6794_v51 = vld [vmem:[%s7523_s5 + $0x58] sm:$0xff]  }
 0x13b   :  { %v6795_v52 = vld [vmem:[%s7523_s5 + $0x18] sm:$0xff]  }
 0x13d   :  { %1846 = vmatpush1.bf16.msra.mxu0 %v6654_v53  ;;  %2010 = vmatpush1.bf16.msra.mxu1 %v6657_v54  ;;  %v374_v53 = vlaneseq }
 0x13e   :  { %1847 = vmatprep.subr.bf16.mxu0 %v6662_v55  ;;  %2011 = vmatprep.subr.bf16.mxu1 %v6665_v56  ;;  %v7280_v56 = vld [vmem:[%s7520_s2] sm:$0xf] }
 0x13f   :  { %v7272_v54 = vshrl.u32 %v374_v53, 7  ;;  %v6798_v53 = vld [vmem:[%s7523_s5 + $0x68] sm:$0xff]  }
 0x141   :  { %1848 = vmatpush1.bf16.msra.mxu0 %v6660_v57  ;;  %2012 = vmatpush1.bf16.msra.mxu1 %v6663_v58  ;;  %v7275_v55 = vsub.s32 0, %v7272_v54  ;;  %v7283_v57 = vsub.s32 1, %v7272_v54  ;;  %v7286_v58 = vsub.s32 3, %v7272_v54 }
 0x142   :  { %1849 = vmatprep.subr.bf16.mxu0 %v6668_v59  ;;  %2013 = vmatprep.subr.bf16.mxu1 %v6671_v60 }
 0x143   :  { %v377_v59 = vrot.slane %v7280_v56, %v7275_v55  ;;  %v381_v60 = vrot.slane %v7280_v56, %v7283_v57 }
 0x145   :  { %1850 = vmatpush1.bf16.msra.mxu0 %v6666_v61  ;;  %2014 = vmatpush1.bf16.msra.mxu1 %v6669_v62  ;;  %v389_v61 = vrot.slane %v7280_v56, %v7286_v58 }
 0x146   :  { %1851 = vmatprep.subr.bf16.mxu0 %v6674_v63  ;;  %2015 = vmatprep.subr.bf16.mxu1 %v6677_v0 }
 0x149   :  { %1852 = vmatpush1.bf16.msra.mxu0 %v6672_v1  ;;  %2016 = vmatpush1.bf16.msra.mxu1 %v6675_v2 }
 0x14a   :  { %1853 = vmatprep.subr.bf16.mxu0 %v6680_v3  ;;  %2017 = vmatprep.subr.bf16.mxu1 %v6683_v4 }
 0x14d   :  { %1854 = vmatpush1.bf16.msra.mxu0 %v6678_v5  ;;  %2018 = vmatpush1.bf16.msra.mxu1 %v6681_v6 }
 0x14e   :  { %1855 = vmatprep.subr.bf16.mxu0 %v6686_v7  ;;  %2019 = vmatprep.subr.bf16.mxu1 %v6689_v8 }
 0x151   :  { %1856 = vmatpush1.bf16.msra.mxu0 %v6684_v9  ;;  %2020 = vmatpush1.bf16.msra.mxu1 %v6687_v12 }
 0x152   :  { %2434 = vmatprep.subr.bf16.mxu0 %v6694_v13  ;;  %6161 = vmatprep.subr.bf16.mxu1 %v6788_v45  ;;  %v6784_v45 = vld [vmem:[#allocation4 + $0x1e4] ss:$8 sps:$4 sm:$0xff]  }
 0x154   :  { %1858 = vmatmul.mubr.bf16.vlgmr.msra.gmra.mrb[0].mxu0 %v5471_v14  ;;  %2022 = vmatmul.mubr.bf16.vlgmr.msra.gmra.mrb[0].mxu1 %v5471_v14 }
 0x155   :  { %2435 = vmatpush1.bf16.msra.mxu0 %v6692_v15  ;;  %6162 = vmatpush3.bf16.msra.mxu1 %v6789_v46  ;;  %v6740_v15 = vld [vmem:[#allocation4 + $0x100] ss:$8 sps:$4 sm:$0xff]  }
 0x156   :  { %2436 = vmatprep.subr.bf16.mxu0 %v6697_v16  ;;  %6163 = vmatprep.subr.bf16.mxu1 %v6790_v47  ;;  %v6782_v46 = vld [vmem:[#allocation4 + $0x1e0] ss:$8 sps:$4 sm:$0xff]   ;;  %v6787_v47 = vld [vmem:[#allocation4 + $0x1f4] ss:$8 sps:$4 sm:$0xff]  }
 0x159   :  { %2437 = vmatpush1.bf16.msra.mxu0 %v6695_v17  ;;  %6164 = vmatpush3.bf16.msra.mxu1 %v6791_v48  ;;  %v6745_v17 = vld [vmem:[#allocation4 + $0x114] ss:$8 sps:$4 sm:$0xff]   ;;  %v6785_v48 = vld [vmem:[#allocation4 + $0x1f0] ss:$8 sps:$4 sm:$0xff]  }
 0x15a   :  { %2438 = vmatprep.subr.bf16.mxu0 %v6700_v18  ;;  %6165 = vmatprep.subr.bf16.mxu1 %v6792_v49 }
 0x15d   :  { %2439 = vmatpush1.bf16.msra.mxu0 %v6698_v19  ;;  %6166 = vmatpush3.bf16.msra.mxu1 %v6793_v50  ;;  %v6743_v19 = vld [vmem:[#allocation4 + $0x110] ss:$8 sps:$4 sm:$0xff]  }
 0x15e   :  { %2440 = vmatprep.subr.bf16.mxu0 %v6703_v20  ;;  %6167 = vmatprep.subr.bf16.mxu1 %v6794_v51  ;;  %v6748_v20 = vld [vmem:[#allocation4 + $0x124] ss:$8 sps:$4 sm:$0xff]  }
 0x15f   :  { %v6796_v51 = vld [vmem:[%s7523_s5 + $0x60] sm:$0xff]  }
 0x161   :  { %2441 = vmatpush1.bf16.msra.mxu0 %v6701_v21  ;;  %6168 = vmatpush3.bf16.msra.mxu1 %v6795_v52  ;;  %v6746_v21 = vld [vmem:[#allocation4 + $0x120] ss:$8 sps:$4 sm:$0xff]  }
 0x162   :  { %2442 = vmatprep.subr.bf16.mxu0 %v6706_v11  ;;  %v6751_v11 = vld [vmem:[#allocation4 + $0x134] ss:$8 sps:$4 sm:$0xff]   ;;  %v6797_v52 = vld [vmem:[%s7523_s5 + $0x20] sm:$0xff]   ;;  %6169 = vmatprep.subr.bf16.mxu1 %v6796_v51 }
 0x163   :  { %v6830_v51 = vld [vmem:[%s7529_s11 + $0x44] ss:$8 sps:$4 sm:$0xff]  }
 0x165   :  { %2443 = vmatpush1.bf16.msra.mxu0 %v6704_v10  ;;  %v6749_v10 = vld [vmem:[#allocation4 + $0x130] ss:$8 sps:$4 sm:$0xff]   ;;  %6170 = vmatpush3.bf16.msra.mxu1 %v6797_v52  ;;  %v6828_v52 = vld [vmem:[%s7529_s11 + $0x40] ss:$8 sps:$4 sm:$0xff]  }
 0x166   :  { %2444 = vmatprep.subr.bf16.mxu0 %v6709_v22  ;;  %v6754_v22 = vld [vmem:[#allocation4 + $0x144] ss:$8 sps:$4 sm:$0xff]   ;;  %6171 = vmatprep.subr.bf16.mxu1 %v6798_v53  ;;  %v6833_v53 = vld [vmem:[%s7529_s11 + $0x54] ss:$8 sps:$4 sm:$0xff]  }
 0x169   :  { %2445 = vmatpush1.bf16.msra.mxu0 %v6707_v23  ;;  %v6752_v23 = vld [vmem:[#allocation4 + $0x140] ss:$8 sps:$4 sm:$0xff]  }
 0x16a   :  { %2446 = vmatprep.subr.bf16.mxu0 %v6712_v24  ;;  %v6757_v24 = vld [vmem:[#allocation4 + $0x154] ss:$8 sps:$4 sm:$0xff]  }
 0x16d   :  { %2447 = vmatpush1.bf16.msra.mxu0 %v6710_v25  ;;  %v6755_v25 = vld [vmem:[#allocation4 + $0x150] ss:$8 sps:$4 sm:$0xff]  }
 0x16e   :  { %2448 = vmatprep.subr.bf16.mxu0 %v6715_v26  ;;  %v6760_v26 = vld [vmem:[#allocation4 + $0x164] ss:$8 sps:$4 sm:$0xff]  }
 0x171   :  { %2449 = vmatpush1.bf16.msra.mxu0 %v6713_v27  ;;  %v6758_v27 = vld [vmem:[#allocation4 + $0x160] ss:$8 sps:$4 sm:$0xff]  }
 0x172   :  { %2450 = vmatprep.subr.bf16.mxu0 %v6718_v28  ;;  %v6763_v28 = vld [vmem:[#allocation4 + $0x174] ss:$8 sps:$4 sm:$0xff]  }
 0x175   :  { %2451 = vmatpush1.bf16.msra.mxu0 %v6716_v29  ;;  %v6761_v29 = vld [vmem:[#allocation4 + $0x170] ss:$8 sps:$4 sm:$0xff]  }
 0x176   :  { %2452 = vmatprep.subr.bf16.mxu0 %v6721_v30  ;;  %v6766_v30 = vld [vmem:[#allocation4 + $0x184] ss:$8 sps:$4 sm:$0xff]  }
 0x179   :  { %2453 = vmatpush1.bf16.msra.mxu0 %v6719_v31  ;;  %v6764_v31 = vld [vmem:[#allocation4 + $0x180] ss:$8 sps:$4 sm:$0xff]  }
 0x17a   :  { %2454 = vmatprep.subr.bf16.mxu0 %v6724_v32  ;;  %v6769_v32 = vld [vmem:[#allocation4 + $0x194] ss:$8 sps:$4 sm:$0xff]  }
 0x17d   :  { %2455 = vmatpush1.bf16.msra.mxu0 %v6722_v33  ;;  %v6767_v33 = vld [vmem:[#allocation4 + $0x190] ss:$8 sps:$4 sm:$0xff]  }
 0x17e   :  { %2456 = vmatprep.subr.bf16.mxu0 %v6727_v34  ;;  %v6772_v34 = vld [vmem:[#allocation4 + $0x1a4] ss:$8 sps:$4 sm:$0xff]  }
 0x181   :  { %2457 = vmatpush1.bf16.msra.mxu0 %v6725_v35  ;;  %v7297_v35 = vsub.s32 2, %v7272_v54 }
 0x182   :  { %2458 = vmatprep.subr.bf16.mxu0 %v6730_v36  ;;  %v6770_v36 = vld [vmem:[#allocation4 + $0x1a0] ss:$8 sps:$4 sm:$0xff]  }
 0x185   :  { %2459 = vmatpush1.bf16.msra.mxu0 %v6728_v37  ;;  %v6775_v37 = vld [vmem:[#allocation4 + $0x1b4] ss:$8 sps:$4 sm:$0xff]  }
 0x186   :  { %2460 = vmatprep.subr.bf16.mxu0 %v6733_v38  ;;  %v385_v38 = vrot.slane %v7280_v56, %v7297_v35  ;;  %v6799_v56 = vld [vmem:[%s7523_s5 + $0x28] sm:$0xff]  }
 0x187   :  { %6172 = vmatpush3.bf16.msra.mxu1 %v6799_v56  ;;  %v6831_v56 = vld [vmem:[%s7529_s11 + $0x50] ss:$8 sps:$4 sm:$0xff]  }
 0x189   :  { %2461 = vmatpush1.bf16.msra.mxu0 %v6731_v39  ;;  %v6773_v39 = vld [vmem:[#allocation4 + $0x1b0] ss:$8 sps:$4 sm:$0xff]  }
 0x18a   :  { %2462 = vmatprep.subr.bf16.mxu0 %v6736_v40  ;;  %v6778_v40 = vld [vmem:[#allocation4 + $0x1c4] ss:$8 sps:$4 sm:$0xff]  }
 0x18d   :  { %2463 = vmatpush1.bf16.msra.mxu0 %v6734_v41 }
 0x18e   :  { %2464 = vmatprep.subr.bf16.mxu0 %v6739_v42  ;;  %v6776_v42 = vld [vmem:[#allocation4 + $0x1c0] ss:$8 sps:$4 sm:$0xff]  }
 0x191   :  { %2465 = vmatpush1.bf16.msra.mxu0 %v6737_v43  ;;  %v6781_v43 = vld [vmem:[#allocation4 + $0x1d4] ss:$8 sps:$4 sm:$0xff]  }
 0x192   :  { %2475 = vmatprep.subr.bf16.mxu0 %v6742_v44  ;;  %v6779_v44 = vld [vmem:[#allocation4 + $0x1d0] ss:$8 sps:$4 sm:$0xff]  }
 0x227   :  { %v1859_v62 = vpop.f32.mrb[0].mxu0  ;;  %v7294_v63 = vpop.f32.mrb[0].mxu1 }
 0x228   :  { %v6229_v0 = vadd.f32 %v1859_v62, %v377_v59  ;;  %v1861_v1 = vpop.f32.mrb[1].mxu0  ;;  %v2025_v2 = vpop.f32.mrb[1].mxu1  ;;  %v6231_v41 = vadd.f32 %v7294_v63, %v385_v38  ;;  %v6800_v59 = vld [vmem:[%s7523_s5 + $0x70] sm:$0xff]   ;;  %v6803_v62 = vld [vmem:[%s7523_s5 + $0x38] sm:$0xff]   ;;  %v7070_v63 = vmov 0.0  }
 0x229   :  { %v6230_v3 = vadd.f32 %v1861_v1, %v381_v60  ;;  %v6232_v4 = vadd.f32 %v2025_v2, %v389_v61  ;;  %v1863_v5 = vpop.f32.mrb[2].mxu0  ;;  %v2027_v6 = vpop.f32.mrb[2].mxu1  ;;  %v6801_v60 = vld [vmem:[%s7523_s5 + $0x30] sm:$0xff]   ;;  %6173 = vmatprep.subr.bf16.mxu1 %v6800_v59  ;;  %v6802_v61 = vld [vmem:[%s7523_s5 + $0x78] sm:$0xff]   ;;  %v6836_v59 = vld [vmem:[%s7529_s11 + $0x64] ss:$8 sps:$4 sm:$0xff]  }
 0x22a   :  { %v1864_v7 = vpop.f32.mrb[3].mxu0  ;;  %v2028_v8 = vpop.f32.mrb[3].mxu1  ;;  %6936 = vtanh.f32 %v6229_v0  ;;  %6174 = vmatpush3.bf16.msra.mxu1 %v6801_v60  ;;  %v2102_v0 = vld [vmem:[%s7522_s4] sm:$0x3] }
 0x22b   :  { %6938 = vtanh.f32 %v6230_v3  ;;  %6175 = vmatprep.subr.bf16.mxu1 %v6802_v61  ;;  %v2107_v1 = vrot.slane %v2102_v0, %v7275_v55  ;;  %v2111_v2 = vrot.slane %v2102_v0, %v7283_v57  ;;  %v6834_v60 = vld [vmem:[%s7529_s11 + $0x60] ss:$8 sps:$4 sm:$0xff]   ;;  %v6839_v61 = vld [vmem:[%s7529_s11 + $0x74] ss:$8 sps:$4 sm:$0xff]  }
 0x22c   :  { %6940 = vtanh.f32 %v6232_v4  ;;  %v6842_v0 = vld [vmem:[#allocation6 + $0x4] ss:$16 sps:$4 sm:$0xff]  }
 0x22d   :  { %6942 = vtanh.f32 %v6231_v41 }
 0x22e   :  { %6176 = vmatpush3.bf16.msra.mxu1 %v6803_v62  ;;  %v6837_v62 = vld [vmem:[%s7529_s11 + $0x70] ss:$8 sps:$4 sm:$0xff]  }
 0x22f   :  { %6197 = vmatprep.subr.bf16.mxu1 %v7070_v63 }
 0x234   :  { %v6937_v9 = vpop.eup %6936 }
 0x235   :  { %v6939_v12 = vpop.eup %6938  ;;  %v2034_v16 = vpack.c.bf16 %v6937_v9, %v6937_v9 }
 0x236   :  { %v6941_v13 = vpop.eup %6940  ;;  %v2035_v14 = vpack.c.bf16 %v6939_v12, %v6939_v12 }
 0x237   :  { %v2037_v18 = vpack.c.bf16 %v6941_v13, %v6941_v13  ;;  %v6943_v49 = vpop.eup %6942 }
 0x238   :  { %2466 = vmatprep.mubr.bf16.mxu0 %v2035_v14  ;;  %v2036_v50 = vpack.c.bf16 %v6943_v49, %v6943_v49  ;;  %v6804_v14 = vld [vmem:[%s7525_s7] sm:$0xff]   ;;  %v6827_v49 = vld [vmem:[%s7529_s11 + $0x34] ss:$8 sps:$4 sm:$0xff]  }
 0x239   :  { %2467 = vmatmul.mubr.bf16.vlgmr.msra.gmra.mrb[4].mxu0 %v2034_v16  ;;  %v6805_v16 = vld [vmem:[%s7525_s7 + $0x8] sm:$0xff]  }
 0x23a   :  { %2476 = vmatpush1.bf16.msra.mxu0 %v6740_v15  ;;  %2507 = vmatprep.mubr.bf16.mxu0 %v2037_v18  ;;  %v6807_v18 = vld [vmem:[%s7525_s7 + $0x18] sm:$0xff]  }
 0x23b   :  { %2477 = vmatprep.subr.bf16.mxu0 %v6745_v17  ;;  %v6806_v17 = vld [vmem:[%s7525_s7 + $0x10] sm:$0xff]  }
 0x23e   :  { %2478 = vmatpush1.bf16.msra.mxu0 %v6743_v19  ;;  %v6808_v19 = vld [vmem:[%s7525_s7 + $0x20] sm:$0xff]  }
 0x23f   :  { %2479 = vmatprep.subr.bf16.mxu0 %v6748_v20  ;;  %v6809_v20 = vld [vmem:[%s7525_s7 + $0x28] sm:$0xff]  }
 0x242   :  { %2480 = vmatpush1.bf16.msra.mxu0 %v6746_v21  ;;  %v6810_v21 = vld [vmem:[%s7525_s7 + $0x30] sm:$0xff]  }
 0x243   :  { %2481 = vmatprep.subr.bf16.mxu0 %v6751_v11  ;;  %v6811_v11 = vld [vmem:[%s7525_s7 + $0x38] sm:$0xff]  }
 0x246   :  { %2482 = vmatpush1.bf16.msra.mxu0 %v6749_v10 }
 0x247   :  { %2483 = vmatprep.subr.bf16.mxu0 %v6754_v22  ;;  %v5793_v22 = vld [vmem:[%s7524_s6] ss:$0 sm:$0xff] }
 0x24a   :  { %2484 = vmatpush1.bf16.msra.mxu0 %v6752_v23 }
 0x24b   :  { %2485 = vmatprep.subr.bf16.mxu0 %v6757_v24 }
 0x24e   :  { %2486 = vmatpush1.bf16.msra.mxu0 %v6755_v25 }
 0x24f   :  { %2487 = vmatprep.subr.bf16.mxu0 %v6760_v26 }
 0x252   :  { %2488 = vmatpush1.bf16.msra.mxu0 %v6758_v27 }
 0x253   :  { %2489 = vmatprep.subr.bf16.mxu0 %v6763_v28 }
 0x256   :  { %2490 = vmatpush1.bf16.msra.mxu0 %v6761_v29 }
 0x257   :  { %2491 = vmatprep.subr.bf16.mxu0 %v6766_v30  ;;  %v6812_v30 = vld [vmem:[%s7527_s9] sm:$0xff]  }
 0x25a   :  { %2492 = vmatpush1.bf16.msra.mxu0 %v6764_v31  ;;  %v6813_v31 = vld [vmem:[%s7527_s9 + $0x8] sm:$0xff]  }
 0x25b   :  { %2493 = vmatprep.subr.bf16.mxu0 %v6769_v32  ;;  %v6814_v32 = vld [vmem:[%s7527_s9 + $0x10] sm:$0xff]  }
 0x25e   :  { %2494 = vmatpush1.bf16.msra.mxu0 %v6767_v33  ;;  %v6815_v33 = vld [vmem:[%s7527_s9 + $0x18] sm:$0xff]  }
 0x25f   :  { %2495 = vmatprep.subr.bf16.mxu0 %v6772_v34  ;;  %v6818_v34 = vld [vmem:[%s7529_s11 + $0x4] ss:$8 sps:$4 sm:$0xff]  }
 0x262   :  { %2496 = vmatpush1.bf16.msra.mxu0 %v6770_v36  ;;  %v5810_v36 = vld [vmem:[%s7526_s8] ss:$0 sm:$0xff] }
 0x263   :  { %2497 = vmatprep.subr.bf16.mxu0 %v6775_v37 }
 0x266   :  { %2498 = vmatpush1.bf16.msra.mxu0 %v6773_v39 }
 0x267   :  { %2499 = vmatprep.subr.bf16.mxu0 %v6778_v40 }
 0x26a   :  { %2500 = vmatpush1.bf16.msra.mxu0 %v6776_v42 }
 0x26b   :  { %2501 = vmatprep.subr.bf16.mxu0 %v6781_v43  ;;  %v6816_v43 = vld [vmem:[%s7529_s11] ss:$8 sps:$4 sm:$0xff]  }
 0x26e   :  { %2502 = vmatpush1.bf16.msra.mxu0 %v6779_v44 }
 0x26f   :  { %2503 = vmatprep.subr.bf16.mxu0 %v6784_v45  ;;  %v6821_v45 = vld [vmem:[%s7529_s11 + $0x14] ss:$8 sps:$4 sm:$0xff]  }
 0x272   :  { %2504 = vmatpush1.bf16.msra.mxu0 %v6782_v46  ;;  %v6819_v46 = vld [vmem:[%s7529_s11 + $0x10] ss:$8 sps:$4 sm:$0xff]  }
 0x273   :  { %2505 = vmatprep.subr.bf16.mxu0 %v6787_v47  ;;  %v6824_v47 = vld [vmem:[%s7529_s11 + $0x24] ss:$8 sps:$4 sm:$0xff]  }
 0x276   :  { %2506 = vmatpush1.bf16.msra.mxu0 %v6785_v48  ;;  %v6822_v48 = vld [vmem:[%s7529_s11 + $0x20] ss:$8 sps:$4 sm:$0xff]  }
 0x279   :  { %2508 = vmatmul.mubr.bf16.vlgmr.msra.gmra.mrb[4].mxu0 %v2036_v50  ;;  %v6825_v50 = vld [vmem:[%s7529_s11 + $0x30] ss:$8 sps:$4 sm:$0xff]  }
 0x34c   :  { %v2509_v3 = vpop.f32.mrb[4].mxu0 }
 0x34d   :  { %v6233_v4 = vadd.f32 %v2509_v3, %v2107_v1  ;;  %v2511_v5 = vpop.f32.mrb[5].mxu0  ;;  %v6843_v1 = vld [vmem:[#allocation6 + $0x8] ss:$16 sps:$4 sm:$0xff]   ;;  %v6851_v3 = vld [vmem:[#allocation6 + $0x2c] ss:$16 sps:$4 sm:$0xff]  }
 0x34e   :  { %v6234_v6 = vadd.f32 %v2511_v5, %v2111_v2  ;;  %v2513_v7 = vpop.f32.mrb[6].mxu0  ;;  %v6845_v2 = vld [vmem:[#allocation6 + $0xc] ss:$16 sps:$4 sm:$0xff]  }
 0x34f   :  { %6944 = vtanh.f32 %v6233_v4  ;;  %v2514_v8 = vpop.f32.mrb[7].mxu0  ;;  %3495 = vmatprep.subr.bf16.mxu0 %v6845_v2  ;;  %v6849_v4 = vld [vmem:[#allocation6 + $0x28] ss:$16 sps:$4 sm:$0xff]   ;;  %v6857_v5 = vld [vmem:[#allocation6 + $0x4c] ss:$16 sps:$4 sm:$0xff]  }
 0x350   :  { %6946 = vtanh.f32 %v6234_v6  ;;  %3496 = vmatpush1.bf16.msra.mxu0 %v6843_v1  ;;  %v6855_v6 = vld [vmem:[#allocation6 + $0x48] ss:$16 sps:$4 sm:$0xff]   ;;  %v6863_v7 = vld [vmem:[#allocation6 + $0x6c] ss:$16 sps:$4 sm:$0xff]   ;;  %v6920_v1 = vld [vmem:[#allocation6 + $0x1a4] ss:$16 sps:$4 sm:$0xff]  }
 0x351   :  { %3497 = vmatprep.subr.bf16.mxu0 %v6851_v3  ;;  %v6861_v8 = vld [vmem:[#allocation6 + $0x68] ss:$16 sps:$4 sm:$0xff]   ;;  %v6923_v2 = vld [vmem:[#allocation6 + $0x1ac] ss:$16 sps:$4 sm:$0xff]   ;;  %v6918_v3 = vld [vmem:[#allocation6 + $0x1a0] ss:$16 sps:$4 sm:$0xff]  }
 0x354   :  { %3498 = vmatpush1.bf16.msra.mxu0 %v6849_v4  ;;  %v6921_v4 = vld [vmem:[#allocation6 + $0x1a8] ss:$16 sps:$4 sm:$0xff]  }
 0x355   :  { %3499 = vmatprep.subr.bf16.mxu0 %v6857_v5  ;;  %v6926_v5 = vld [vmem:[#allocation6 + $0x1c4] ss:$16 sps:$4 sm:$0xff]  }
 0x358   :  { %3500 = vmatpush1.bf16.msra.mxu0 %v6855_v6  ;;  %v6929_v6 = vld [vmem:[#allocation6 + $0x1cc] ss:$16 sps:$4 sm:$0xff]  }
 0x359   :  { %v6945_v9 = vpop.eup %6944  ;;  %3501 = vmatprep.subr.bf16.mxu0 %v6863_v7  ;;  %v6924_v7 = vld [vmem:[#allocation6 + $0x1c0] ss:$16 sps:$4 sm:$0xff]  }
 0x35a   :  { %v6947_v12 = vpop.eup %6946  ;;  %v2518_v15 = vpack.c.bf16 %v6945_v9, %v6945_v9  ;;  %v6869_v9 = vld [vmem:[#allocation6 + $0x8c] ss:$16 sps:$4 sm:$0xff]  }
 0x35b   :  { %v2519_v13 = vpack.c.bf16 %v6947_v12, %v6947_v12  ;;  %v6867_v12 = vld [vmem:[#allocation6 + $0x88] ss:$16 sps:$4 sm:$0xff]  }
 0x35c   :  { %3502 = vmatpush1.bf16.msra.mxu0 %v6861_v8  ;;  %v6927_v8 = vld [vmem:[#allocation6 + $0x1c8] ss:$16 sps:$4 sm:$0xff]  }
 0x35d   :  { %2687 = vmatprep.mubr.bf16.mxu1 %v2519_v13  ;;  %3503 = vmatprep.subr.bf16.mxu0 %v6869_v9  ;;  %v6875_v13 = vld [vmem:[#allocation6 + $0xac] ss:$16 sps:$4 sm:$0xff]   ;;  %v6932_v9 = vld [vmem:[#allocation6 + $0x1e4] ss:$16 sps:$4 sm:$0xff]  }
 0x35e   :  { %2688 = vmatmul.mubr.bf16.vlgmr.msra.gmra.mrb[4].mxu1 %v2518_v15  ;;  %v6881_v15 = vld [vmem:[#allocation6 + $0xcc] ss:$16 sps:$4 sm:$0xff]  }
 0x35f   :  { %6198 = vmatpush3.bf16.msra.mxu1 %v6804_v14  ;;  %6213 = vmatprep.mubr.msk.bf16.mxu1 %vm7071_vm0, %v7070_v63  ;;  %v6873_v14 = vld [vmem:[#allocation6 + $0xa8] ss:$16 sps:$4 sm:$0xff]  }
 0x360   :  { %6199 = vmatprep.subr.bf16.mxu1 %v7070_v63  ;;  %3504 = vmatpush1.bf16.msra.mxu0 %v6867_v12  ;;  %v6935_v12 = vld [vmem:[#allocation6 + $0x1ec] ss:$16 sps:$4 sm:$0xff]  }
 0x361   :  { %3505 = vmatprep.subr.bf16.mxu0 %v6875_v13  ;;  %v6930_v13 = vld [vmem:[#allocation6 + $0x1e0] ss:$16 sps:$4 sm:$0xff]  }
 0x363   :  { %6200 = vmatpush3.bf16.msra.mxu1 %v6805_v16  ;;  %v6879_v16 = vld [vmem:[#allocation6 + $0xc8] ss:$16 sps:$4 sm:$0xff]  }
 0x364   :  { %6201 = vmatprep.subr.bf16.mxu1 %v7070_v63  ;;  %3506 = vmatpush1.bf16.msra.mxu0 %v6873_v14  ;;  %v6933_v14 = vld [vmem:[#allocation6 + $0x1e8] ss:$16 sps:$4 sm:$0xff]  }
 0x365   :  { %3507 = vmatprep.subr.bf16.mxu0 %v6881_v15  ;;  %v3544_v15 = vld [vmem:[#allocation7] sm:$0xff] }
 0x367   :  { %6202 = vmatpush3.bf16.msra.mxu1 %v6806_v17  ;;  %v6887_v17 = vld [vmem:[#allocation6 + $0xec] ss:$16 sps:$4 sm:$0xff]  }
 0x368   :  { %6203 = vmatprep.subr.bf16.mxu1 %v7070_v63  ;;  %3508 = vmatpush1.bf16.msra.mxu0 %v6879_v16  ;;  %v3548_v16 = vld [vmem:[#allocation7 + $0x20] sm:$0xff] }
 0x369   :  { %3509 = vmatprep.subr.bf16.mxu0 %v6887_v17  ;;  %v3545_v17 = vld [vmem:[#allocation7 + $0x8] sm:$0xff] }
 0x36b   :  { %6204 = vmatpush3.bf16.msra.mxu1 %v6807_v18  ;;  %v6885_v18 = vld [vmem:[#allocation6 + $0xe8] ss:$16 sps:$4 sm:$0xff]  }
 0x36c   :  { %6205 = vmatprep.subr.bf16.mxu1 %v7070_v63  ;;  %3510 = vmatpush1.bf16.msra.mxu0 %v6885_v18  ;;  %v5905_v18 = vcombine.low %v3544_v15, %v3548_v16 }
 0x36f   :  { %6206 = vmatpush3.bf16.msra.mxu1 %v6808_v19  ;;  %v6893_v19 = vld [vmem:[#allocation6 + $0x10c] ss:$16 sps:$4 sm:$0xff]  }
 0x370   :  { %6207 = vmatprep.subr.bf16.mxu1 %v7070_v63  ;;  %3511 = vmatprep.subr.bf16.mxu0 %v6893_v19  ;;  %v5906_v19 = vcombine.high %v3544_v15, %v3548_v16  ;;  %v3592_v15 = vld [vmem:[#allocation7 + $0x180] sm:$0xff] }
 0x371   :  { %v3596_v16 = vld [vmem:[#allocation7 + $0x1a0] sm:$0xff] }
 0x373   :  { %6208 = vmatpush3.bf16.msra.mxu1 %v6809_v20  ;;  %v6891_v20 = vld [vmem:[#allocation6 + $0x108] ss:$16 sps:$4 sm:$0xff]  }
 0x374   :  { %6209 = vmatprep.subr.bf16.mxu1 %v7070_v63  ;;  %3512 = vmatpush1.bf16.msra.mxu0 %v6891_v20  ;;  %v3549_v20 = vld [vmem:[#allocation7 + $0x28] sm:$0xff] }
 0x377   :  { %6210 = vmatpush3.bf16.msra.mxu1 %v6810_v21  ;;  %v6899_v21 = vld [vmem:[#allocation6 + $0x12c] ss:$16 sps:$4 sm:$0xff]  }
 0x378   :  { %6211 = vmatprep.subr.bf16.mxu1 %v7070_v63  ;;  %3513 = vmatprep.subr.bf16.mxu0 %v6899_v21  ;;  %v5907_v21 = vcombine.low %v3545_v17, %v3549_v20 }
 0x37b   :  { %6212 = vmatpush3.bf16.msra.mxu1 %v6811_v11  ;;  %v6897_v11 = vld [vmem:[#allocation6 + $0x128] ss:$16 sps:$4 sm:$0xff]  }
 0x37c   :  { %6217 = vmatprep.subr.bf16.mxu1 %v7070_v63  ;;  %3514 = vmatpush1.bf16.msra.mxu0 %v6897_v11  ;;  %v5908_v11 = vcombine.high %v3545_v17, %v3549_v20  ;;  %v3593_v17 = vld [vmem:[#allocation7 + $0x188] sm:$0xff] }
 0x431   :  { %v6177_v10 = vpop.f32.mrb[4].mxu1 }
 0x432   :  { %v6178_v23 = vpop.f32.mrb[5].mxu1 }
 0x433   :  { %v6179_v24 = vadd.f32 %v6178_v23, %v6177_v10  ;;  %v6180_v25 = vpop.f32.mrb[6].mxu1  ;;  %v6905_v10 = vld [vmem:[#allocation6 + $0x14c] ss:$16 sps:$4 sm:$0xff]  }
 0x434   :  { %v6181_v26 = vpop.f32.mrb[7].mxu1  ;;  %3515 = vmatprep.subr.bf16.mxu0 %v6905_v10  ;;  %v6911_v23 = vld [vmem:[#allocation6 + $0x16c] ss:$16 sps:$4 sm:$0xff]   ;;  %v5819_v25 = vld [vmem:[%s7528_s10] ss:$0 sm:$0xff] }
 0x435   :  { %v2690_v27 = vadd.f32 %v6179_v24, %v5793_v22  ;;  %v6903_v22 = vld [vmem:[#allocation6 + $0x148] ss:$16 sps:$4 sm:$0xff]   ;;  %v2911_v10 = vld [vmem:[%s7530_s12] sm:$0x3] }
 0x436   :  { %3516 = vmatpush1.bf16.msra.mxu0 %v6903_v22  ;;  %v6909_v24 = vld [vmem:[#allocation6 + $0x168] ss:$16 sps:$4 sm:$0xff]   ;;  %v2916_v22 = vrot.slane %v2911_v10, %v7275_v55 }
 0x437   :  { %6948 = vtanh.f32 %v2690_v27  ;;  %3517 = vmatprep.subr.bf16.mxu0 %v6911_v23  ;;  %v2920_v23 = vrot.slane %v2911_v10, %v7283_v57  ;;  %v3600_v10 = vld [vmem:[#allocation7 + $0x1c0] sm:$0xff] }
 0x43a   :  { %3518 = vmatpush1.bf16.msra.mxu0 %v6909_v24 }
 0x441   :  { %v6949_v28 = vpop.eup %6948 }
 0x442   :  { %v2696_v29 = vpack.c.bf16 %v6949_v28, %v6949_v28 }
 0x444   :  { %6214 = vmatmul.mubr.bf16.vlgmr.msra.gmra.mrb[8].mxu1 %v2696_v29 }
 0x445   :  { %6225 = vmatprep.mubr.msk.bf16.mxu1 %vm7071_vm0, %v7070_v63  ;;  %6218 = vmatpush3.bf16.msra.mxu1 %v6812_v30 }
 0x446   :  { %6219 = vmatprep.subr.bf16.mxu1 %v7070_v63 }
 0x449   :  { %6220 = vmatpush3.bf16.msra.mxu1 %v6813_v31 }
 0x44a   :  { %6221 = vmatprep.subr.bf16.mxu1 %v7070_v63 }
 0x44d   :  { %6222 = vmatpush3.bf16.msra.mxu1 %v6814_v32  ;;  %v6840_v32 = vld [vmem:[#allocation6] ss:$16 sps:$4 sm:$0xff]  }
 0x44e   :  { %6223 = vmatprep.subr.bf16.mxu1 %v7070_v63  ;;  %v7072_v63 = vmov 0  }
 0x451   :  { %6224 = vmatpush3.bf16.msra.mxu1 %v6815_v33 }
 0x452   :  { %3003 = vmatprep.subr.bf16.mxu1 %v6818_v34  ;;  %v6848_v34 = vld [vmem:[#allocation6 + $0x24] ss:$16 sps:$4 sm:$0xff]  }
 0x517   :  { %v2802_v37 = vpop.f32.mrb[8].mxu1 }
 0x518   :  { %v2803_v38 = vadd.f32 %v5810_v36, %v2802_v37  ;;  %v6215_v39 = vpop.f32.mrb[9].mxu1  ;;  %v6846_v36 = vld [vmem:[#allocation6 + $0x20] ss:$16 sps:$4 sm:$0xff]   ;;  %v6854_v37 = vld [vmem:[#allocation6 + $0x44] ss:$16 sps:$4 sm:$0xff]  }
 0x519   :  { %v2805_v40 = vpop.f32.mrb[10].mxu1  ;;  %v6860_v39 = vld [vmem:[#allocation6 + $0x64] ss:$16 sps:$4 sm:$0xff]  }
 0x51a   :  { %6950 = vtanh.f32 %v2803_v38  ;;  %v6216_v41 = vpop.f32.mrb[11].mxu1  ;;  %v6852_v38 = vld [vmem:[#allocation6 + $0x40] ss:$16 sps:$4 sm:$0xff]  }
 0x51b   :  { %v6858_v40 = vld [vmem:[#allocation6 + $0x60] ss:$16 sps:$4 sm:$0xff]   ;;  %v6866_v41 = vld [vmem:[#allocation6 + $0x84] ss:$16 sps:$4 sm:$0xff]  }
 0x524   :  { %v6951_v42 = vpop.eup %6950 }
 0x525   :  { %v2809_v44 = vpack.c.bf16 %v6951_v42, %v6951_v42  ;;  %v6864_v42 = vld [vmem:[#allocation6 + $0x80] ss:$16 sps:$4 sm:$0xff]  }
 0x527   :  { %6226 = vmatmul.mubr.msk.bf16.vlgmr.msra.gmra.mrb[12].mxu1 %vm2849_vm1, %v2809_v44  ;;  %v6870_v44 = vld [vmem:[#allocation6 + $0xa0] ss:$16 sps:$4 sm:$0xff]  }
 0x528   :  { %3004 = vmatpush1.bf16.msra.mxu1 %v6816_v43  ;;  %3035 = vmatprep.mubr.bf16.mxu1 %v7072_v63  ;;  %v6872_v43 = vld [vmem:[#allocation6 + $0xa4] ss:$16 sps:$4 sm:$0xff]   ;;  %v6912_v63 = vld [vmem:[#allocation6 + $0x180] ss:$16 sps:$4 sm:$0xff]  }
 0x529   :  { %3005 = vmatprep.subr.bf16.mxu1 %v6821_v45  ;;  %v6878_v45 = vld [vmem:[#allocation6 + $0xc4] ss:$16 sps:$4 sm:$0xff]  }
 0x52c   :  { %3006 = vmatpush1.bf16.msra.mxu1 %v6819_v46  ;;  %v6876_v46 = vld [vmem:[#allocation6 + $0xc0] ss:$16 sps:$4 sm:$0xff]  }
 0x52d   :  { %3007 = vmatprep.subr.bf16.mxu1 %v6824_v47  ;;  %v6884_v47 = vld [vmem:[#allocation6 + $0xe4] ss:$16 sps:$4 sm:$0xff]  }
 0x530   :  { %3008 = vmatpush1.bf16.msra.mxu1 %v6822_v48  ;;  %v6882_v48 = vld [vmem:[#allocation6 + $0xe0] ss:$16 sps:$4 sm:$0xff]  }
 0x531   :  { %3009 = vmatprep.subr.bf16.mxu1 %v6827_v49  ;;  %v6890_v49 = vld [vmem:[#allocation6 + $0x104] ss:$16 sps:$4 sm:$0xff]  }
 0x534   :  { %3010 = vmatpush1.bf16.msra.mxu1 %v6825_v50  ;;  %v6888_v50 = vld [vmem:[#allocation6 + $0x100] ss:$16 sps:$4 sm:$0xff]  }
 0x535   :  { %3011 = vmatprep.subr.bf16.mxu1 %v6830_v51  ;;  %v6896_v51 = vld [vmem:[#allocation6 + $0x124] ss:$16 sps:$4 sm:$0xff]  }
 0x538   :  { %3012 = vmatpush1.bf16.msra.mxu1 %v6828_v52  ;;  %v6894_v52 = vld [vmem:[#allocation6 + $0x120] ss:$16 sps:$4 sm:$0xff]  }
 0x539   :  { %3013 = vmatprep.subr.bf16.mxu1 %v6833_v53  ;;  %v6902_v53 = vld [vmem:[#allocation6 + $0x144] ss:$16 sps:$4 sm:$0xff]  }
 0x53c   :  { %3014 = vmatpush1.bf16.msra.mxu1 %v6831_v56  ;;  %v6900_v56 = vld [vmem:[#allocation6 + $0x140] ss:$16 sps:$4 sm:$0xff]  }
 0x53d   :  { %3015 = vmatprep.subr.bf16.mxu1 %v6836_v59  ;;  %v6908_v59 = vld [vmem:[#allocation6 + $0x164] ss:$16 sps:$4 sm:$0xff]  }
 0x540   :  { %3016 = vmatpush1.bf16.msra.mxu1 %v6834_v60  ;;  %v6906_v60 = vld [vmem:[#allocation6 + $0x160] ss:$16 sps:$4 sm:$0xff]  }
 0x541   :  { %3017 = vmatprep.subr.bf16.mxu1 %v6839_v61  ;;  %v6914_v61 = vld [vmem:[#allocation6 + $0x184] ss:$16 sps:$4 sm:$0xff]  }
 0x544   :  { %3018 = vmatpush1.bf16.msra.mxu1 %v6837_v62  ;;  %v6917_v62 = vld [vmem:[#allocation6 + $0x18c] ss:$16 sps:$4 sm:$0xff]  }
 0x545   :  { %3454 = vmatprep.subr.bf16.mxu1 %v6842_v0  ;;  %v6915_v0 = vld [vmem:[#allocation6 + $0x188] ss:$16 sps:$4 sm:$0xff]   ;;  %3519 = vmatprep.subr.bf16.mxu0 %v6917_v62  ;;  %v3580_v62 = vld [vmem:[#allocation7 + $0x120] sm:$0xff] }
 0x546   :  { %3520 = vmatpush1.bf16.msra.mxu0 %v6915_v0  ;;  %v3581_v0 = vld [vmem:[#allocation7 + $0x128] sm:$0xff] }
 0x547   :  { %3521 = vmatprep.subr.bf16.mxu0 %v6923_v2 }
 0x54a   :  { %3522 = vmatpush1.bf16.msra.mxu0 %v6921_v4 }
 0x54b   :  { %3523 = vmatprep.subr.bf16.mxu0 %v6929_v6  ;;  %v3588_v6 = vld [vmem:[#allocation7 + $0x160] sm:$0xff] }
 0x54e   :  { %3524 = vmatpush1.bf16.msra.mxu0 %v6927_v8  ;;  %v3589_v8 = vld [vmem:[#allocation7 + $0x168] sm:$0xff] }
 0x54f   :  { %3525 = vmatprep.subr.bf16.mxu0 %v6935_v12 }
 0x552   :  { %3526 = vmatpush1.bf16.msra.mxu0 %v6933_v14 }
 0x553   :  { %5204 = vmatprep.subr.bf16.mxu0 %v5908_v11 }
 0x5fa   :  { %v2887_v26 = vpop.f32.mrb[12].mxu1 }
 0x5fb   :  { %v2888_v27 = vadd.f32 %v5819_v25, %v2887_v26  ;;  %v6227_v28 = vpop.f32.mrb[13].mxu1 }
 0x5fc   :  { %v2890_v29 = vpop.f32.mrb[14].mxu1 }
 0x5fd   :  { %6952 = vtanh.f32 %v2888_v27  ;;  %v6228_v30 = vpop.f32.mrb[15].mxu1 }
 0x5fe   :  { %v3552_v30 = vld [vmem:[#allocation7 + $0x40] sm:$0xff] }
 0x607   :  { %v6953_v31 = vpop.eup %6952 }
 0x608   :  { %v2894_v33 = vpack.c.bf16 %v6953_v31, %v6953_v31 }
 0x60a   :  { %3036 = vmatmul.mubr.bf16.vlgmr.msra.gmra.mrb[16].mxu1 %v2894_v33  ;;  %v3553_v33 = vld [vmem:[#allocation7 + $0x48] sm:$0xff] }
 0x60b   :  { %3455 = vmatpush1.bf16.msra.mxu1 %v6840_v32  ;;  %v3556_v32 = vld [vmem:[#allocation7 + $0x60] sm:$0xff] }
 0x60c   :  { %3456 = vmatprep.subr.bf16.mxu1 %v6848_v34  ;;  %v3557_v34 = vld [vmem:[#allocation7 + $0x68] sm:$0xff] }
 0x60f   :  { %3457 = vmatpush1.bf16.msra.mxu1 %v6846_v36 }
 0x610   :  { %3458 = vmatprep.subr.bf16.mxu1 %v6854_v37 }
 0x613   :  { %3459 = vmatpush1.bf16.msra.mxu1 %v6852_v38 }
 0x614   :  { %3460 = vmatprep.subr.bf16.mxu1 %v6860_v39  ;;  %v5914_v39 = vcombine.high %v3552_v30, %v3556_v32 }
 0x617   :  { %3461 = vmatpush1.bf16.msra.mxu1 %v6858_v40  ;;  %v5916_v40 = vcombine.high %v3553_v33, %v3557_v34 }
 0x618   :  { %3462 = vmatprep.subr.bf16.mxu1 %v6866_v41  ;;  %v3560_v41 = vld [vmem:[#allocation7 + $0x80] sm:$0xff] }
 0x61b   :  { %3463 = vmatpush1.bf16.msra.mxu1 %v6864_v42  ;;  %v3564_v42 = vld [vmem:[#allocation7 + $0xa0] sm:$0xff] }
 0x61c   :  { %3464 = vmatprep.subr.bf16.mxu1 %v6872_v43  ;;  %v3561_v43 = vld [vmem:[#allocation7 + $0x88] sm:$0xff] }
 0x61f   :  { %3465 = vmatpush1.bf16.msra.mxu1 %v6870_v44  ;;  %v3565_v44 = vld [vmem:[#allocation7 + $0xa8] sm:$0xff] }
 0x620   :  { %3466 = vmatprep.subr.bf16.mxu1 %v6878_v45  ;;  %v5913_v45 = vcombine.low %v3552_v30, %v3556_v32  ;;  %v3612_v30 = vld [vmem:[#allocation7 + $0x220] sm:$0xff]  ;;  %v3613_v32 = vld [vmem:[#allocation7 + $0x228] sm:$0xff] }
 0x623   :  { %3467 = vmatpush1.bf16.msra.mxu1 %v6876_v46  ;;  %v5915_v46 = vcombine.low %v3553_v33, %v3557_v34 }
 0x624   :  { %3468 = vmatprep.subr.bf16.mxu1 %v6884_v47  ;;  %v5922_v47 = vcombine.high %v3560_v41, %v3564_v42 }
 0x627   :  { %3469 = vmatpush1.bf16.msra.mxu1 %v6882_v48  ;;  %v5924_v48 = vcombine.high %v3561_v43, %v3565_v44 }
 0x628   :  { %3470 = vmatprep.subr.bf16.mxu1 %v6890_v49  ;;  %v3568_v49 = vld [vmem:[#allocation7 + $0xc0] sm:$0xff] }
 0x62b   :  { %3471 = vmatpush1.bf16.msra.mxu1 %v6888_v50  ;;  %v3572_v50 = vld [vmem:[#allocation7 + $0xe0] sm:$0xff] }
 0x62c   :  { %3472 = vmatprep.subr.bf16.mxu1 %v6896_v51  ;;  %v3569_v51 = vld [vmem:[#allocation7 + $0xc8] sm:$0xff] }
 0x62f   :  { %3473 = vmatpush1.bf16.msra.mxu1 %v6894_v52  ;;  %v3573_v52 = vld [vmem:[#allocation7 + $0xe8] sm:$0xff] }
 0x630   :  { %3474 = vmatprep.subr.bf16.mxu1 %v6902_v53  ;;  %v5921_v53 = vcombine.low %v3560_v41, %v3564_v42  ;;  %v5931_v2 = vcombine.low %v3569_v51, %v3573_v52  ;;  %v3621_v41 = vld [vmem:[#allocation7 + $0x268] sm:$0xff] }
 0x633   :  { %3475 = vmatpush1.bf16.msra.mxu1 %v6900_v56  ;;  %v5923_v56 = vcombine.low %v3561_v43, %v3565_v44 }
 0x634   :  { %3476 = vmatprep.subr.bf16.mxu1 %v6908_v59  ;;  %v5930_v59 = vcombine.high %v3568_v49, %v3572_v50 }
 0x637   :  { %3477 = vmatpush1.bf16.msra.mxu1 %v6906_v60  ;;  %v5932_v60 = vcombine.high %v3569_v51, %v3573_v52 }
 0x638   :  { %3478 = vmatprep.subr.bf16.mxu1 %v6914_v61  ;;  %v3576_v61 = vld [vmem:[#allocation7 + $0x100] sm:$0xff] }
 0x63b   :  { %3479 = vmatpush1.bf16.msra.mxu1 %v6912_v63  ;;  %v3577_v63 = vld [vmem:[#allocation7 + $0x108] sm:$0xff] }
 0x63c   :  { %3480 = vmatprep.subr.bf16.mxu1 %v6920_v1  ;;  %v5929_v1 = vcombine.low %v3568_v49, %v3572_v50  ;;  %v5940_v4 = vcombine.high %v3577_v63, %v3581_v0  ;;  %v5939_v12 = vcombine.low %v3577_v63, %v3581_v0  ;;  %v3629_v49 = vld [vmem:[#allocation7 + $0x2a8] sm:$0xff] }
 0x63f   :  { %3481 = vmatpush1.bf16.msra.mxu1 %v6918_v3  ;;  %v5938_v3 = vcombine.high %v3576_v61, %v3580_v62 }
 0x640   :  { %3482 = vmatprep.subr.bf16.mxu1 %v6926_v5  ;;  %v3584_v5 = vld [vmem:[#allocation7 + $0x140] sm:$0xff] }
 0x643   :  { %3483 = vmatpush1.bf16.msra.mxu1 %v6924_v7  ;;  %v3585_v7 = vld [vmem:[#allocation7 + $0x148] sm:$0xff] }
 0x644   :  { %3484 = vmatprep.subr.bf16.mxu1 %v6932_v9  ;;  %v5937_v9 = vcombine.low %v3576_v61, %v3580_v62  ;;  %v5948_v14 = vcombine.high %v3585_v7, %v3589_v8  ;;  %v5947_v20 = vcombine.low %v3585_v7, %v3589_v8  ;;  %v3637_v61 = vld [vmem:[#allocation7 + $0x2e8] sm:$0xff] }
 0x645   :  { %v3645_v8 = vld [vmem:[#allocation7 + $0x328] sm:$0xff] }
 0x647   :  { %3485 = vmatpush1.bf16.msra.mxu1 %v6930_v13  ;;  %v5946_v13 = vcombine.high %v3584_v5, %v3588_v6 }
 0x648   :  { %5122 = vmatprep.subr.bf16.mxu1 %v5906_v19  ;;  %v5945_v19 = vcombine.low %v3584_v5, %v3588_v6  ;;  %v3644_v5 = vld [vmem:[#allocation7 + $0x320] sm:$0xff]  ;;  %v3641_v6 = vld [vmem:[#allocation7 + $0x308] sm:$0xff] }
 0x6dd   :  { %v3037_v24 = vpop.f32.mrb[16].mxu1 }
 0x6de   :  { %v3038_v25 = vadd.f32 %v3037_v24, %v2916_v22  ;;  %v3039_v26 = vpop.f32.mrb[17].mxu1  ;;  %v3604_v22 = vld [vmem:[#allocation7 + $0x1e0] sm:$0xff]  ;;  %v3605_v24 = vld [vmem:[#allocation7 + $0x1e8] sm:$0xff] }
 0x6df   :  { %v3040_v27 = vadd.f32 %v3039_v26, %v2920_v23  ;;  %v3041_v28 = vpop.f32.mrb[18].mxu1  ;;  %v3601_v23 = vld [vmem:[#allocation7 + $0x1c8] sm:$0xff]  ;;  %v5961_v33 = vcombine.low %v3600_v10, %v3604_v22 }
 0x6e0   :  { %6954 = vtanh.f32 %v3038_v25  ;;  %v3042_v29 = vpop.f32.mrb[19].mxu1  ;;  %v5953_v25 = vcombine.low %v3592_v15, %v3596_v16  ;;  %v5964_v28 = vcombine.high %v3601_v23, %v3605_v24  ;;  %v5963_v34 = vcombine.low %v3601_v23, %v3605_v24  ;;  %v3661_v24 = vld [vmem:[#allocation7 + $0x3a8] sm:$0xff] }
 0x6e1   :  { %6956 = vtanh.f32 %v3040_v27  ;;  %v5962_v27 = vcombine.high %v3600_v10, %v3604_v22  ;;  %v3608_v29 = vld [vmem:[#allocation7 + $0x200] sm:$0xff]  ;;  %v3657_v22 = vld [vmem:[#allocation7 + $0x388] sm:$0xff] }
 0x6e2   :  { %v5969_v42 = vcombine.low %v3608_v29, %v3612_v30  ;;  %v3660_v10 = vld [vmem:[#allocation7 + $0x3a0] sm:$0xff] }
 0x6ea   :  { %v6955_v31 = vpop.eup %6954 }
 0x6eb   :  { %v6957_v36 = vpop.eup %6956  ;;  %v3046_v38 = vpack.c.bf16 %v6955_v31, %v6955_v31  ;;  %v3609_v31 = vld [vmem:[#allocation7 + $0x208] sm:$0xff] }
 0x6ec   :  { %v3047_v37 = vpack.c.bf16 %v6957_v36, %v6957_v36  ;;  %v5970_v36 = vcombine.high %v3608_v29, %v3612_v30  ;;  %v5971_v43 = vcombine.low %v3609_v31, %v3613_v32  ;;  %v3668_v29 = vld [vmem:[#allocation7 + $0x3e0] sm:$0xff]  ;;  %v3665_v30 = vld [vmem:[#allocation7 + $0x3c8] sm:$0xff] }
 0x6ee   :  { %3486 = vmatprep.mubr.bf16.mxu1 %v3047_v37  ;;  %3527 = vmatprep.mubr.bf16.mxu0 %v3047_v37  ;;  %v5972_v37 = vcombine.high %v3609_v31, %v3613_v32  ;;  %v3669_v32 = vld [vmem:[#allocation7 + $0x3e8] sm:$0xff] }
 0x6ef   :  { %3487 = vmatmul.mubr.bf16.vlgmr.msra.gmra.mrb[20].mxu1 %v3046_v38  ;;  %3528 = vmatmul.mubr.bf16.vlgmr.msra.gmra.mrb[8].mxu0 %v3046_v38  ;;  %v3616_v38 = vld [vmem:[#allocation7 + $0x240] sm:$0xff] }
 0x6f0   :  { %5123 = vmatpush1.bf16.msra.mxu1 %v5905_v18  ;;  %5205 = vmatpush1.bf16.msra.mxu0 %v5907_v21  ;;  %v3597_v18 = vld [vmem:[#allocation7 + $0x1a8] sm:$0xff]  ;;  %v5954_v21 = vcombine.high %v3592_v15, %v3596_v16  ;;  %v3652_v15 = vld [vmem:[#allocation7 + $0x360] sm:$0xff] }
 0x6f1   :  { %5124 = vmatprep.subr.bf16.mxu1 %v5914_v39  ;;  %5206 = vmatprep.subr.bf16.mxu0 %v5916_v40  ;;  %v5956_v11 = vcombine.high %v3593_v17, %v3597_v18  ;;  %v5955_v26 = vcombine.low %v3593_v17, %v3597_v18  ;;  %v3620_v39 = vld [vmem:[#allocation7 + $0x260] sm:$0xff]  ;;  %v3617_v40 = vld [vmem:[#allocation7 + $0x248] sm:$0xff] }
 0x6f2   :  { %v5978_v44 = vcombine.high %v3616_v38, %v3620_v39  ;;  %v5977_v50 = vcombine.low %v3616_v38, %v3620_v39  ;;  %v5979_v51 = vcombine.low %v3617_v40, %v3621_v41  ;;  %v3649_v16 = vld [vmem:[#allocation7 + $0x348] sm:$0xff]  ;;  %v3676_v38 = vld [vmem:[#allocation7 + $0x420] sm:$0xff] }
 0x6f3   :  { %v3653_v18 = vld [vmem:[#allocation7 + $0x368] sm:$0xff] }
 0x6f4   :  { %5125 = vmatpush1.bf16.msra.mxu1 %v5913_v45  ;;  %5207 = vmatpush1.bf16.msra.mxu0 %v5915_v46  ;;  %v5980_v45 = vcombine.high %v3617_v40, %v3621_v41  ;;  %v3624_v46 = vld [vmem:[#allocation7 + $0x280] sm:$0xff]  ;;  %v3673_v39 = vld [vmem:[#allocation7 + $0x408] sm:$0xff] }
 0x6f5   :  { %5126 = vmatprep.subr.bf16.mxu1 %v5922_v47  ;;  %5208 = vmatprep.subr.bf16.mxu0 %v5924_v48  ;;  %v3628_v47 = vld [vmem:[#allocation7 + $0x2a0] sm:$0xff]  ;;  %v3625_v48 = vld [vmem:[#allocation7 + $0x288] sm:$0xff] }
 0x6f6   :  { %v5986_v52 = vcombine.high %v3624_v46, %v3628_v47  ;;  %v5985_v62 = vcombine.low %v3624_v46, %v3628_v47  ;;  %v5987_v63 = vcombine.low %v3625_v48, %v3629_v49  ;;  %v3677_v41 = vld [vmem:[#allocation7 + $0x428] sm:$0xff] }
 0x6f8   :  { %5127 = vmatpush1.bf16.msra.mxu1 %v5921_v53  ;;  %5209 = vmatpush1.bf16.msra.mxu0 %v5923_v56  ;;  %v5988_v53 = vcombine.high %v3625_v48, %v3629_v49  ;;  %v3632_v56 = vld [vmem:[#allocation7 + $0x2c0] sm:$0xff] }
 0x6f9   :  { %5128 = vmatprep.subr.bf16.mxu1 %v5930_v59  ;;  %5210 = vmatprep.subr.bf16.mxu0 %v5932_v60  ;;  %v3636_v59 = vld [vmem:[#allocation7 + $0x2e0] sm:$0xff]  ;;  %v3633_v60 = vld [vmem:[#allocation7 + $0x2c8] sm:$0xff] }
 0x6fa   :  { %v5994_v0 = vcombine.high %v3632_v56, %v3636_v59 }
 0x6fc   :  { %5129 = vmatpush1.bf16.msra.mxu1 %v5929_v1  ;;  %5211 = vmatpush1.bf16.msra.mxu0 %v5931_v2  ;;  %v5996_v1 = vcombine.high %v3633_v60, %v3637_v61  ;;  %v5993_v2 = vcombine.low %v3632_v56, %v3636_v59 }
 0x6fd   :  { %5130 = vmatprep.subr.bf16.mxu1 %v5938_v3  ;;  %5212 = vmatprep.subr.bf16.mxu0 %v5940_v4  ;;  %v5995_v3 = vcombine.low %v3633_v60, %v3637_v61  ;;  %v3640_v4 = vld [vmem:[#allocation7 + $0x300] sm:$0xff] }
 0x6fe   :  { %v6002_v7 = vcombine.high %v3640_v4, %v3644_v5 }
 0x700   :  { %5131 = vmatpush1.bf16.msra.mxu1 %v5937_v9  ;;  %5213 = vmatpush1.bf16.msra.mxu0 %v5939_v12  ;;  %v6001_v9 = vcombine.low %v3640_v4, %v3644_v5  ;;  %v6003_v12 = vcombine.low %v3641_v6, %v3645_v8  ;;  %v3681_v4 = vld [vmem:[#allocation7 + $0x448] sm:$0xff] }
 0x701   :  { %5132 = vmatprep.subr.bf16.mxu1 %v5946_v13  ;;  %5214 = vmatprep.subr.bf16.mxu0 %v5948_v14  ;;  %v6004_v13 = vcombine.high %v3641_v6, %v3645_v8  ;;  %v3648_v14 = vld [vmem:[#allocation7 + $0x340] sm:$0xff]  ;;  %v3685_v5 = vld [vmem:[#allocation7 + $0x468] sm:$0xff] }
 0x702   :  { %v6010_v17 = vcombine.high %v3648_v14, %v3652_v15 }
 0x704   :  { %5133 = vmatpush1.bf16.msra.mxu1 %v5945_v19  ;;  %5215 = vmatpush1.bf16.msra.mxu0 %v5947_v20  ;;  %v6009_v19 = vcombine.low %v3648_v14, %v3652_v15  ;;  %v6011_v20 = vcombine.low %v3649_v16, %v3653_v18  ;;  %v3692_v14 = vld [vmem:[#allocation7 + $0x4a0] sm:$0xff]  ;;  %v3689_v15 = vld [vmem:[#allocation7 + $0x488] sm:$0xff] }
 0x705   :  { %5134 = vmatprep.subr.bf16.mxu1 %v5954_v21  ;;  %5216 = vmatprep.subr.bf16.mxu0 %v5956_v11  ;;  %v6012_v21 = vcombine.high %v3649_v16, %v3653_v18  ;;  %v3656_v11 = vld [vmem:[#allocation7 + $0x380] sm:$0xff]  ;;  %v3693_v16 = vld [vmem:[#allocation7 + $0x4a8] sm:$0xff] }
 0x706   :  { %v6018_v23 = vcombine.high %v3656_v11, %v3660_v10 }
 0x708   :  { %5135 = vmatpush1.bf16.msra.mxu1 %v5953_v25  ;;  %5217 = vmatpush1.bf16.msra.mxu0 %v5955_v26  ;;  %v6017_v25 = vcombine.low %v3656_v11, %v3660_v10  ;;  %v6019_v26 = vcombine.low %v3657_v22, %v3661_v24  ;;  %v3696_v11 = vld [vmem:[#allocation7 + $0x4c0] sm:$0xff] }
 0x709   :  { %5136 = vmatprep.subr.bf16.mxu1 %v5962_v27  ;;  %5218 = vmatprep.subr.bf16.mxu0 %v5964_v28  ;;  %v6020_v27 = vcombine.high %v3657_v22, %v3661_v24  ;;  %v3664_v28 = vld [vmem:[#allocation7 + $0x3c0] sm:$0xff]  ;;  %v3697_v22 = vld [vmem:[#allocation7 + $0x4c8] sm:$0xff] }
 0x70a   :  { %v6026_v31 = vcombine.high %v3664_v28, %v3668_v29  ;;  %v3700_v10 = vld [vmem:[#allocation7 + $0x4e0] sm:$0xff] }
 0x70c   :  { %5137 = vmatpush1.bf16.msra.mxu1 %v5961_v33  ;;  %5219 = vmatpush1.bf16.msra.mxu0 %v5963_v34  ;;  %v6025_v33 = vcombine.low %v3664_v28, %v3668_v29  ;;  %v6027_v34 = vcombine.low %v3665_v30, %v3669_v32  ;;  %v3704_v28 = vld [vmem:[#allocation7 + $0x500] sm:$0xff] }
 0x70d   :  { %5138 = vmatprep.subr.bf16.mxu1 %v5970_v36  ;;  %5220 = vmatprep.subr.bf16.mxu0 %v5972_v37  ;;  %v6028_v36 = vcombine.high %v3665_v30, %v3669_v32  ;;  %v3672_v37 = vld [vmem:[#allocation7 + $0x400] sm:$0xff]  ;;  %v3705_v30 = vld [vmem:[#allocation7 + $0x508] sm:$0xff]  ;;  %v6057_v32 = vcombine.low %v3696_v11, %v3700_v10 }
 0x70e   :  { %v6034_v40 = vcombine.high %v3672_v37, %v3676_v38  ;;  %v3708_v29 = vld [vmem:[#allocation7 + $0x520] sm:$0xff] }
 0x710   :  { %5139 = vmatpush1.bf16.msra.mxu1 %v5969_v42  ;;  %5221 = vmatpush1.bf16.msra.mxu0 %v5971_v43  ;;  %v6033_v42 = vcombine.low %v3672_v37, %v3676_v38  ;;  %v6035_v43 = vcombine.low %v3673_v39, %v3677_v41  ;;  %v3712_v37 = vld [vmem:[#allocation7 + $0x540] sm:$0xff] }
 0x711   :  { %5140 = vmatprep.subr.bf16.mxu1 %v5978_v44  ;;  %5222 = vmatprep.subr.bf16.mxu0 %v5980_v45  ;;  %v6036_v44 = vcombine.high %v3673_v39, %v3677_v41  ;;  %v7446_v45 = vld [vmem:[%s7532_s14] sm:$0xf]  ;;  %v3713_v39 = vld [vmem:[#allocation7 + $0x548] sm:$0xff]  ;;  %v6065_v41 = vcombine.low %v3704_v28, %v3708_v29 }
 0x712   :  { %v3117_v46 = vrot.slane %v7446_v45, %v7275_v55  ;;  %v3121_v47 = vrot.slane %v7446_v45, %v7283_v57  ;;  %v3129_v48 = vrot.slane %v7446_v45, %v7286_v58  ;;  %v3716_v38 = vld [vmem:[#allocation7 + $0x560] sm:$0xff] }
 0x714   :  { %5141 = vmatpush1.bf16.msra.mxu1 %v5977_v50  ;;  %5223 = vmatpush1.bf16.msra.mxu0 %v5979_v51 }
 0x715   :  { %5142 = vmatprep.subr.bf16.mxu1 %v5986_v52  ;;  %5224 = vmatprep.subr.bf16.mxu0 %v5988_v53 }
 0x718   :  { %5143 = vmatpush1.bf16.msra.mxu1 %v5985_v62  ;;  %5225 = vmatpush1.bf16.msra.mxu0 %v5987_v63 }
 0x719   :  { %5144 = vmatprep.subr.bf16.mxu1 %v5994_v0  ;;  %5226 = vmatprep.subr.bf16.mxu0 %v5996_v1  ;;  %v3680_v1 = vld [vmem:[#allocation7 + $0x440] sm:$0xff] }
 0x71c   :  { %5145 = vmatpush1.bf16.msra.mxu1 %v5993_v2  ;;  %5227 = vmatpush1.bf16.msra.mxu0 %v5995_v3  ;;  %v3684_v3 = vld [vmem:[#allocation7 + $0x460] sm:$0xff] }
 0x71d   :  { %5146 = vmatprep.subr.bf16.mxu1 %v6002_v7  ;;  %5228 = vmatprep.subr.bf16.mxu0 %v6004_v13  ;;  %v6044_v13 = vcombine.high %v3681_v4, %v3685_v5  ;;  %v6041_v18 = vcombine.low %v3680_v1, %v3684_v3 }
 0x720   :  { %5147 = vmatpush1.bf16.msra.mxu1 %v6001_v9  ;;  %5229 = vmatpush1.bf16.msra.mxu0 %v6003_v12  ;;  %v3688_v9 = vld [vmem:[#allocation7 + $0x480] sm:$0xff]  ;;  %v6042_v12 = vcombine.high %v3680_v1, %v3684_v3 }
 0x721   :  { %5148 = vmatprep.subr.bf16.mxu1 %v6010_v17  ;;  %5230 = vmatprep.subr.bf16.mxu0 %v6012_v21  ;;  %v6052_v21 = vcombine.high %v3689_v15, %v3693_v16  ;;  %v6049_v24 = vcombine.low %v3688_v9, %v3692_v14  ;;  %v3736_v3 = vld [vmem:[#allocation7 + $0x600] sm:$0xff] }
 0x724   :  { %5149 = vmatpush1.bf16.msra.mxu1 %v6009_v19  ;;  %5231 = vmatpush1.bf16.msra.mxu0 %v6011_v20  ;;  %v6043_v19 = vcombine.low %v3681_v4, %v3685_v5  ;;  %v6050_v20 = vcombine.high %v3688_v9, %v3692_v14  ;;  %v3740_v4 = vld [vmem:[#allocation7 + $0x620] sm:$0xff]  ;;  %v3737_v5 = vld [vmem:[#allocation7 + $0x608] sm:$0xff] }
 0x725   :  { %5150 = vmatprep.subr.bf16.mxu1 %v6018_v23  ;;  %5232 = vmatprep.subr.bf16.mxu0 %v6020_v27  ;;  %v3701_v23 = vld [vmem:[#allocation7 + $0x4e8] sm:$0xff] }
 0x726   :  { %v6060_v27 = vcombine.high %v3697_v22, %v3701_v23 }
 0x728   :  { %5151 = vmatpush1.bf16.msra.mxu1 %v6017_v25  ;;  %5233 = vmatpush1.bf16.msra.mxu0 %v6019_v26  ;;  %v6051_v25 = vcombine.low %v3689_v15, %v3693_v16  ;;  %v6058_v26 = vcombine.high %v3696_v11, %v3700_v10  ;;  %v3744_v15 = vld [vmem:[#allocation7 + $0x640] sm:$0xff] }
 0x729   :  { %5152 = vmatprep.subr.bf16.mxu1 %v6026_v31  ;;  %5234 = vmatprep.subr.bf16.mxu0 %v6028_v36  ;;  %v3709_v31 = vld [vmem:[#allocation7 + $0x528] sm:$0xff]  ;;  %v3748_v16 = vld [vmem:[#allocation7 + $0x660] sm:$0xff] }
 0x72a   :  { %v6068_v36 = vcombine.high %v3705_v30, %v3709_v31  ;;  %v6106_v11 = vcombine.high %v3744_v15, %v3748_v16 }
 0x72c   :  { %5153 = vmatpush1.bf16.msra.mxu1 %v6025_v33  ;;  %5235 = vmatpush1.bf16.msra.mxu0 %v6027_v34  ;;  %v6059_v33 = vcombine.low %v3697_v22, %v3701_v23  ;;  %v6066_v34 = vcombine.high %v3704_v28, %v3708_v29  ;;  %v3752_v22 = vld [vmem:[#allocation7 + $0x680] sm:$0xff] }
 0x72d   :  { %5163 = vmatprep.subr.bf16.mxu1 %v6034_v40  ;;  %5245 = vmatprep.subr.bf16.mxu0 %v6036_v44  ;;  %v3717_v40 = vld [vmem:[#allocation7 + $0x568] sm:$0xff]  ;;  %v3756_v23 = vld [vmem:[#allocation7 + $0x6a0] sm:$0xff] }
 0x72e   :  { %v6076_v44 = vcombine.high %v3713_v39, %v3717_v40  ;;  %v6114_v28 = vcombine.high %v3752_v22, %v3756_v23 }
 0x7c2   :  { %v3488_v49 = vpop.f32.mrb[20].mxu1  ;;  %v7454_v50 = vpop.f32.mrb[8].mxu0 }
 0x7c3   :  { %v3489_v51 = vadd.f32 %v3488_v49, %v3117_v46  ;;  %v3490_v52 = vpop.f32.mrb[21].mxu1  ;;  %v3531_v53 = vpop.f32.mrb[9].mxu0  ;;  %v3720_v46 = vld [vmem:[#allocation7 + $0x580] sm:$0xff]  ;;  %v3725_v49 = vld [vmem:[#allocation7 + $0x5a8] sm:$0xff] }
 0x7c4   :  { %v3491_v56 = vadd.f32 %v3490_v52, %v3121_v47  ;;  %v3532_v59 = vadd.f32 %v3531_v53, %v3129_v48  ;;  %v3492_v60 = vpop.f32.mrb[22].mxu1  ;;  %v3533_v61 = vpop.f32.mrb[10].mxu0  ;;  %v3724_v47 = vld [vmem:[#allocation7 + $0x5a0] sm:$0xff]  ;;  %v3721_v48 = vld [vmem:[#allocation7 + $0x588] sm:$0xff]  ;;  %v6075_v52 = vcombine.low %v3713_v39, %v3717_v40 }
 0x7c5   :  { %v3493_v62 = vpop.f32.mrb[23].mxu1  ;;  %v3534_v63 = vpop.f32.mrb[11].mxu0  ;;  %6958 = vtanh.f32 %v3489_v51  ;;  %v6073_v51 = vcombine.low %v3712_v37, %v3716_v38  ;;  %v6082_v53 = vcombine.high %v3720_v46, %v3724_v47  ;;  %v3732_v60 = vld [vmem:[#allocation7 + $0x5e0] sm:$0xff]  ;;  %v3729_v61 = vld [vmem:[#allocation7 + $0x5c8] sm:$0xff] }
 0x7c6   :  { %6960 = vtanh.f32 %v3491_v56  ;;  %v6084_v56 = vcombine.high %v3721_v48, %v3725_v49  ;;  %v3733_v62 = vld [vmem:[#allocation7 + $0x5e8] sm:$0xff]  ;;  %v6081_v63 = vcombine.low %v3720_v46, %v3724_v47  ;;  %v3768_v39 = vld [vmem:[#allocation7 + $0x700] sm:$0xff] }
 0x7c7   :  { %6962 = vtanh.f32 %v3532_v59  ;;  %v3728_v59 = vld [vmem:[#allocation7 + $0x5c0] sm:$0xff] }
 0x7c8   :  { %v6090_v1 = vcombine.high %v3728_v59, %v3732_v60  ;;  %v6089_v9 = vcombine.low %v3728_v59, %v3732_v60  ;;  %v3772_v40 = vld [vmem:[#allocation7 + $0x720] sm:$0xff] }
 0x7c9   :  { %v6130_v47 = vcombine.high %v3768_v39, %v3772_v40  ;;  %v6129_v59 = vcombine.low %v3768_v39, %v3772_v40 }
 0x7cf   :  { %v6959_v0 = vpop.eup %6958 }
 0x7d0   :  { %v6961_v2 = vpop.eup %6960  ;;  %v7458_v8 = vpack.c.bf16 %v6959_v0, %v6959_v0  ;;  %v6083_v0 = vcombine.low %v3721_v48, %v3725_v49  ;;  %v3776_v49 = vld [vmem:[#allocation7 + $0x740] sm:$0xff] }
 0x7d1   :  { %v6963_v6 = vpop.eup %6962  ;;  %v7456_v7 = vpack.c.bf16 %v6961_v2, %v6961_v2  ;;  %v6092_v2 = vcombine.high %v3729_v61, %v3733_v62 }
 0x7d2   :  { %v7462_v17 = vpack.c.bf16 %v6963_v6, %v6963_v6  ;;  %v3741_v6 = vld [vmem:[#allocation7 + $0x628] sm:$0xff] }
 0x7d3   :  { %5154 = vmatprep.mubr.bf16.mxu1 %v7456_v7  ;;  %5236 = vmatprep.mubr.bf16.mxu0 %v7456_v7  ;;  %v6100_v14 = vcombine.high %v3737_v5, %v3741_v6 }
 0x7d4   :  { %5155 = vmatmul.mubr.bf16.vlgmr.msra.gmra.mrb[24].mxu1 %v7458_v8  ;;  %5237 = vmatmul.mubr.bf16.vlgmr.msra.gmra.mrb[12].mxu0 %v7458_v8 }
 0x7d5   :  { %5164 = vmatpush1.bf16.msra.mxu1 %v6033_v42  ;;  %5246 = vmatpush1.bf16.msra.mxu0 %v6035_v43  ;;  %v6067_v42 = vcombine.low %v3705_v30, %v3709_v31  ;;  %v6074_v43 = vcombine.high %v3712_v37, %v3716_v38  ;;  %v3760_v30 = vld [vmem:[#allocation7 + $0x6c0] sm:$0xff] }
 0x7d6   :  { %5195 = vmatprep.mubr.bf16.mxu1 %v7462_v17  ;;  %5277 = vmatprep.mubr.bf16.mxu0 %v7462_v17  ;;  %v3764_v31 = vld [vmem:[#allocation7 + $0x6e0] sm:$0xff] }
 0x7d7   :  { %5165 = vmatprep.subr.bf16.mxu1 %v6042_v12  ;;  %5247 = vmatprep.subr.bf16.mxu0 %v6044_v13  ;;  %v6091_v12 = vcombine.low %v3729_v61, %v3733_v62  ;;  %v6098_v13 = vcombine.high %v3736_v3, %v3740_v4  ;;  %v6122_v37 = vcombine.high %v3760_v30, %v3764_v31  ;;  %v3784_v62 = vld [vmem:[#allocation7 + $0x780] sm:$0xff] }
 0x7d9   :  { %5166 = vmatpush1.bf16.msra.mxu1 %v6041_v18  ;;  %5248 = vmatpush1.bf16.msra.mxu0 %v6043_v19  ;;  %v3745_v18 = vld [vmem:[#allocation7 + $0x648] sm:$0xff] }
 0x7da   :  { %5167 = vmatprep.subr.bf16.mxu1 %v6050_v20  ;;  %5249 = vmatprep.subr.bf16.mxu0 %v6052_v21  ;;  %v3749_v19 = vld [vmem:[#allocation7 + $0x668] sm:$0xff]  ;;  %v6097_v20 = vcombine.low %v3736_v3, %v3740_v4  ;;  %v6099_v21 = vcombine.low %v3737_v5, %v3741_v6  ;;  %v3792_v5 = vld [vmem:[#allocation7 + $0x7c0] sm:$0xff] }
 0x7db   :  { %v6108_v10 = vcombine.high %v3745_v18, %v3749_v19  ;;  %v3796_v6 = vld [vmem:[#allocation7 + $0x7e0] sm:$0xff] }
 0x7dd   :  { %5168 = vmatpush1.bf16.msra.mxu1 %v6049_v24  ;;  %5250 = vmatpush1.bf16.msra.mxu0 %v6051_v25  ;;  %v3753_v24 = vld [vmem:[#allocation7 + $0x688] sm:$0xff] }
 0x7de   :  { %5169 = vmatprep.subr.bf16.mxu1 %v6058_v26  ;;  %5251 = vmatprep.subr.bf16.mxu0 %v6060_v27  ;;  %v3757_v25 = vld [vmem:[#allocation7 + $0x6a8] sm:$0xff]  ;;  %v6105_v26 = vcombine.low %v3744_v15, %v3748_v16  ;;  %v6107_v27 = vcombine.low %v3745_v18, %v3749_v19  ;;  %v6154_v15 = vcombine.high %v3792_v5, %v3796_v6  ;;  %v3546_v18 = vld [vmem:[#allocation7 + $0x10] sm:$0xff] }
 0x7df   :  { %v6116_v29 = vcombine.high %v3753_v24, %v3757_v25  ;;  %v3550_v19 = vld [vmem:[#allocation7 + $0x30] sm:$0xff] }
 0x7e1   :  { %5170 = vmatpush1.bf16.msra.mxu1 %v6057_v32  ;;  %5252 = vmatpush1.bf16.msra.mxu0 %v6059_v33  ;;  %v3761_v32 = vld [vmem:[#allocation7 + $0x6c8] sm:$0xff] }
 0x7e2   :  { %5171 = vmatprep.subr.bf16.mxu1 %v6066_v34  ;;  %5253 = vmatprep.subr.bf16.mxu0 %v6068_v36  ;;  %v3765_v33 = vld [vmem:[#allocation7 + $0x6e8] sm:$0xff]  ;;  %v6113_v34 = vcombine.low %v3752_v22, %v3756_v23  ;;  %v6115_v36 = vcombine.low %v3753_v24, %v3757_v25  ;;  %v5910_v22 = vcombine.high %v3546_v18, %v3550_v19  ;;  %v3554_v25 = vld [vmem:[#allocation7 + $0x50] sm:$0xff] }
 0x7e3   :  { %v6124_v38 = vcombine.high %v3761_v32, %v3765_v33  ;;  %v6123_v46 = vcombine.low %v3761_v32, %v3765_v33 }
 0x7e5   :  { %5172 = vmatpush1.bf16.msra.mxu1 %v6065_v41  ;;  %5254 = vmatpush1.bf16.msra.mxu0 %v6067_v42  ;;  %v3769_v41 = vld [vmem:[#allocation7 + $0x708] sm:$0xff] }
 0x7e6   :  { %5173 = vmatprep.subr.bf16.mxu1 %v6074_v43  ;;  %5255 = vmatprep.subr.bf16.mxu0 %v6076_v44  ;;  %v3773_v42 = vld [vmem:[#allocation7 + $0x728] sm:$0xff]  ;;  %v3125_v43 = vrot.slane %v7446_v45, %v7297_v35  ;;  %v6121_v44 = vcombine.low %v3760_v30, %v3764_v31 }
 0x7e7   :  { %v6132_v48 = vcombine.high %v3769_v41, %v3773_v42  ;;  %v6131_v60 = vcombine.low %v3769_v41, %v3773_v42 }
 0x7e9   :  { %5174 = vmatpush1.bf16.msra.mxu1 %v6073_v51  ;;  %5256 = vmatpush1.bf16.msra.mxu0 %v6075_v52  ;;  %v3780_v51 = vld [vmem:[#allocation7 + $0x760] sm:$0xff]  ;;  %v3777_v52 = vld [vmem:[#allocation7 + $0x748] sm:$0xff] }
 0x7ea   :  { %5175 = vmatprep.subr.bf16.mxu1 %v6082_v53  ;;  %5257 = vmatprep.subr.bf16.mxu0 %v6084_v56  ;;  %v3781_v53 = vld [vmem:[#allocation7 + $0x768] sm:$0xff]  ;;  %v3530_v56 = vadd.f32 %v7454_v50, %v3125_v43  ;;  %v6138_v45 = vcombine.high %v3776_v49, %v3780_v51  ;;  %v3570_v43 = vld [vmem:[#allocation7 + $0xd0] sm:$0xff] }
 0x7eb   :  { %v6140_v61 = vcombine.high %v3777_v52, %v3781_v53  ;;  %v6139_v3 = vcombine.low %v3777_v52, %v3781_v53  ;;  %v3578_v53 = vld [vmem:[#allocation7 + $0x110] sm:$0xff] }
 0x7ec   :  { %6964 = vtanh.f32 %v3530_v56  ;;  %v3582_v56 = vld [vmem:[#allocation7 + $0x130] sm:$0xff] }
 0x7ed   :  { %5176 = vmatpush1.bf16.msra.mxu1 %v6081_v63  ;;  %5258 = vmatpush1.bf16.msra.mxu0 %v6083_v0  ;;  %v3788_v63 = vld [vmem:[#allocation7 + $0x7a0] sm:$0xff]  ;;  %v3785_v0 = vld [vmem:[#allocation7 + $0x788] sm:$0xff] }
 0x7ee   :  { %5177 = vmatprep.subr.bf16.mxu1 %v6090_v1  ;;  %5259 = vmatprep.subr.bf16.mxu0 %v6092_v2  ;;  %v3789_v1 = vld [vmem:[#allocation7 + $0x7a8] sm:$0xff]  ;;  %v6137_v2 = vcombine.low %v3776_v49, %v3780_v51  ;;  %v6146_v50 = vcombine.high %v3784_v62, %v3788_v63 }
 0x7ef   :  { %v6148_v4 = vcombine.high %v3785_v0, %v3789_v1 }
 0x7f1   :  { %5178 = vmatpush1.bf16.msra.mxu1 %v6089_v9  ;;  %5260 = vmatpush1.bf16.msra.mxu0 %v6091_v12  ;;  %v3793_v9 = vld [vmem:[#allocation7 + $0x7c8] sm:$0xff] }
 0x7f2   :  { %5179 = vmatprep.subr.bf16.mxu1 %v6098_v13  ;;  %5261 = vmatprep.subr.bf16.mxu0 %v6100_v14  ;;  %v3797_v12 = vld [vmem:[#allocation7 + $0x7e8] sm:$0xff]  ;;  %v6145_v13 = vcombine.low %v3784_v62, %v3788_v63  ;;  %v6147_v14 = vcombine.low %v3785_v0, %v3789_v1  ;;  %v3586_v63 = vld [vmem:[#allocation7 + $0x150] sm:$0xff]  ;;  %v3587_v1 = vld [vmem:[#allocation7 + $0x158] sm:$0xff] }
 0x7f3   :  { %v6156_v16 = vcombine.high %v3793_v9, %v3797_v12  ;;  %v3590_v0 = vld [vmem:[#allocation7 + $0x170] sm:$0xff] }
 0x7f5   :  { %5180 = vmatpush1.bf16.msra.mxu1 %v6097_v20  ;;  %5262 = vmatpush1.bf16.msra.mxu0 %v6099_v21  ;;  %v3547_v20 = vld [vmem:[#allocation7 + $0x18] sm:$0xff] }
 0x7f6   :  { %5181 = vmatprep.subr.bf16.mxu1 %v6106_v11  ;;  %5263 = vmatprep.subr.bf16.mxu0 %v6108_v10  ;;  %v3551_v21 = vld [vmem:[#allocation7 + $0x38] sm:$0xff]  ;;  %v6153_v11 = vcombine.low %v3792_v5, %v3796_v6  ;;  %v6155_v10 = vcombine.low %v3793_v9, %v3797_v12  ;;  %v6965_v24 = vpop.eup %6964  ;;  %v3594_v6 = vld [vmem:[#allocation7 + $0x190] sm:$0xff] }
 0x7f7   :  { %v5912_v23 = vcombine.high %v3547_v20, %v3551_v21  ;;  %v7471_v30 = vpack.c.bf16 %v6965_v24, %v6965_v24  ;;  %v5911_v31 = vcombine.low %v3547_v20, %v3551_v21  ;;  %v3598_v9 = vld [vmem:[#allocation7 + $0x1b0] sm:$0xff]  ;;  %v3595_v12 = vld [vmem:[#allocation7 + $0x198] sm:$0xff] }
 0x7f8   :  { %v3606_v20 = vld [vmem:[#allocation7 + $0x1f0] sm:$0xff]  ;;  %v3603_v21 = vld [vmem:[#allocation7 + $0x1d8] sm:$0xff] }
 0x7f9   :  { %5182 = vmatpush1.bf16.msra.mxu1 %v6105_v26  ;;  %5264 = vmatpush1.bf16.msra.mxu0 %v6107_v27  ;;  %v3558_v26 = vld [vmem:[#allocation7 + $0x70] sm:$0xff]  ;;  %v3555_v27 = vld [vmem:[#allocation7 + $0x58] sm:$0xff] }
 0x7fa   :  { %5183 = vmatprep.subr.bf16.mxu1 %v6114_v28  ;;  %5265 = vmatprep.subr.bf16.mxu0 %v6116_v29  ;;  %v3559_v28 = vld [vmem:[#allocation7 + $0x78] sm:$0xff]  ;;  %v5909_v29 = vcombine.low %v3546_v18, %v3550_v19  ;;  %v5918_v32 = vcombine.high %v3554_v25, %v3558_v26  ;;  %v5917_v39 = vcombine.low %v3554_v25, %v3558_v26  ;;  %v3602_v19 = vld [vmem:[#allocation7 + $0x1d0] sm:$0xff] }
 0x7fb   :  { %v5920_v33 = vcombine.high %v3555_v27, %v3559_v28  ;;  %v5919_v40 = vcombine.low %v3555_v27, %v3559_v28  ;;  %v3610_v25 = vld [vmem:[#allocation7 + $0x210] sm:$0xff]  ;;  %v3611_v27 = vld [vmem:[#allocation7 + $0x218] sm:$0xff] }
 0x7fc   :  { %v3614_v26 = vld [vmem:[#allocation7 + $0x230] sm:$0xff]  ;;  %v3615_v28 = vld [vmem:[#allocation7 + $0x238] sm:$0xff] }
 0x7fd   :  { %5184 = vmatpush1.bf16.msra.mxu1 %v6113_v34  ;;  %5266 = vmatpush1.bf16.msra.mxu0 %v6115_v36  ;;  %v3562_v34 = vld [vmem:[#allocation7 + $0x90] sm:$0xff] }
 0x7fe   :  { %5185 = vmatprep.subr.bf16.mxu1 %v6122_v37  ;;  %5267 = vmatprep.subr.bf16.mxu0 %v6124_v38  ;;  %v3566_v36 = vld [vmem:[#allocation7 + $0xb0] sm:$0xff]  ;;  %v3563_v37 = vld [vmem:[#allocation7 + $0x98] sm:$0xff] }
 0x7ff   :  { %v3567_v38 = vld [vmem:[#allocation7 + $0xb8] sm:$0xff]  ;;  %v5926_v41 = vcombine.high %v3562_v34, %v3566_v36 }
 0x800   :  { %v5928_v42 = vcombine.high %v3563_v37, %v3567_v38  ;;  %v5927_v49 = vcombine.low %v3563_v37, %v3567_v38  ;;  %v3619_v37 = vld [vmem:[#allocation7 + $0x258] sm:$0xff] }
 0x801   :  { %5186 = vmatpush1.bf16.msra.mxu1 %v6121_v44  ;;  %5268 = vmatpush1.bf16.msra.mxu0 %v6123_v46  ;;  %v3574_v44 = vld [vmem:[#allocation7 + $0xf0] sm:$0xff]  ;;  %v3571_v46 = vld [vmem:[#allocation7 + $0xd8] sm:$0xff] }
 0x802   :  { %5187 = vmatprep.subr.bf16.mxu1 %v6130_v47  ;;  %5269 = vmatprep.subr.bf16.mxu0 %v6132_v48  ;;  %v3575_v47 = vld [vmem:[#allocation7 + $0xf8] sm:$0xff]  ;;  %v5925_v48 = vcombine.low %v3562_v34, %v3566_v36  ;;  %v5934_v51 = vcombine.high %v3570_v43, %v3574_v44  ;;  %v3618_v34 = vld [vmem:[#allocation7 + $0x250] sm:$0xff] }
 0x803   :  { %v5936_v52 = vcombine.high %v3571_v46, %v3575_v47  ;;  %v3622_v36 = vld [vmem:[#allocation7 + $0x270] sm:$0xff]  ;;  %v3623_v38 = vld [vmem:[#allocation7 + $0x278] sm:$0xff] }
 0x805   :  { %5188 = vmatpush1.bf16.msra.mxu1 %v6129_v59  ;;  %5270 = vmatpush1.bf16.msra.mxu0 %v6131_v60  ;;  %v3583_v59 = vld [vmem:[#allocation7 + $0x138] sm:$0xff]  ;;  %v5933_v60 = vcombine.low %v3570_v43, %v3574_v44  ;;  %v3626_v43 = vld [vmem:[#allocation7 + $0x290] sm:$0xff] }
 0x806   :  { %5189 = vmatprep.subr.bf16.mxu1 %v6138_v45  ;;  %5271 = vmatprep.subr.bf16.mxu0 %v6140_v61  ;;  %v5935_v45 = vcombine.low %v3571_v46, %v3575_v47  ;;  %v5942_v61 = vcombine.high %v3578_v53, %v3582_v56  ;;  %v3630_v44 = vld [vmem:[#allocation7 + $0x2b0] sm:$0xff]  ;;  %v3627_v46 = vld [vmem:[#allocation7 + $0x298] sm:$0xff] }
 0x807   :  { %v3631_v47 = vld [vmem:[#allocation7 + $0x2b8] sm:$0xff] }
 0x809   :  { %5190 = vmatpush1.bf16.msra.mxu1 %v6137_v2  ;;  %5272 = vmatpush1.bf16.msra.mxu0 %v6139_v3  ;;  %v3591_v2 = vld [vmem:[#allocation7 + $0x178] sm:$0xff]  ;;  %v5941_v3 = vcombine.low %v3578_v53, %v3582_v56  ;;  %v3634_v53 = vld [vmem:[#allocation7 + $0x2d0] sm:$0xff] }
 0x80a   :  { %5191 = vmatprep.subr.bf16.mxu1 %v6146_v50  ;;  %5273 = vmatprep.subr.bf16.mxu0 %v6148_v4  ;;  %v5950_v4 = vcombine.high %v3586_v63, %v3590_v0  ;;  %v5952_v5 = vcombine.high %v3587_v1, %v3591_v2  ;;  %v3638_v56 = vld [vmem:[#allocation7 + $0x2f0] sm:$0xff] }
 0x80d   :  { %5192 = vmatpush1.bf16.msra.mxu1 %v6145_v13  ;;  %5274 = vmatpush1.bf16.msra.mxu0 %v6147_v14  ;;  %v3599_v13 = vld [vmem:[#allocation7 + $0x1b8] sm:$0xff]  ;;  %v5949_v14 = vcombine.low %v3586_v63, %v3590_v0  ;;  %v3642_v63 = vld [vmem:[#allocation7 + $0x310] sm:$0xff] }
 0x80e   :  { %5193 = vmatprep.subr.bf16.mxu1 %v6154_v15  ;;  %5275 = vmatprep.subr.bf16.mxu0 %v6156_v16  ;;  %v5951_v15 = vcombine.low %v3587_v1, %v3591_v2  ;;  %v5958_v16 = vcombine.high %v3594_v6, %v3598_v9  ;;  %v5960_v18 = vcombine.high %v3595_v12, %v3599_v13  ;;  %v3646_v0 = vld [vmem:[#allocation7 + $0x330] sm:$0xff]  ;;  %v3643_v1 = vld [vmem:[#allocation7 + $0x318] sm:$0xff] }
 0x80f   :  { %v3647_v2 = vld [vmem:[#allocation7 + $0x338] sm:$0xff] }
 0x811   :  { %5194 = vmatpush1.bf16.msra.mxu1 %v6153_v11  ;;  %5276 = vmatpush1.bf16.msra.mxu0 %v6155_v10  ;;  %v3607_v11 = vld [vmem:[#allocation7 + $0x1f8] sm:$0xff]  ;;  %v5957_v10 = vcombine.low %v3594_v6, %v3598_v9  ;;  %v3650_v6 = vld [vmem:[#allocation7 + $0x350] sm:$0xff] }
 0x812   :  { %5286 = vmatprep.subr.bf16.mxu1 %v5910_v22  ;;  %5368 = vmatprep.subr.bf16.mxu0 %v5912_v23  ;;  %v5959_v22 = vcombine.low %v3595_v12, %v3599_v13  ;;  %v5966_v23 = vcombine.high %v3602_v19, %v3606_v20  ;;  %v5968_v24 = vcombine.high %v3603_v21, %v3607_v11  ;;  %v3654_v9 = vld [vmem:[#allocation7 + $0x370] sm:$0xff]  ;;  %v3651_v12 = vld [vmem:[#allocation7 + $0x358] sm:$0xff] }
 0x813   :  { %v3655_v13 = vld [vmem:[#allocation7 + $0x378] sm:$0xff] }
 0x814   :  { %5196 = vmatmul.mubr.bf16.vlgmr.msra.gmra.mrb[24].mxu1 %v7471_v30  ;;  %5278 = vmatmul.mubr.bf16.vlgmr.msra.gmra.mrb[12].mxu0 %v7471_v30 }
 0x815   :  { %5287 = vmatpush1.bf16.msra.mxu1 %v5909_v29  ;;  %5318 = vmatprep.mubr.bf16.mxu1 %v7456_v7  ;;  %v5965_v29 = vcombine.low %v3602_v19, %v3606_v20  ;;  %v3658_v19 = vld [vmem:[#allocation7 + $0x390] sm:$0xff] }
 0x816   :  { %5369 = vmatpush1.bf16.msra.mxu0 %v5911_v31  ;;  %5400 = vmatprep.mubr.bf16.mxu0 %v7456_v7  ;;  %v3579_v7 = vld [vmem:[#allocation7 + $0x118] sm:$0xff]  ;;  %v5967_v31 = vcombine.low %v3603_v21, %v3607_v11  ;;  %v3662_v20 = vld [vmem:[#allocation7 + $0x3b0] sm:$0xff] }
 0x817   :  { %5288 = vmatprep.subr.bf16.mxu1 %v5918_v32  ;;  %5370 = vmatprep.subr.bf16.mxu0 %v5920_v33  ;;  %v5944_v62 = vcombine.high %v3579_v7, %v3583_v59  ;;  %v5943_v50 = vcombine.low %v3579_v7, %v3583_v59  ;;  %v5974_v32 = vcombine.high %v3610_v25, %v3614_v26  ;;  %v3635_v7 = vld [vmem:[#allocation7 + $0x2d8] sm:$0xff] }
 0x818   :  { %v5976_v33 = vcombine.high %v3611_v27, %v3615_v28  ;;  %v3639_v59 = vld [vmem:[#allocation7 + $0x2f8] sm:$0xff] }
 0x819   :  { %5289 = vmatpush1.bf16.msra.mxu1 %v5917_v39  ;;  %v5973_v39 = vcombine.low %v3610_v25, %v3614_v26  ;;  %v3659_v21 = vld [vmem:[#allocation7 + $0x398] sm:$0xff]  ;;  %v3666_v25 = vld [vmem:[#allocation7 + $0x3d0] sm:$0xff] }
 0x81a   :  { %5371 = vmatpush1.bf16.msra.mxu0 %v5919_v40  ;;  %5290 = vmatprep.subr.bf16.mxu1 %v5926_v41  ;;  %v5975_v40 = vcombine.low %v3611_v27, %v3615_v28  ;;  %v5982_v41 = vcombine.high %v3618_v34, %v3622_v36  ;;  %v3663_v11 = vld [vmem:[#allocation7 + $0x3b8] sm:$0xff]  ;;  %v3670_v26 = vld [vmem:[#allocation7 + $0x3f0] sm:$0xff] }
 0x81b   :  { %5372 = vmatprep.subr.bf16.mxu0 %v5928_v42  ;;  %v5984_v42 = vcombine.high %v3619_v37, %v3623_v38  ;;  %v3667_v27 = vld [vmem:[#allocation7 + $0x3d8] sm:$0xff] }
 0x81c   :  { %v3671_v28 = vld [vmem:[#allocation7 + $0x3f8] sm:$0xff] }
 0x81d   :  { %5291 = vmatpush1.bf16.msra.mxu1 %v5925_v48  ;;  %v5981_v48 = vcombine.low %v3618_v34, %v3622_v36  ;;  %v3674_v34 = vld [vmem:[#allocation7 + $0x410] sm:$0xff] }
 0x81e   :  { %5373 = vmatpush1.bf16.msra.mxu0 %v5927_v49  ;;  %5292 = vmatprep.subr.bf16.mxu1 %v5934_v51  ;;  %v5983_v49 = vcombine.low %v3619_v37, %v3623_v38  ;;  %v5990_v51 = vcombine.high %v3626_v43, %v3630_v44  ;;  %v3678_v36 = vld [vmem:[#allocation7 + $0x430] sm:$0xff]  ;;  %v3675_v37 = vld [vmem:[#allocation7 + $0x418] sm:$0xff] }
 0x81f   :  { %5374 = vmatprep.subr.bf16.mxu0 %v5936_v52  ;;  %v5992_v52 = vcombine.high %v3627_v46, %v3631_v47  ;;  %v3679_v38 = vld [vmem:[#allocation7 + $0x438] sm:$0xff] }
 0x821   :  { %5293 = vmatpush1.bf16.msra.mxu1 %v5933_v60  ;;  %v5989_v60 = vcombine.low %v3626_v43, %v3630_v44  ;;  %v3682_v43 = vld [vmem:[#allocation7 + $0x450] sm:$0xff] }
 0x822   :  { %5375 = vmatpush1.bf16.msra.mxu0 %v5935_v45  ;;  %5294 = vmatprep.subr.bf16.mxu1 %v5942_v61  ;;  %v5991_v45 = vcombine.low %v3627_v46, %v3631_v47  ;;  %v5998_v61 = vcombine.high %v3634_v53, %v3638_v56  ;;  %v3686_v44 = vld [vmem:[#allocation7 + $0x470] sm:$0xff]  ;;  %v6037_v46 = vcombine.low %v3674_v34, %v3678_v36  ;;  %v3683_v47 = vld [vmem:[#allocation7 + $0x458] sm:$0xff] }
 0x823   :  { %5376 = vmatprep.subr.bf16.mxu0 %v5944_v62  ;;  %v6000_v62 = vcombine.high %v3635_v7, %v3639_v59 }
 0x825   :  { %5295 = vmatpush1.bf16.msra.mxu1 %v5941_v3  ;;  %v5997_v3 = vcombine.low %v3634_v53, %v3638_v56  ;;  %v3694_v53 = vld [vmem:[#allocation7 + $0x4b0] sm:$0xff] }
 0x826   :  { %5377 = vmatpush1.bf16.msra.mxu0 %v5943_v50  ;;  %5296 = vmatprep.subr.bf16.mxu1 %v5950_v4  ;;  %v5999_v50 = vcombine.low %v3635_v7, %v3639_v59  ;;  %v6006_v4 = vcombine.high %v3642_v63, %v3646_v0  ;;  %v3691_v7 = vld [vmem:[#allocation7 + $0x498] sm:$0xff] }
 0x827   :  { %5378 = vmatprep.subr.bf16.mxu0 %v5952_v5  ;;  %v6008_v5 = vcombine.high %v3643_v1, %v3647_v2  ;;  %v3695_v59 = vld [vmem:[#allocation7 + $0x4b8] sm:$0xff] }
 0x829   :  { %5297 = vmatpush1.bf16.msra.mxu1 %v5949_v14  ;;  %v6005_v14 = vcombine.low %v3642_v63, %v3646_v0  ;;  %v3698_v63 = vld [vmem:[#allocation7 + $0x4d0] sm:$0xff] }
 0x82a   :  { %5379 = vmatpush1.bf16.msra.mxu0 %v5951_v15  ;;  %5298 = vmatprep.subr.bf16.mxu1 %v5958_v16  ;;  %v6007_v15 = vcombine.low %v3643_v1, %v3647_v2  ;;  %v6014_v16 = vcombine.high %v3650_v6, %v3654_v9  ;;  %v3702_v0 = vld [vmem:[#allocation7 + $0x4f0] sm:$0xff]  ;;  %v3699_v1 = vld [vmem:[#allocation7 + $0x4d8] sm:$0xff] }
 0x82b   :  { %5380 = vmatprep.subr.bf16.mxu0 %v5960_v18  ;;  %v6016_v18 = vcombine.high %v3651_v12, %v3655_v13  ;;  %v3703_v2 = vld [vmem:[#allocation7 + $0x4f8] sm:$0xff] }
 0x82d   :  { %5299 = vmatpush1.bf16.msra.mxu1 %v5957_v10  ;;  %v6013_v10 = vcombine.low %v3650_v6, %v3654_v9  ;;  %v3710_v6 = vld [vmem:[#allocation7 + $0x530] sm:$0xff]  ;;  %v3707_v9 = vld [vmem:[#allocation7 + $0x518] sm:$0xff] }
 0x82e   :  { %5381 = vmatpush1.bf16.msra.mxu0 %v5959_v22  ;;  %5300 = vmatprep.subr.bf16.mxu1 %v5966_v23  ;;  %v6015_v22 = vcombine.low %v3651_v12, %v3655_v13  ;;  %v6022_v23 = vcombine.high %v3658_v19, %v3662_v20  ;;  %v3711_v12 = vld [vmem:[#allocation7 + $0x538] sm:$0xff]  ;;  %v6063_v13 = vcombine.low %v3699_v1, %v3703_v2 }
 0x82f   :  { %5382 = vmatprep.subr.bf16.mxu0 %v5968_v24  ;;  %v6024_v24 = vcombine.high %v3659_v21, %v3663_v11 }
 0x831   :  { %5301 = vmatpush1.bf16.msra.mxu1 %v5965_v29  ;;  %v6021_v29 = vcombine.low %v3658_v19, %v3662_v20  ;;  %v3715_v19 = vld [vmem:[#allocation7 + $0x558] sm:$0xff] }
 0x832   :  { %5383 = vmatpush1.bf16.msra.mxu0 %v5967_v31  ;;  %5302 = vmatprep.subr.bf16.mxu1 %v5974_v32  ;;  %v6023_v31 = vcombine.low %v3659_v21, %v3663_v11  ;;  %v6030_v32 = vcombine.high %v3666_v25, %v3670_v26  ;;  %v3719_v20 = vld [vmem:[#allocation7 + $0x578] sm:$0xff]  ;;  %v6071_v11 = vcombine.low %v3707_v9, %v3711_v12 }
 0x833   :  { %5384 = vmatprep.subr.bf16.mxu0 %v5976_v33  ;;  %v6032_v33 = vcombine.high %v3667_v27, %v3671_v28 }
 0x835   :  { %5303 = vmatpush1.bf16.msra.mxu1 %v5973_v39  ;;  %v6029_v39 = vcombine.low %v3666_v25, %v3670_v26  ;;  %v3723_v25 = vld [vmem:[#allocation7 + $0x598] sm:$0xff] }
 0x836   :  { %5385 = vmatpush1.bf16.msra.mxu0 %v5975_v40  ;;  %5304 = vmatprep.subr.bf16.mxu1 %v5982_v41  ;;  %v6031_v40 = vcombine.low %v3667_v27, %v3671_v28  ;;  %v6038_v41 = vcombine.high %v3674_v34, %v3678_v36  ;;  %v3727_v26 = vld [vmem:[#allocation7 + $0x5b8] sm:$0xff]  ;;  %v6079_v28 = vcombine.low %v3715_v19, %v3719_v20 }
 0x837   :  { %5386 = vmatprep.subr.bf16.mxu0 %v5984_v42  ;;  %v6040_v42 = vcombine.high %v3675_v37, %v3679_v38  ;;  %v3731_v34 = vld [vmem:[#allocation7 + $0x5d8] sm:$0xff] }
 0x838   :  { %v3735_v36 = vld [vmem:[#allocation7 + $0x5f8] sm:$0xff] }
 0x839   :  { %5305 = vmatpush1.bf16.msra.mxu1 %v5981_v48  ;;  %v3687_v48 = vld [vmem:[#allocation7 + $0x478] sm:$0xff] }
 0x83a   :  { %5387 = vmatpush1.bf16.msra.mxu0 %v5983_v49  ;;  %5306 = vmatprep.subr.bf16.mxu1 %v5990_v51  ;;  %v6039_v49 = vcombine.low %v3675_v37, %v3679_v38  ;;  %v6046_v51 = vcombine.high %v3682_v43, %v3686_v44  ;;  %v6048_v56 = vcombine.high %v3683_v47, %v3687_v48 }
 0x83b   :  { %5388 = vmatprep.subr.bf16.mxu0 %v5992_v52  ;;  %v3690_v52 = vld [vmem:[#allocation7 + $0x490] sm:$0xff]  ;;  %v6087_v38 = vcombine.low %v3723_v25, %v3727_v26 }
 0x83d   :  { %5307 = vmatpush1.bf16.msra.mxu1 %v5989_v60  ;;  %v6045_v60 = vcombine.low %v3682_v43, %v3686_v44  ;;  %v3739_v43 = vld [vmem:[#allocation7 + $0x618] sm:$0xff] }
 0x83e   :  { %5389 = vmatpush1.bf16.msra.mxu0 %v5991_v45  ;;  %5308 = vmatprep.subr.bf16.mxu1 %v5998_v61  ;;  %v6047_v45 = vcombine.low %v3683_v47, %v3687_v48  ;;  %v6054_v61 = vcombine.high %v3690_v52, %v3694_v53  ;;  %v3743_v44 = vld [vmem:[#allocation7 + $0x638] sm:$0xff]  ;;  %v6095_v47 = vcombine.low %v3731_v34, %v3735_v36 }
 0x83f   :  { %5390 = vmatprep.subr.bf16.mxu0 %v6000_v62  ;;  %v6056_v62 = vcombine.high %v3691_v7, %v3695_v59 }
 0x841   :  { %5309 = vmatpush1.bf16.msra.mxu1 %v5997_v3  ;;  %v6053_v3 = vcombine.low %v3690_v52, %v3694_v53  ;;  %v3750_v52 = vld [vmem:[#allocation7 + $0x670] sm:$0xff]  ;;  %v3747_v53 = vld [vmem:[#allocation7 + $0x658] sm:$0xff] }
 0x842   :  { %5391 = vmatpush1.bf16.msra.mxu0 %v5999_v50  ;;  %5310 = vmatprep.subr.bf16.mxu1 %v6006_v4  ;;  %v6062_v50 = vcombine.high %v3698_v63, %v3702_v0  ;;  %v6064_v4 = vcombine.high %v3699_v1, %v3703_v2 }
 0x843   :  { %5392 = vmatprep.subr.bf16.mxu0 %v6008_v5  ;;  %v3706_v5 = vld [vmem:[#allocation7 + $0x510] sm:$0xff] }
 0x844   :  { %v6069_v21 = vcombine.low %v3706_v5, %v3710_v6 }
 0x845   :  { %5311 = vmatpush1.bf16.msra.mxu1 %v6005_v14  ;;  %v6070_v14 = vcombine.high %v3706_v5, %v3710_v6  ;;  %v3763_v5 = vld [vmem:[#allocation7 + $0x6d8] sm:$0xff] }
 0x846   :  { %5393 = vmatpush1.bf16.msra.mxu0 %v6007_v15  ;;  %5312 = vmatprep.subr.bf16.mxu1 %v6014_v16  ;;  %v6072_v15 = vcombine.high %v3707_v9, %v3711_v12  ;;  %v3714_v16 = vld [vmem:[#allocation7 + $0x550] sm:$0xff]  ;;  %v3767_v6 = vld [vmem:[#allocation7 + $0x6f8] sm:$0xff] }
 0x847   :  { %5394 = vmatprep.subr.bf16.mxu0 %v6016_v18  ;;  %v3718_v18 = vld [vmem:[#allocation7 + $0x570] sm:$0xff] }
 0x848   :  { %v6077_v27 = vcombine.low %v3714_v16, %v3718_v18 }
 0x849   :  { %5313 = vmatpush1.bf16.msra.mxu1 %v6013_v10  ;;  %v6078_v10 = vcombine.high %v3714_v16, %v3718_v18  ;;  %v3771_v16 = vld [vmem:[#allocation7 + $0x718] sm:$0xff] }
 0x84a   :  { %5395 = vmatpush1.bf16.msra.mxu0 %v6015_v22  ;;  %5314 = vmatprep.subr.bf16.mxu1 %v6022_v23  ;;  %v6080_v22 = vcombine.high %v3715_v19, %v3719_v20  ;;  %v3722_v23 = vld [vmem:[#allocation7 + $0x590] sm:$0xff]  ;;  %v3775_v18 = vld [vmem:[#allocation7 + $0x738] sm:$0xff]  ;;  %v6127_v20 = vcombine.low %v3763_v5, %v3767_v6 }
 0x84b   :  { %5396 = vmatprep.subr.bf16.mxu0 %v6024_v24  ;;  %v3726_v24 = vld [vmem:[#allocation7 + $0x5b0] sm:$0xff] }
 0x84c   :  { %v6085_v37 = vcombine.low %v3722_v23, %v3726_v24 }
 0x84d   :  { %5315 = vmatpush1.bf16.msra.mxu1 %v6021_v29  ;;  %v6086_v29 = vcombine.high %v3722_v23, %v3726_v24  ;;  %v3779_v23 = vld [vmem:[#allocation7 + $0x758] sm:$0xff] }
 0x84e   :  { %5397 = vmatpush1.bf16.msra.mxu0 %v6023_v31  ;;  %5316 = vmatprep.subr.bf16.mxu1 %v6030_v32  ;;  %v6088_v31 = vcombine.high %v3723_v25, %v3727_v26  ;;  %v3730_v32 = vld [vmem:[#allocation7 + $0x5d0] sm:$0xff]  ;;  %v3783_v24 = vld [vmem:[#allocation7 + $0x778] sm:$0xff]  ;;  %v6135_v26 = vcombine.low %v3771_v16, %v3775_v18 }
 0x84f   :  { %5398 = vmatprep.subr.bf16.mxu0 %v6032_v33  ;;  %v3734_v33 = vld [vmem:[#allocation7 + $0x5f0] sm:$0xff] }
 0x851   :  { %5317 = vmatpush1.bf16.msra.mxu1 %v6029_v39  ;;  %v6094_v39 = vcombine.high %v3730_v32, %v3734_v33 }
 0x852   :  { %5399 = vmatpush1.bf16.msra.mxu0 %v6031_v40  ;;  %5327 = vmatprep.subr.bf16.mxu1 %v6038_v41  ;;  %v6096_v40 = vcombine.high %v3731_v34, %v3735_v36  ;;  %v3738_v41 = vld [vmem:[#allocation7 + $0x610] sm:$0xff]  ;;  %v6143_v36 = vcombine.low %v3779_v23, %v3783_v24 }
 0x853   :  { %5409 = vmatprep.subr.bf16.mxu0 %v6040_v42  ;;  %v3742_v42 = vld [vmem:[#allocation7 + $0x630] sm:$0xff] }
 0x854   :  { %5319 = vmatmul.mubr.bf16.vlgmr.msra.gmra.mrb[28].mxu1 %v7458_v8  ;;  %v6102_v48 = vcombine.high %v3738_v41, %v3742_v42 }
 0x855   :  { %5401 = vmatmul.mubr.bf16.vlgmr.msra.gmra.mrb[16].mxu0 %v7458_v8  ;;  %5328 = vmatpush1.bf16.msra.mxu1 %v6037_v46  ;;  %v6055_v8 = vcombine.low %v3691_v7, %v3695_v59  ;;  %v6093_v46 = vcombine.low %v3730_v32, %v3734_v33  ;;  %v6101_v7 = vcombine.low %v3738_v41, %v3742_v42  ;;  %v3787_v32 = vld [vmem:[#allocation7 + $0x798] sm:$0xff] }
 0x856   :  { %5359 = vmatprep.mubr.bf16.mxu1 %v7462_v17  ;;  %5410 = vmatpush1.bf16.msra.mxu0 %v6039_v49  ;;  %v6104_v49 = vcombine.high %v3739_v43, %v3743_v44  ;;  %v6103_v59 = vcombine.low %v3739_v43, %v3743_v44  ;;  %v3791_v33 = vld [vmem:[#allocation7 + $0x7b8] sm:$0xff] }
 0x857   :  { %5441 = vmatprep.mubr.bf16.mxu0 %v7462_v17  ;;  %5329 = vmatprep.subr.bf16.mxu1 %v6046_v51  ;;  %v6061_v17 = vcombine.low %v3698_v63, %v3702_v0  ;;  %v3746_v51 = vld [vmem:[#allocation7 + $0x650] sm:$0xff]  ;;  %v3755_v63 = vld [vmem:[#allocation7 + $0x698] sm:$0xff]  ;;  %v6151_v44 = vcombine.low %v3787_v32, %v3791_v33 }
 0x858   :  { %5411 = vmatprep.subr.bf16.mxu0 %v6048_v56  ;;  %v3751_v56 = vld [vmem:[#allocation7 + $0x678] sm:$0xff]  ;;  %v6109_v1 = vcombine.low %v3746_v51, %v3750_v52 }
 0x859   :  { %5330 = vmatpush1.bf16.msra.mxu1 %v6045_v60  ;;  %v6110_v60 = vcombine.high %v3746_v51, %v3750_v52  ;;  %v3759_v0 = vld [vmem:[#allocation7 + $0x6b8] sm:$0xff]  ;;  %v6111_v2 = vcombine.low %v3747_v53, %v3751_v56  ;;  %v3800_v51 = vld [vmem:[%s7534_s16] sm:$0xff] }
 0x85a   :  { %5412 = vmatpush1.bf16.msra.mxu0 %v6047_v45  ;;  %5331 = vmatprep.subr.bf16.mxu1 %v6054_v61  ;;  %v6112_v45 = vcombine.high %v3747_v53, %v3751_v56  ;;  %v3754_v61 = vld [vmem:[#allocation7 + $0x690] sm:$0xff]  ;;  %v6119_v12 = vcombine.low %v3755_v63, %v3759_v0  ;;  %v3795_v41 = vld [vmem:[#allocation7 + $0x7d8] sm:$0xff]  ;;  %v3805_v52 = vrot.slane %v3800_v51, %v7275_v55 }
 0x85b   :  { %5413 = vmatprep.subr.bf16.mxu0 %v6056_v62  ;;  %v3758_v62 = vld [vmem:[#allocation7 + $0x6b0] sm:$0xff]  ;;  %v3799_v42 = vld [vmem:[#allocation7 + $0x7f8] sm:$0xff]  ;;  %v3813_v53 = vrot.slane %v3800_v51, %v7297_v35  ;;  %v3809_v56 = vrot.slane %v3800_v51, %v7283_v57  ;;  %v3828_v35 = vsub.s32 6, %v7272_v54 }
 0x85c   :  { %v6117_v9 = vcombine.low %v3754_v61, %v3758_v62 }
 0x85d   :  { %5332 = vmatpush1.bf16.msra.mxu1 %v6053_v3  ;;  %v6118_v3 = vcombine.high %v3754_v61, %v3758_v62 }
 0x85e   :  { %5414 = vmatpush1.bf16.msra.mxu0 %v6055_v8  ;;  %5333 = vmatprep.subr.bf16.mxu1 %v6062_v50  ;;  %v6120_v8 = vcombine.high %v3755_v63, %v3759_v0  ;;  %v3762_v50 = vld [vmem:[#allocation7 + $0x6d0] sm:$0xff] }
 0x85f   :  { %5415 = vmatprep.subr.bf16.mxu0 %v6064_v4  ;;  %v3766_v4 = vld [vmem:[#allocation7 + $0x6f0] sm:$0xff] }
 0x860   :  { %v6125_v19 = vcombine.low %v3762_v50, %v3766_v4 }
 0x861   :  { %5334 = vmatpush1.bf16.msra.mxu1 %v6061_v17  ;;  %v6126_v17 = vcombine.high %v3762_v50, %v3766_v4  ;;  %v3829_v4 = vrot.slane %v3800_v51, %v3828_v35 }
 0x862   :  { %5416 = vmatpush1.bf16.msra.mxu0 %v6063_v13  ;;  %5335 = vmatprep.subr.bf16.mxu1 %v6070_v14  ;;  %v6128_v13 = vcombine.high %v3763_v5, %v3767_v6  ;;  %v3770_v14 = vld [vmem:[#allocation7 + $0x710] sm:$0xff] }
 0x863   :  { %5417 = vmatprep.subr.bf16.mxu0 %v6072_v15  ;;  %v3774_v15 = vld [vmem:[#allocation7 + $0x730] sm:$0xff] }
 0x864   :  { %v6133_v25 = vcombine.low %v3770_v14, %v3774_v15 }
 0x865   :  { %5336 = vmatpush1.bf16.msra.mxu1 %v6069_v21  ;;  %v6134_v21 = vcombine.high %v3770_v14, %v3774_v15 }
 0x866   :  { %5418 = vmatpush1.bf16.msra.mxu0 %v6071_v11  ;;  %5337 = vmatprep.subr.bf16.mxu1 %v6078_v10  ;;  %v6136_v11 = vcombine.high %v3771_v16, %v3775_v18  ;;  %v3778_v10 = vld [vmem:[#allocation7 + $0x750] sm:$0xff] }
 0x867   :  { %5419 = vmatprep.subr.bf16.mxu0 %v6080_v22  ;;  %v3782_v22 = vld [vmem:[#allocation7 + $0x770] sm:$0xff] }
 0x868   :  { %v6141_v34 = vcombine.low %v3778_v10, %v3782_v22 }
 0x869   :  { %5338 = vmatpush1.bf16.msra.mxu1 %v6077_v27  ;;  %v6142_v27 = vcombine.high %v3778_v10, %v3782_v22 }
 0x86a   :  { %5420 = vmatpush1.bf16.msra.mxu0 %v6079_v28  ;;  %5339 = vmatprep.subr.bf16.mxu1 %v6086_v29  ;;  %v6144_v28 = vcombine.high %v3779_v23, %v3783_v24  ;;  %v3786_v29 = vld [vmem:[#allocation7 + $0x790] sm:$0xff] }
 0x86b   :  { %5421 = vmatprep.subr.bf16.mxu0 %v6088_v31  ;;  %v3790_v31 = vld [vmem:[#allocation7 + $0x7b0] sm:$0xff] }
 0x86c   :  { %v6149_v43 = vcombine.low %v3786_v29, %v3790_v31 }
 0x86d   :  { %5340 = vmatpush1.bf16.msra.mxu1 %v6085_v37  ;;  %v6150_v37 = vcombine.high %v3786_v29, %v3790_v31 }
 0x86e   :  { %5422 = vmatpush1.bf16.msra.mxu0 %v6087_v38  ;;  %5341 = vmatprep.subr.bf16.mxu1 %v6094_v39  ;;  %v6152_v38 = vcombine.high %v3787_v32, %v3791_v33  ;;  %v3794_v39 = vld [vmem:[#allocation7 + $0x7d0] sm:$0xff] }
 0x86f   :  { %5423 = vmatprep.subr.bf16.mxu0 %v6096_v40  ;;  %v3798_v40 = vld [vmem:[#allocation7 + $0x7f0] sm:$0xff] }
 0x871   :  { %5342 = vmatpush1.bf16.msra.mxu1 %v6093_v46  ;;  %v6158_v46 = vcombine.high %v3794_v39, %v3798_v40 }
 0x872   :  { %5424 = vmatpush1.bf16.msra.mxu0 %v6095_v47  ;;  %5343 = vmatprep.subr.bf16.mxu1 %v6102_v48  ;;  %v6160_v47 = vcombine.high %v3795_v41, %v3799_v42  ;;  %v6157_v48 = vcombine.low %v3794_v39, %v3798_v40 }
 0x873   :  { %5425 = vmatprep.subr.bf16.mxu0 %v6104_v49  ;;  %v6159_v49 = vcombine.low %v3795_v41, %v3799_v42 }
 0x875   :  { %5344 = vmatpush1.bf16.msra.mxu1 %v6101_v7  ;;  %v3817_v7 = vrot.slane %v3800_v51, %v7286_v58  ;;  %v3820_v58 = vsub.s32 4, %v7272_v54 }
 0x876   :  { %5426 = vmatpush1.bf16.msra.mxu0 %v6103_v59  ;;  %5345 = vmatprep.subr.bf16.mxu1 %v6110_v60 }
 0x877   :  { %5427 = vmatprep.subr.bf16.mxu0 %v6112_v45  ;;  %v3821_v50 = vrot.slane %v3800_v51, %v3820_v58 }
 0x879   :  { %5346 = vmatpush1.bf16.msra.mxu1 %v6109_v1 }
 0x87a   :  { %5428 = vmatpush1.bf16.msra.mxu0 %v6111_v2  ;;  %5347 = vmatprep.subr.bf16.mxu1 %v6118_v3  ;;  %v3824_v3 = vsub.s32 5, %v7272_v54 }
 0x87b   :  { %5429 = vmatprep.subr.bf16.mxu0 %v6120_v8  ;;  %v3832_v8 = vsub.s32 7, %v7272_v54 }
 0x87c   :  { %v3825_v5 = vrot.slane %v3800_v51, %v3824_v3 }
 0x87d   :  { %5348 = vmatpush1.bf16.msra.mxu1 %v6117_v9  ;;  %v3833_v6 = vrot.slane %v3800_v51, %v3832_v8 }
 0x87e   :  { %5430 = vmatpush1.bf16.msra.mxu0 %v6119_v12  ;;  %5349 = vmatprep.subr.bf16.mxu1 %v6126_v17 }
 0x87f   :  { %5431 = vmatprep.subr.bf16.mxu0 %v6128_v13 }
 0x881   :  { %5350 = vmatpush1.bf16.msra.mxu1 %v6125_v19 }
 0x882   :  { %5432 = vmatpush1.bf16.msra.mxu0 %v6127_v20  ;;  %5351 = vmatprep.subr.bf16.mxu1 %v6134_v21 }
 0x883   :  { %5433 = vmatprep.subr.bf16.mxu0 %v6136_v11 }
 0x885   :  { %5352 = vmatpush1.bf16.msra.mxu1 %v6133_v25 }
 0x886   :  { %5434 = vmatpush1.bf16.msra.mxu0 %v6135_v26  ;;  %5353 = vmatprep.subr.bf16.mxu1 %v6142_v27 }
 0x887   :  { %5435 = vmatprep.subr.bf16.mxu0 %v6144_v28 }
 0x889   :  { %5354 = vmatpush1.bf16.msra.mxu1 %v6141_v34 }
 0x88a   :  { %5436 = vmatpush1.bf16.msra.mxu0 %v6143_v36  ;;  %5355 = vmatprep.subr.bf16.mxu1 %v6150_v37 }
 0x88b   :  { %5437 = vmatprep.subr.bf16.mxu0 %v6152_v38 }
 0x88d   :  { %5356 = vmatpush1.bf16.msra.mxu1 %v6149_v43 }
 0x88e   :  { %5438 = vmatpush1.bf16.msra.mxu0 %v6151_v44  ;;  %5357 = vmatprep.subr.bf16.mxu1 %v6158_v46 }
 0x88f   :  { %5439 = vmatprep.subr.bf16.mxu0 %v6160_v47 }
 0x891   :  { %5358 = vmatpush1.bf16.msra.mxu1 %v6157_v48 }
 0x892   :  { %5440 = vmatpush1.bf16.msra.mxu0 %v6159_v49 }
 0x894   :  { %5360 = vmatmul.mubr.bf16.vlgmr.msra.gmra.mrb[28].mxu1 %v7471_v30 }
 0x895   :  { %5442 = vmatmul.mubr.bf16.vlgmr.msra.gmra.mrb[16].mxu0 %v7471_v30 }
 0x8e7   :  { %v5197_v59 = vpop.f32.mrb[24].mxu1  ;;  %v5279_v60 = vpop.f32.mrb[12].mxu0 }
 0x8e8   :  { %v6235_v45 = vadd.f32 %v5197_v59, %v3805_v52  ;;  %v6237_v61 = vadd.f32 %v5279_v60, %v3813_v53  ;;  %v5199_v62 = vpop.f32.mrb[25].mxu1  ;;  %v5281_v63 = vpop.f32.mrb[13].mxu0 }
 0x8e9   :  { %v6236_v0 = vadd.f32 %v5199_v62, %v3809_v56  ;;  %v6238_v30 = vadd.f32 %v5281_v63, %v3817_v7  ;;  %v5201_v1 = vpop.f32.mrb[26].mxu1  ;;  %v5283_v2 = vpop.f32.mrb[14].mxu0 }
 0x8ea   :  { %5450 = vst [vmem:[%s7544_s3] sm:$0xff] %v6235_v45  ;;  %5452 = vst [vmem:[%s7544_s3 + $0x10] sm:$0xff] %v6237_v61  ;;  %v5202_v55 = vpop.f32.mrb[27].mxu1  ;;  %v5284_v57 = vpop.f32.mrb[15].mxu0 }
 0x8eb   :  { %5451 = vst [vmem:[%s7544_s3 + $0x8] sm:$0xff] %v6236_v0  ;;  %5453 = vst [vmem:[%s7544_s3 + $0x18] sm:$0xff] %v6238_v30 }
 0x967   :  { %v5361_v9 = vpop.f32.mrb[28].mxu1 }
 0x968   :  { %v6239_v12 = vadd.f32 %v5361_v9, %v3821_v50  ;;  %v5443_v17 = vpop.f32.mrb[16].mxu0  ;;  %v5363_v13 = vpop.f32.mrb[29].mxu1 }
 0x969   :  { %v6241_v14 = vadd.f32 %v5443_v17, %v3829_v4  ;;  %v6240_v15 = vadd.f32 %v5363_v13, %v3825_v5  ;;  %v5445_v16 = vpop.f32.mrb[17].mxu0  ;;  %v5365_v18 = vpop.f32.mrb[30].mxu1 }
 0x96a   :  { %5454 = vst [vmem:[%s7544_s3 + $0x20] sm:$0xff] %v6239_v12  ;;  %v6242_v19 = vadd.f32 %v5445_v16, %v3833_v6  ;;  %v5447_v20 = vpop.f32.mrb[18].mxu0  ;;  %v5366_v21 = vpop.f32.mrb[31].mxu1 }
 0x96b   :  { %5456 = vst [vmem:[%s7544_s3 + $0x30] sm:$0xff] %v6241_v14  ;;  %5455 = vst [vmem:[%s7544_s3 + $0x28] sm:$0xff] %v6240_v15  ;;  %v5448_v54 = vpop.f32.mrb[19].mxu0 }
 0x96c   :  { %5457 = vst [vmem:[%s7544_s3 + $0x38] sm:$0xff] %v6242_v19 }
 0x96d   :  { %5462 = vsyncpa [#allocation3], 1 }
 0x96e   :  { %5463 = vsyncpa [#allocation5], 1 }
 0x96f   :  { %5464 = vsyncpa [#allocation8], 1 }

</bundles_post_ra>
